<compile_context>
chip_gen: v7x
topology: tpu7x:2x2x1
jax: 0.10.0
libtpu: 0.0.40
codegen_flags: <defaults>
</compile_context>

<pallas_src>
import functools

import jax
import jax.numpy as jnp
from jax.experimental import pallas as pl
from jax.experimental.pallas import tpu as pltpu

NEG_SLOPE = 0.1
BN_EPS = 1e-5
LANE = 128


def _round_up(x, m):
    return (x + m - 1) // m * m


# ----------------------------- Pallas kernels ------------------------------ #

def _gemm_stats_kernel(p_ref, w_ref, b_ref, y_ref, s_ref, acc_ref, *, m_total, tm):
    """Tiled conv-as-GEMM (bf16 on the MXU, f32 accumulator) + bias.

    Also emits per-row-tile channel sum / sum-of-squares so that *global*
    BatchNorm batch statistics can be formed in pass 2 (per-tile stats would be
    numerically wrong)."""
    # Grid queries hoisted to the kernel top level (never inside pl.when bodies).
    m = pl.program_id(0)
    k = pl.program_id(1)
    nk = pl.num_programs(1)
    # Mask rows that are pure M-padding so they do not pollute the BN stats.
    row = m * tm + jax.lax.broadcasted_iota(jnp.int32, y_ref.shape, 0)
    valid = (row < m_total).astype(jnp.float32)

    @pl.when(k == 0)
    def _():
        acc_ref[...] = jnp.zeros_like(acc_ref)

    acc_ref[...] += jnp.dot(p_ref[...], w_ref[...],
                            preferred_element_type=jnp.float32)

    @pl.when(k == nk - 1)
    def _():
        y = acc_ref[...] + b_ref[...]
        y_ref[...] = y
        yv = y * valid
        ssum = jnp.sum(yv, axis=0, keepdims=True)
        ssq = jnp.sum(yv * yv, axis=0, keepdims=True)
        s_ref[...] = jnp.concatenate(
            [ssum, ssq, jnp.zeros((6, y.shape[1]), jnp.float32)], axis=0)


def _bn_lrelu_kernel(y_ref, s_ref, g_ref, be_ref, o_ref, *, m_total, n_tiles):
    """Finalize global BN stats from the per-tile partials (tiny, f32) and apply
    (y - mean) * rsqrt(var + eps) * gamma + beta followed by LeakyReLU(0.1)."""
    tot = s_ref[...].reshape(n_tiles, 8, -1).sum(axis=0)     # (8, Coutp)
    inv_m = 1.0 / m_total
    mean = tot[0:1, :] * inv_m
    var = tot[1:2, :] * inv_m - mean * mean                  # biased variance
    scale = g_ref[...] * jax.lax.rsqrt(var + BN_EPS)
    shift = be_ref[...] - mean * scale
    z = y_ref[...] * scale + shift
    o_ref[...] = jnp.where(z >= 0, z, NEG_SLOPE * z)


def _classifier_kernel(x_ref, w1_ref, b1_ref, w2_ref, b2_ref, o_ref):
    # Linear(feat,100->padded 128) -> LeakyReLU(0.1) -> Linear(100->128, 1->128)
    h = jnp.dot(x_ref[...], w1_ref[...], preferred_element_type=jnp.float32) + b1_ref[...]
    h = jnp.where(h >= 0, h, NEG_SLOPE * h)
    o_ref[...] = jnp.dot(h, w2_ref[...], preferred_element_type=jnp.float32) + b2_ref[...]


# ------------------------------- conv wrapper ------------------------------ #

def conv_bn_lrelu(x_nhwc, w, bias, gamma, beta, *, stride, pad):
    """x_nhwc: (N, H, W, Cin); w: (KH, KW, Cin, Cout). Returns (N, OH, OW, Cout)."""
    N, H, W, Cin = x_nhwc.shape
    KH, KW, _, Cout = w.shape
    OH = (H + 2 * pad - KH) // stride + 1
    OW = (W + 2 * pad - KW) // stride + 1
    M = N * OH * OW
    K = KH * KW * Cin

    # im2col (layout glue; cast to bf16 to halve DMA bytes into the GEMM).
    # TODO(synk): replace the HBM-materialized im2col with in-kernel shifted-window
    # DMA (kh*kw grid axis) to cut HBM read traffic ~K-fold on deeper layers.
    xp = jnp.pad(x_nhwc, ((0, 0), (pad, pad), (pad, pad), (0, 0)))
    cols = []
    for i in range(KH):
        for j in range(KW):
            cols.append(xp[:, i:i + stride * OH:stride, j:j + stride * OW:stride, :])
    patches = jnp.concatenate(cols, axis=-1).reshape(M, K)

    # Padded / tiled shapes: lane-dense Cout, K padded to 128, (8,128)-aligned rows.
    Coutp = _round_up(Cout, LANE)
    Kp = _round_up(K, LANE)
    TK = Kp if Kp <= 2048 else 2048
    Kp = _round_up(Kp, TK)
    TM = min(512, _round_up(M, 16))
    Mp = _round_up(M, TM)
    n_m, n_k = Mp // TM, Kp // TK

    patches = jnp.pad(patches, ((0, Mp - M), (0, Kp - K))).astype(jnp.bfloat16)
    w2d = jnp.pad(w.reshape(K, Cout),
                  ((0, Kp - K), (0, Coutp - Cout))).astype(jnp.bfloat16)
    b_p = jnp.pad(bias, (0, Coutp - Cout)).reshape(1, Coutp)
    g_p = jnp.pad(gamma, (0, Coutp - Cout)).reshape(1, Coutp)
    be_p = jnp.pad(beta, (0, Coutp - Cout)).reshape(1, Coutp)

    # Pass 1: tiled GEMM + bias + per-tile BN partial statistics.
    y, stats = pl.pallas_call(
        functools.partial(_gemm_stats_kernel, m_total=M, tm=TM),
        out_shape=(jax.ShapeDtypeStruct((Mp, Coutp), jnp.float32),
                   jax.ShapeDtypeStruct((n_m * 8, Coutp), jnp.float32)),
        grid=(n_m, n_k),
        in_specs=[pl.BlockSpec((TM, TK), lambda m, k: (m, k)),       # patches tile
                  pl.BlockSpec((TK, Coutp), lambda m, k: (k, 0)),    # weight slab
                  pl.BlockSpec((1, Coutp), lambda m, k: (0, 0))],    # bias (resident)
        out_specs=(pl.BlockSpec((TM, Coutp), lambda m, k: (m, 0)),
                   pl.BlockSpec((8, Coutp), lambda m, k: (m, 0))),
        scratch_shapes=[pltpu.VMEM((TM, Coutp), jnp.float32)],
        compiler_params=pltpu.CompilerParams(
            dimension_semantics=("parallel", "arbitrary")),
    )(patches, w2d, b_p)

    # Pass 2: global-stat BatchNorm + LeakyReLU, tiled over rows.
    out = pl.pallas_call(
        functools.partial(_bn_lrelu_kernel, m_total=M, n_tiles=n_m),
        out_shape=jax.ShapeDtypeStruct((Mp, Coutp), jnp.float32),
        grid=(n_m,),
        in_specs=[pl.BlockSpec((TM, Coutp), lambda m: (m, 0)),
                  pl.BlockSpec((n_m * 8, Coutp), lambda m: (0, 0)),  # stats (resident)
                  pl.BlockSpec((1, Coutp), lambda m: (0, 0)),
                  pl.BlockSpec((1, Coutp), lambda m: (0, 0))],
        out_specs=pl.BlockSpec((TM, Coutp), lambda m: (m, 0)),
        compiler_params=pltpu.CompilerParams(
            dimension_semantics=("parallel",)),
    )(y, stats, g_p, be_p)

    return out[:M, :Cout].reshape(N, OH, OW, Cout)


# ------------------------------ parameter init ----------------------------- #

def _kaiming_normal(key, shape, fan_in, scale=1.0):
    # kaiming_normal_(a=0, mode='fan_in'): std = sqrt(2 / fan_in)
    std = (2.0 / fan_in) ** 0.5
    return (scale * std * jax.random.normal(key, shape, dtype=jnp.float32)).astype(jnp.float32)


def init_disblock(key, cin, cout):
    # conv1: 3x3 s1 p1; conv2: 4x4 s2 p1; weights scaled by 0.1 (initialize_weights),
    # conv biases zeroed (or absent), BatchNorm gamma=1 / beta=0.
    k1, k2 = jax.random.split(key)
    return {
        "w1": _kaiming_normal(k1, (3, 3, cin, cout), fan_in=cin * 9, scale=0.1),
        "b1": jnp.zeros((cout,), jnp.float32),
        "g1": jnp.ones((cout,), jnp.float32),
        "be1": jnp.zeros((cout,), jnp.float32),
        "w2": _kaiming_normal(k2, (4, 4, cout, cout), fan_in=cout * 16, scale=0.1),
        "b2": jnp.zeros((cout,), jnp.float32),
        "g2": jnp.ones((cout,), jnp.float32),
        "be2": jnp.zeros((cout,), jnp.float32),
    }


def init_discriminator(key, in_channels, num_features, dis_blocks):
    keys = jax.random.split(key, dis_blocks + 1)
    params = {"image_to_features": init_disblock(keys[0], in_channels, num_features),
              "features": []}
    for i in range(dis_blocks - 1):
        cin = num_features * min(2 ** i, 8)
        cout = num_features * min(2 ** (i + 1), 8)
        params["features"].append(init_disblock(keys[1 + i], cin, cout))

    feat_dim = num_features * min(2 ** (dis_blocks - 1), 8) * 4 * 4
    feat_dim_p = _round_up(feat_dim, LANE)
    k1, k2, k3, k4 = jax.random.split(keys[-1], 4)
    fc1_w = _kaiming_normal(k1, (feat_dim, 100), fan_in=feat_dim)
    fc1_b = jax.random.uniform(k2, (100,), jnp.float32,
                               -1.0 / feat_dim ** 0.5, 1.0 / feat_dim ** 0.5)
    fc2_w = _kaiming_normal(k3, (100, 1), fan_in=100)
    fc2_b = jax.random.uniform(k4, (1,), jnp.float32, -0.1, 0.1)
    # Lane-dense padded copies (hidden 100 -> 128, output 1 -> 128) for the kernel;
    # padded rows/cols are zero so the math is unchanged.
    params["fc1_w"] = jnp.pad(fc1_w, ((0, feat_dim_p - feat_dim), (0, 128 - 100)))
    params["fc1_b"] = jnp.pad(fc1_b, (0, 128 - 100)).reshape(1, 128)
    params["fc2_w"] = jnp.pad(fc2_w, ((0, 128 - 100), (0, LANE - 1)))
    params["fc2_b"] = jnp.pad(fc2_b, (0, LANE - 1)).reshape(1, LANE)
    return params


# --------------------------------- forward --------------------------------- #

def apply_disblock(p, x):
    x = conv_bn_lrelu(x, p["w1"], p["b1"], p["g1"], p["be1"], stride=1, pad=1)
    x = conv_bn_lrelu(x, p["w2"], p["b2"], p["g2"], p["be2"], stride=2, pad=1)
    return x


def classifier_forward(params, x_flat):
    N, F = x_flat.shape
    Fp = _round_up(F, LANE)
    x_p = jnp.pad(x_flat, ((0, 0), (0, Fp - F)))
    # Whole-array blocks (tiny operands): default VMEM residency, single kernel.
    out = pl.pallas_call(
        _classifier_kernel,
        out_shape=jax.ShapeDtypeStruct((N, LANE), jnp.float32),
    )(x_p, params["fc1_w"], params["fc1_b"], params["fc2_w"], params["fc2_b"])
    return out[:, :1]


def discriminator_forward(params, x_nchw, dis_blocks):
    crop = 4 * (2 ** dis_blocks)
    N, _, H, W = x_nchw.shape
    top, left = (H - crop) // 2, (W - crop) // 2
    x = x_nchw[:, :, top:top + crop, left:left + crop]          # center_crop
    x = jnp.transpose(x, (0, 2, 3, 1))                          # NCHW -> NHWC
    x = apply_disblock(params["image_to_features"], x)
    for bp in params["features"]:
        x = apply_disblock(bp, x)
    # torch flatten(start_dim=1) flattens (C, H, W) order -> go back to NCHW first.
    x = jnp.transpose(x, (0, 3, 1, 2)).reshape(N, -1)
    return classifier_forward(params, x)


# ----------------------------------- main ----------------------------------- #

if __name__ == "__main__":
    in_channels, num_features, dis_blocks = 3, 8, 2   # crop_size = 4 * 2**2 = 16
    key = jax.random.PRNGKey(0)
    kx, kp = jax.random.split(key)
    x = jax.random.normal(kx, (2, in_channels, 20, 20), dtype=jnp.float32)
    params = init_discriminator(kp, in_channels, num_features, dis_blocks)

    fwd = jax.jit(discriminator_forward, static_argnums=2)
    out = fwd(params, x, dis_blocks)
    out = jax.block_until_ready(out)
    assert out.shape == (2, 1) and out.dtype == jnp.float32
    print("KERNEL_OK")
</pallas_src>

<mosaic_0001>
module attributes {stable_mosaic.version = 11 : i64} {
  func.func @_gemm_stats_kernel(%arg0: i32, %arg1: i32, %arg2: memref<512x128xbf16, #tpu.memory_space<vmem>>, %arg3: memref<128x128xbf16, #tpu.memory_space<vmem>>, %arg4: memref<1x128xf32, #tpu.memory_space<vmem>>, %arg5: memref<512x128xf32, #tpu.memory_space<vmem>>, %arg6: memref<8x128xf32, #tpu.memory_space<vmem>>, %arg7: memref<512x128xf32, #tpu.memory_space<vmem>>) attributes {dimension_semantics = [#tpu.dimension_semantics<parallel>, #tpu.dimension_semantics<arbitrary>], iteration_bounds = array<i64: 1, 1>, scalar_prefetch = 0 : i64, scratch_operands = 1 : i64, tpu.core_type = #tpu.core_type<tc>, window_params = [{transform_indices = @transform_0, window_bounds = array<i64: 512, 128>}, {transform_indices = @transform_1, window_bounds = array<i64: 128, 128>}, {pipeline_mode = #tpu.pipeline_mode<synchronous>, transform_indices = @transform_2, window_bounds = array<i64: 1, 128>}, {transform_indices = @transform_3, window_bounds = array<i64: 512, 128>}, {transform_indices = @transform_4, window_bounds = array<i64: 8, 128>}]} {
    %c512_i32 = arith.constant 512 : i32
    %0 = arith.muli %arg0, %c512_i32 : i32
    %1 = tpu.iota {dimensions = array<i32: 0>} : vector<512x128xi32>
    %2 = vector.broadcast %0 : i32 to vector<512x128xi32>
    %3 = arith.addi %2, %1 : vector<512x128xi32>
    %c512_i32_0 = arith.constant 512 : i32
    %4 = vector.broadcast %c512_i32_0 : i32 to vector<512x128xi32>
    %5 = arith.cmpi slt, %3, %4 : vector<512x128xi32>
    %6 = arith.extui %5 : vector<512x128xi1> to vector<512x128xi32>
    %7 = arith.sitofp %6 : vector<512x128xi32> to vector<512x128xf32>
    %c0_i32 = arith.constant 0 : i32
    %8 = arith.cmpi eq, %arg1, %c0_i32 : i32
    %9 = arith.extui %8 : i1 to i32
    %c0_i32_1 = arith.constant 0 : i32
    %10 = arith.cmpi ne, %9, %c0_i32_1 : i32
    scf.if %10 {
      %cst_11 = arith.constant 0.000000e+00 : f32
      %20 = vector.broadcast %cst_11 : f32 to vector<512x128xf32>
      %c0_12 = arith.constant 0 : index
      %c0_13 = arith.constant 0 : index
      %21 = vector.load %arg7[%c0_12, %c0_13] : memref<512x128xf32, #tpu.memory_space<vmem>>, vector<512x128xf32>
      tpu.vector_store %arg7[%c0_12, %c0_13], %20 {strides = array<i32>} : memref<512x128xf32, #tpu.memory_space<vmem>>, vector<512x128xf32>,
    } else {
    }
    %c0 = arith.constant 0 : index
    %c0_2 = arith.constant 0 : index
    %11 = vector.load %arg7[%c0, %c0_2] : memref<512x128xf32, #tpu.memory_space<vmem>>, vector<512x128xf32>
    %c0_3 = arith.constant 0 : index
    %c0_4 = arith.constant 0 : index
    %12 = vector.load %arg2[%c0_3, %c0_4] : memref<512x128xbf16, #tpu.memory_space<vmem>>, vector<512x128xbf16>
    %c0_5 = arith.constant 0 : index
    %c0_6 = arith.constant 0 : index
    %13 = vector.load %arg3[%c0_5, %c0_6] : memref<128x128xbf16, #tpu.memory_space<vmem>>, vector<128x128xbf16>
    %cst = arith.constant dense<0.000000e+00> : vector<512x128xf32>
    %14 = tpu.matmul %12, %13, %cst {dimension_numbers = #tpu.dot_dimension_numbers<[1], [0], [0], [1], [0, 0, 1, 1], [], []>} : vector<512x128xbf16>, vector<128x128xbf16>, vector<512x128xf32> -> vector<512x128xf32>
    %15 = arith.addf %11, %14 : vector<512x128xf32>
    %c0_7 = arith.constant 0 : index
    %c0_8 = arith.constant 0 : index
    %16 = vector.load %arg7[%c0_7, %c0_8] : memref<512x128xf32, #tpu.memory_space<vmem>>, vector<512x128xf32>
    tpu.vector_store %arg7[%c0_7, %c0_8], %15 {strides = array<i32>} : memref<512x128xf32, #tpu.memory_space<vmem>>, vector<512x128xf32>,
    %c0_i32_9 = arith.constant 0 : i32
    %17 = arith.cmpi eq, %arg1, %c0_i32_9 : i32
    %18 = arith.extui %17 : i1 to i32
    %c0_i32_10 = arith.constant 0 : i32
    %19 = arith.cmpi ne, %18, %c0_i32_10 : i32
    scf.if %19 {
      %c0_11 = arith.constant 0 : index
      %c0_12 = arith.constant 0 : index
      %20 = vector.load %arg7[%c0_11, %c0_12] : memref<512x128xf32, #tpu.memory_space<vmem>>, vector<512x128xf32>
      %c0_13 = arith.constant 0 : index
      %c0_14 = arith.constant 0 : index
      %21 = vector.load %arg4[%c0_13, %c0_14] : memref<1x128xf32, #tpu.memory_space<vmem>>, vector<1x128xf32>
      %22 = vector.broadcast %21 : vector<1x128xf32> to vector<512x128xf32>
      %23 = arith.addf %20, %22 : vector<512x128xf32>
      %c0_15 = arith.constant 0 : index
      %c0_16 = arith.constant 0 : index
      %24 = vector.load %arg5[%c0_15, %c0_16] : memref<512x128xf32, #tpu.memory_space<vmem>>, vector<512x128xf32>
      tpu.vector_store %arg5[%c0_15, %c0_16], %23 {strides = array<i32>} : memref<512x128xf32, #tpu.memory_space<vmem>>, vector<512x128xf32>,
      %25 = arith.mulf %23, %7 : vector<512x128xf32>
      %cst_17 = arith.constant dense<0.000000e+00> : vector<128xf32>
      %26 = vector.multi_reduction <add>, %25, %cst_17 [0] : vector<512x128xf32> to vector<128xf32>
      %27 = vector.shape_cast %26 : vector<128xf32> to vector<1x128xf32>
      %28 = arith.mulf %25, %25 : vector<512x128xf32>
      %cst_18 = arith.constant dense<0.000000e+00> : vector<128xf32>
      %29 = vector.multi_reduction <add>, %28, %cst_18 [0] : vector<512x128xf32> to vector<128xf32>
      %30 = vector.shape_cast %29 : vector<128xf32> to vector<1x128xf32>
      %cst_19 = arith.constant 0.000000e+00 : f32
      %31 = vector.broadcast %cst_19 : f32 to vector<6x128xf32>
      %32 = tpu.concatenate %27, %30, %31 in 0 : vector<1x128xf32>, vector<1x128xf32>, vector<6x128xf32> -> vector<8x128xf32>
      %c0_20 = arith.constant 0 : index
      %c0_21 = arith.constant 0 : index
      %33 = vector.load %arg6[%c0_20, %c0_21] : memref<8x128xf32, #tpu.memory_space<vmem>>, vector<8x128xf32>
      tpu.vector_store %arg6[%c0_20, %c0_21], %32 {strides = array<i32>} : memref<8x128xf32, #tpu.memory_space<vmem>>, vector<8x128xf32>,
    } else {
    }
    return
  }
  func.func @transform_0(%arg0: i32, %arg1: i32) -> (i32, i32) {
    %c0_i32 = arith.constant 0 : i32
    return %arg0, %arg1 : i32, i32
  }
  func.func @transform_1(%arg0: i32, %arg1: i32) -> (i32, i32) {
    %c0_i32 = arith.constant 0 : i32
    %c0_i32_0 = arith.constant 0 : i32
    return %arg1, %c0_i32 : i32, i32
  }
  func.func @transform_2(%arg0: i32, %arg1: i32) -> (i32, i32) {
    %c0_i32 = arith.constant 0 : i32
    %c0_i32_0 = arith.constant 0 : i32
    %c0_i32_1 = arith.constant 0 : i32
    return %c0_i32, %c0_i32_0 : i32, i32
  }
  func.func @transform_3(%arg0: i32, %arg1: i32) -> (i32, i32) {
    %c0_i32 = arith.constant 0 : i32
    %c0_i32_0 = arith.constant 0 : i32
    return %arg0, %c0_i32 : i32, i32
  }
  func.func @transform_4(%arg0: i32, %arg1: i32) -> (i32, i32) {
    %c0_i32 = arith.constant 0 : i32
    %c0_i32_0 = arith.constant 0 : i32
    return %arg0, %c0_i32 : i32, i32
  }
}

module attributes {stable_mosaic.version = 11 : i64} {
  func.func @_bn_lrelu_kernel(%arg0: i32, %arg1: memref<512x128xf32, #tpu.memory_space<vmem>>, %arg2: memref<8x128xf32, #tpu.memory_space<vmem>>, %arg3: memref<1x128xf32, #tpu.memory_space<vmem>>, %arg4: memref<1x128xf32, #tpu.memory_space<vmem>>, %arg5: memref<512x128xf32, #tpu.memory_space<vmem>>) attributes {dimension_semantics = [#tpu.dimension_semantics<parallel>], iteration_bounds = array<i64: 1>, scalar_prefetch = 0 : i64, scratch_operands = 0 : i64, tpu.core_type = #tpu.core_type<tc>, window_params = [{transform_indices = @transform_0, window_bounds = array<i64: 512, 128>}, {pipeline_mode = #tpu.pipeline_mode<synchronous>, transform_indices = @transform_1, window_bounds = array<i64: 8, 128>}, {pipeline_mode = #tpu.pipeline_mode<synchronous>, transform_indices = @transform_2, window_bounds = array<i64: 1, 128>}, {pipeline_mode = #tpu.pipeline_mode<synchronous>, transform_indices = @transform_3, window_bounds = array<i64: 1, 128>}, {transform_indices = @transform_4, window_bounds = array<i64: 512, 128>}]} {
    %c0 = arith.constant 0 : index
    %c0_0 = arith.constant 0 : index
    %0 = vector.load %arg2[%c0, %c0_0] : memref<8x128xf32, #tpu.memory_space<vmem>>, vector<8x128xf32>
    %1 = vector.shape_cast %0 : vector<8x128xf32> to vector<1x8x128xf32>
    %cst = arith.constant dense<0.000000e+00> : vector<8x128xf32>
    %2 = vector.multi_reduction <add>, %1, %cst [0] : vector<1x8x128xf32> to vector<8x128xf32>
    %3 = vector.extract_strided_slice %2 {offsets = [0, 0], sizes = [1, 128], strides = [1, 1]} : vector<8x128xf32> to vector<1x128xf32>
    %cst_1 = arith.constant 0.001953125 : f32
    %4 = vector.broadcast %cst_1 : f32 to vector<1x128xf32>
    %5 = arith.mulf %3, %4 : vector<1x128xf32>
    %6 = vector.extract_strided_slice %2 {offsets = [1, 0], sizes = [1, 128], strides = [1, 1]} : vector<8x128xf32> to vector<1x128xf32>
    %cst_2 = arith.constant 0.001953125 : f32
    %7 = vector.broadcast %cst_2 : f32 to vector<1x128xf32>
    %8 = arith.mulf %6, %7 : vector<1x128xf32>
    %9 = arith.mulf %5, %5 : vector<1x128xf32>
    %10 = arith.subf %8, %9 : vector<1x128xf32>
    %c0_3 = arith.constant 0 : index
    %c0_4 = arith.constant 0 : index
    %11 = vector.load %arg3[%c0_3, %c0_4] : memref<1x128xf32, #tpu.memory_space<vmem>>, vector<1x128xf32>
    %cst_5 = arith.constant 9.99999974E-6 : f32
    %12 = vector.broadcast %cst_5 : f32 to vector<1x128xf32>
    %13 = arith.addf %10, %12 : vector<1x128xf32>
    %14 = math.rsqrt %13 : vector<1x128xf32>
    %15 = arith.mulf %11, %14 : vector<1x128xf32>
    %c0_6 = arith.constant 0 : index
    %c0_7 = arith.constant 0 : index
    %16 = vector.load %arg4[%c0_6, %c0_7] : memref<1x128xf32, #tpu.memory_space<vmem>>, vector<1x128xf32>
    %17 = arith.mulf %5, %15 : vector<1x128xf32>
    %18 = arith.subf %16, %17 : vector<1x128xf32>
    %c0_8 = arith.constant 0 : index
    %c0_9 = arith.constant 0 : index
    %19 = vector.load %arg1[%c0_8, %c0_9] : memref<512x128xf32, #tpu.memory_space<vmem>>, vector<512x128xf32>
    %20 = vector.broadcast %15 : vector<1x128xf32> to vector<512x128xf32>
    %21 = arith.mulf %19, %20 : vector<512x128xf32>
    %22 = vector.broadcast %18 : vector<1x128xf32> to vector<512x128xf32>
    %23 = arith.addf %21, %22 : vector<512x128xf32>
    %cst_10 = arith.constant 0.000000e+00 : f32
    %24 = vector.broadcast %cst_10 : f32 to vector<512x128xf32>
    %25 = arith.cmpf oge, %23, %24 : vector<512x128xf32>
    %cst_11 = arith.constant 1.000000e-01 : f32
    %26 = vector.broadcast %cst_11 : f32 to vector<512x128xf32>
    %27 = arith.mulf %26, %23 : vector<512x128xf32>
    %28 = arith.select %25, %23, %27 : vector<512x128xi1>, vector<512x128xf32>
    %c0_12 = arith.constant 0 : index
    %c0_13 = arith.constant 0 : index
    %29 = vector.load %arg5[%c0_12, %c0_13] : memref<512x128xf32, #tpu.memory_space<vmem>>, vector<512x128xf32>
    tpu.vector_store %arg5[%c0_12, %c0_13], %28 {strides = array<i32>} : memref<512x128xf32, #tpu.memory_space<vmem>>, vector<512x128xf32>,
    return
  }
  func.func @transform_0(%arg0: i32) -> (i32, i32) {
    %c0_i32 = arith.constant 0 : i32
    %c0_i32_0 = arith.constant 0 : i32
    return %arg0, %c0_i32 : i32, i32
  }
  func.func @transform_1(%arg0: i32) -> (i32, i32) {
    %c0_i32 = arith.constant 0 : i32
    %c0_i32_0 = arith.constant 0 : i32
    %c0_i32_1 = arith.constant 0 : i32
    return %c0_i32, %c0_i32_0 : i32, i32
  }
  func.func @transform_2(%arg0: i32) -> (i32, i32) {
    %c0_i32 = arith.constant 0 : i32
    %c0_i32_0 = arith.constant 0 : i32
    %c0_i32_1 = arith.constant 0 : i32
    return %c0_i32, %c0_i32_0 : i32, i32
  }
  func.func @transform_3(%arg0: i32) -> (i32, i32) {
    %c0_i32 = arith.constant 0 : i32
    %c0_i32_0 = arith.constant 0 : i32
    %c0_i32_1 = arith.constant 0 : i32
    return %c0_i32, %c0_i32_0 : i32, i32
  }
  func.func @transform_4(%arg0: i32) -> (i32, i32) {
    %c0_i32 = arith.constant 0 : i32
    %c0_i32_0 = arith.constant 0 : i32
    return %arg0, %c0_i32 : i32, i32
  }
}

module attributes {stable_mosaic.version = 11 : i64} {
  func.func @_gemm_stats_kernel(%arg0: i32, %arg1: i32, %arg2: memref<128x128xbf16, #tpu.memory_space<vmem>>, %arg3: memref<128x128xbf16, #tpu.memory_space<vmem>>, %arg4: memref<1x128xf32, #tpu.memory_space<vmem>>, %arg5: memref<128x128xf32, #tpu.memory_space<vmem>>, %arg6: memref<8x128xf32, #tpu.memory_space<vmem>>, %arg7: memref<128x128xf32, #tpu.memory_space<vmem>>) attributes {dimension_semantics = [#tpu.dimension_semantics<parallel>, #tpu.dimension_semantics<arbitrary>], iteration_bounds = array<i64: 1, 1>, scalar_prefetch = 0 : i64, scratch_operands = 1 : i64, tpu.core_type = #tpu.core_type<tc>, window_params = [{transform_indices = @transform_0, window_bounds = array<i64: 128, 128>}, {transform_indices = @transform_1, window_bounds = array<i64: 128, 128>}, {pipeline_mode = #tpu.pipeline_mode<synchronous>, transform_indices = @transform_2, window_bounds = array<i64: 1, 128>}, {transform_indices = @transform_3, window_bounds = array<i64: 128, 128>}, {transform_indices = @transform_4, window_bounds = array<i64: 8, 128>}]} {
    %c128_i32 = arith.constant 128 : i32
    %0 = arith.muli %arg0, %c128_i32 : i32
    %1 = tpu.iota {dimensions = array<i32: 0>} : vector<128x128xi32>
    %2 = vector.broadcast %0 : i32 to vector<128x128xi32>
    %3 = arith.addi %2, %1 : vector<128x128xi32>
    %c128_i32_0 = arith.constant 128 : i32
    %4 = vector.broadcast %c128_i32_0 : i32 to vector<128x128xi32>
    %5 = arith.cmpi slt, %3, %4 : vector<128x128xi32>
    %6 = arith.extui %5 : vector<128x128xi1> to vector<128x128xi32>
    %7 = arith.sitofp %6 : vector<128x128xi32> to vector<128x128xf32>
    %c0_i32 = arith.constant 0 : i32
    %8 = arith.cmpi eq, %arg1, %c0_i32 : i32
    %9 = arith.extui %8 : i1 to i32
    %c0_i32_1 = arith.constant 0 : i32
    %10 = arith.cmpi ne, %9, %c0_i32_1 : i32
    scf.if %10 {
      %cst_11 = arith.constant 0.000000e+00 : f32
      %20 = vector.broadcast %cst_11 : f32 to vector<128x128xf32>
      %c0_12 = arith.constant 0 : index
      %c0_13 = arith.constant 0 : index
      %21 = vector.load %arg7[%c0_12, %c0_13] : memref<128x128xf32, #tpu.memory_space<vmem>>, vector<128x128xf32>
      tpu.vector_store %arg7[%c0_12, %c0_13], %20 {strides = array<i32>} : memref<128x128xf32, #tpu.memory_space<vmem>>, vector<128x128xf32>,
    } else {
    }
    %c0 = arith.constant 0 : index
    %c0_2 = arith.constant 0 : index
    %11 = vector.load %arg7[%c0, %c0_2] : memref<128x128xf32, #tpu.memory_space<vmem>>, vector<128x128xf32>
    %c0_3 = arith.constant 0 : index
    %c0_4 = arith.constant 0 : index
    %12 = vector.load %arg2[%c0_3, %c0_4] : memref<128x128xbf16, #tpu.memory_space<vmem>>, vector<128x128xbf16>
    %c0_5 = arith.constant 0 : index
    %c0_6 = arith.constant 0 : index
    %13 = vector.load %arg3[%c0_5, %c0_6] : memref<128x128xbf16, #tpu.memory_space<vmem>>, vector<128x128xbf16>
    %cst = arith.constant dense<0.000000e+00> : vector<128x128xf32>
    %14 = tpu.matmul %12, %13, %cst {dimension_numbers = #tpu.dot_dimension_numbers<[1], [0], [0], [1], [0, 0, 1, 1], [], []>} : vector<128x128xbf16>, vector<128x128xbf16>, vector<128x128xf32> -> vector<128x128xf32>
    %15 = arith.addf %11, %14 : vector<128x128xf32>
    %c0_7 = arith.constant 0 : index
    %c0_8 = arith.constant 0 : index
    %16 = vector.load %arg7[%c0_7, %c0_8] : memref<128x128xf32, #tpu.memory_space<vmem>>, vector<128x128xf32>
    tpu.vector_store %arg7[%c0_7, %c0_8], %15 {strides = array<i32>} : memref<128x128xf32, #tpu.memory_space<vmem>>, vector<128x128xf32>,
    %c0_i32_9 = arith.constant 0 : i32
    %17 = arith.cmpi eq, %arg1, %c0_i32_9 : i32
    %18 = arith.extui %17 : i1 to i32
    %c0_i32_10 = arith.constant 0 : i32
    %19 = arith.cmpi ne, %18, %c0_i32_10 : i32
    scf.if %19 {
      %c0_11 = arith.constant 0 : index
      %c0_12 = arith.constant 0 : index
      %20 = vector.load %arg7[%c0_11, %c0_12] : memref<128x128xf32, #tpu.memory_space<vmem>>, vector<128x128xf32>
      %c0_13 = arith.constant 0 : index
      %c0_14 = arith.constant 0 : index
      %21 = vector.load %arg4[%c0_13, %c0_14] : memref<1x128xf32, #tpu.memory_space<vmem>>, vector<1x128xf32>
      %22 = vector.broadcast %21 : vector<1x128xf32> to vector<128x128xf32>
      %23 = arith.addf %20, %22 : vector<128x128xf32>
      %c0_15 = arith.constant 0 : index
      %c0_16 = arith.constant 0 : index
      %24 = vector.load %arg5[%c0_15, %c0_16] : memref<128x128xf32, #tpu.memory_space<vmem>>, vector<128x128xf32>
      tpu.vector_store %arg5[%c0_15, %c0_16], %23 {strides = array<i32>} : memref<128x128xf32, #tpu.memory_space<vmem>>, vector<128x128xf32>,
      %25 = arith.mulf %23, %7 : vector<128x128xf32>
      %cst_17 = arith.constant dense<0.000000e+00> : vector<128xf32>
      %26 = vector.multi_reduction <add>, %25, %cst_17 [0] : vector<128x128xf32> to vector<128xf32>
      %27 = vector.shape_cast %26 : vector<128xf32> to vector<1x128xf32>
      %28 = arith.mulf %25, %25 : vector<128x128xf32>
      %cst_18 = arith.constant dense<0.000000e+00> : vector<128xf32>
      %29 = vector.multi_reduction <add>, %28, %cst_18 [0] : vector<128x128xf32> to vector<128xf32>
      %30 = vector.shape_cast %29 : vector<128xf32> to vector<1x128xf32>
      %cst_19 = arith.constant 0.000000e+00 : f32
      %31 = vector.broadcast %cst_19 : f32 to vector<6x128xf32>
      %32 = tpu.concatenate %27, %30, %31 in 0 : vector<1x128xf32>, vector<1x128xf32>, vector<6x128xf32> -> vector<8x128xf32>
      %c0_20 = arith.constant 0 : index
      %c0_21 = arith.constant 0 : index
      %33 = vector.load %arg6[%c0_20, %c0_21] : memref<8x128xf32, #tpu.memory_space<vmem>>, vector<8x128xf32>
      tpu.vector_store %arg6[%c0_20, %c0_21], %32 {strides = array<i32>} : memref<8x128xf32, #tpu.memory_space<vmem>>, vector<8x128xf32>,
    } else {
    }
    return
  }
  func.func @transform_0(%arg0: i32, %arg1: i32) -> (i32, i32) {
    %c0_i32 = arith.constant 0 : i32
    return %arg0, %arg1 : i32, i32
  }
  func.func @transform_1(%arg0: i32, %arg1: i32) -> (i32, i32) {
    %c0_i32 = arith.constant 0 : i32
    %c0_i32_0 = arith.constant 0 : i32
    return %arg1, %c0_i32 : i32, i32
  }
  func.func @transform_2(%arg0: i32, %arg1: i32) -> (i32, i32) {
    %c0_i32 = arith.constant 0 : i32
    %c0_i32_0 = arith.constant 0 : i32
    %c0_i32_1 = arith.constant 0 : i32
    return %c0_i32, %c0_i32_0 : i32, i32
  }
  func.func @transform_3(%arg0: i32, %arg1: i32) -> (i32, i32) {
    %c0_i32 = arith.constant 0 : i32
    %c0_i32_0 = arith.constant 0 : i32
    return %arg0, %c0_i32 : i32, i32
  }
  func.func @transform_4(%arg0: i32, %arg1: i32) -> (i32, i32) {
    %c0_i32 = arith.constant 0 : i32
    %c0_i32_0 = arith.constant 0 : i32
    return %arg0, %c0_i32 : i32, i32
  }
}

module attributes {stable_mosaic.version = 11 : i64} {
  func.func @_bn_lrelu_kernel(%arg0: i32, %arg1: memref<128x128xf32, #tpu.memory_space<vmem>>, %arg2: memref<8x128xf32, #tpu.memory_space<vmem>>, %arg3: memref<1x128xf32, #tpu.memory_space<vmem>>, %arg4: memref<1x128xf32, #tpu.memory_space<vmem>>, %arg5: memref<128x128xf32, #tpu.memory_space<vmem>>) attributes {dimension_semantics = [#tpu.dimension_semantics<parallel>], iteration_bounds = array<i64: 1>, scalar_prefetch = 0 : i64, scratch_operands = 0 : i64, tpu.core_type = #tpu.core_type<tc>, window_params = [{transform_indices = @transform_0, window_bounds = array<i64: 128, 128>}, {pipeline_mode = #tpu.pipeline_mode<synchronous>, transform_indices = @transform_1, window_bounds = array<i64: 8, 128>}, {pipeline_mode = #tpu.pipeline_mode<synchronous>, transform_indices = @transform_2, window_bounds = array<i64: 1, 128>}, {pipeline_mode = #tpu.pipeline_mode<synchronous>, transform_indices = @transform_3, window_bounds = array<i64: 1, 128>}, {transform_indices = @transform_4, window_bounds = array<i64: 128, 128>}]} {
    %c0 = arith.constant 0 : index
    %c0_0 = arith.constant 0 : index
    %0 = vector.load %arg2[%c0, %c0_0] : memref<8x128xf32, #tpu.memory_space<vmem>>, vector<8x128xf32>
    %1 = vector.shape_cast %0 : vector<8x128xf32> to vector<1x8x128xf32>
    %cst = arith.constant dense<0.000000e+00> : vector<8x128xf32>
    %2 = vector.multi_reduction <add>, %1, %cst [0] : vector<1x8x128xf32> to vector<8x128xf32>
    %3 = vector.extract_strided_slice %2 {offsets = [0, 0], sizes = [1, 128], strides = [1, 1]} : vector<8x128xf32> to vector<1x128xf32>
    %cst_1 = arith.constant 7.812500e-03 : f32
    %4 = vector.broadcast %cst_1 : f32 to vector<1x128xf32>
    %5 = arith.mulf %3, %4 : vector<1x128xf32>
    %6 = vector.extract_strided_slice %2 {offsets = [1, 0], sizes = [1, 128], strides = [1, 1]} : vector<8x128xf32> to vector<1x128xf32>
    %cst_2 = arith.constant 7.812500e-03 : f32
    %7 = vector.broadcast %cst_2 : f32 to vector<1x128xf32>
    %8 = arith.mulf %6, %7 : vector<1x128xf32>
    %9 = arith.mulf %5, %5 : vector<1x128xf32>
    %10 = arith.subf %8, %9 : vector<1x128xf32>
    %c0_3 = arith.constant 0 : index
    %c0_4 = arith.constant 0 : index
    %11 = vector.load %arg3[%c0_3, %c0_4] : memref<1x128xf32, #tpu.memory_space<vmem>>, vector<1x128xf32>
    %cst_5 = arith.constant 9.99999974E-6 : f32
    %12 = vector.broadcast %cst_5 : f32 to vector<1x128xf32>
    %13 = arith.addf %10, %12 : vector<1x128xf32>
    %14 = math.rsqrt %13 : vector<1x128xf32>
    %15 = arith.mulf %11, %14 : vector<1x128xf32>
    %c0_6 = arith.constant 0 : index
    %c0_7 = arith.constant 0 : index
    %16 = vector.load %arg4[%c0_6, %c0_7] : memref<1x128xf32, #tpu.memory_space<vmem>>, vector<1x128xf32>
    %17 = arith.mulf %5, %15 : vector<1x128xf32>
    %18 = arith.subf %16, %17 : vector<1x128xf32>
    %c0_8 = arith.constant 0 : index
    %c0_9 = arith.constant 0 : index
    %19 = vector.load %arg1[%c0_8, %c0_9] : memref<128x128xf32, #tpu.memory_space<vmem>>, vector<128x128xf32>
    %20 = vector.broadcast %15 : vector<1x128xf32> to vector<128x128xf32>
    %21 = arith.mulf %19, %20 : vector<128x128xf32>
    %22 = vector.broadcast %18 : vector<1x128xf32> to vector<128x128xf32>
    %23 = arith.addf %21, %22 : vector<128x128xf32>
    %cst_10 = arith.constant 0.000000e+00 : f32
    %24 = vector.broadcast %cst_10 : f32 to vector<128x128xf32>
    %25 = arith.cmpf oge, %23, %24 : vector<128x128xf32>
    %cst_11 = arith.constant 1.000000e-01 : f32
    %26 = vector.broadcast %cst_11 : f32 to vector<128x128xf32>
    %27 = arith.mulf %26, %23 : vector<128x128xf32>
    %28 = arith.select %25, %23, %27 : vector<128x128xi1>, vector<128x128xf32>
    %c0_12 = arith.constant 0 : index
    %c0_13 = arith.constant 0 : index
    %29 = vector.load %arg5[%c0_12, %c0_13] : memref<128x128xf32, #tpu.memory_space<vmem>>, vector<128x128xf32>
    tpu.vector_store %arg5[%c0_12, %c0_13], %28 {strides = array<i32>} : memref<128x128xf32, #tpu.memory_space<vmem>>, vector<128x128xf32>,
    return
  }
  func.func @transform_0(%arg0: i32) -> (i32, i32) {
    %c0_i32 = arith.constant 0 : i32
    %c0_i32_0 = arith.constant 0 : i32
    return %arg0, %c0_i32 : i32, i32
  }
  func.func @transform_1(%arg0: i32) -> (i32, i32) {
    %c0_i32 = arith.constant 0 : i32
    %c0_i32_0 = arith.constant 0 : i32
    %c0_i32_1 = arith.constant 0 : i32
    return %c0_i32, %c0_i32_0 : i32, i32
  }
  func.func @transform_2(%arg0: i32) -> (i32, i32) {
    %c0_i32 = arith.constant 0 : i32
    %c0_i32_0 = arith.constant 0 : i32
    %c0_i32_1 = arith.constant 0 : i32
    return %c0_i32, %c0_i32_0 : i32, i32
  }
  func.func @transform_3(%arg0: i32) -> (i32, i32) {
    %c0_i32 = arith.constant 0 : i32
    %c0_i32_0 = arith.constant 0 : i32
    %c0_i32_1 = arith.constant 0 : i32
    return %c0_i32, %c0_i32_0 : i32, i32
  }
  func.func @transform_4(%arg0: i32) -> (i32, i32) {
    %c0_i32 = arith.constant 0 : i32
    %c0_i32_0 = arith.constant 0 : i32
    return %arg0, %c0_i32 : i32, i32
  }
}

module attributes {stable_mosaic.version = 11 : i64} {
  func.func @_bn_lrelu_kernel(%arg0: i32, %arg1: memref<32x128xf32, #tpu.memory_space<vmem>>, %arg2: memref<8x128xf32, #tpu.memory_space<vmem>>, %arg3: memref<1x128xf32, #tpu.memory_space<vmem>>, %arg4: memref<1x128xf32, #tpu.memory_space<vmem>>, %arg5: memref<32x128xf32, #tpu.memory_space<vmem>>) attributes {dimension_semantics = [#tpu.dimension_semantics<parallel>], iteration_bounds = array<i64: 1>, scalar_prefetch = 0 : i64, scratch_operands = 0 : i64, tpu.core_type = #tpu.core_type<tc>, window_params = [{transform_indices = @transform_0, window_bounds = array<i64: 32, 128>}, {pipeline_mode = #tpu.pipeline_mode<synchronous>, transform_indices = @transform_1, window_bounds = array<i64: 8, 128>}, {pipeline_mode = #tpu.pipeline_mode<synchronous>, transform_indices = @transform_2, window_bounds = array<i64: 1, 128>}, {pipeline_mode = #tpu.pipeline_mode<synchronous>, transform_indices = @transform_3, window_bounds = array<i64: 1, 128>}, {transform_indices = @transform_4, window_bounds = array<i64: 32, 128>}]} {
    %c0 = arith.constant 0 : index
    %c0_0 = arith.constant 0 : index
    %0 = vector.load %arg2[%c0, %c0_0] : memref<8x128xf32, #tpu.memory_space<vmem>>, vector<8x128xf32>
    %1 = vector.shape_cast %0 : vector<8x128xf32> to vector<1x8x128xf32>
    %cst = arith.constant dense<0.000000e+00> : vector<8x128xf32>
    %2 = vector.multi_reduction <add>, %1, %cst [0] : vector<1x8x128xf32> to vector<8x128xf32>
    %3 = vector.extract_strided_slice %2 {offsets = [0, 0], sizes = [1, 128], strides = [1, 1]} : vector<8x128xf32> to vector<1x128xf32>
    %cst_1 = arith.constant 3.125000e-02 : f32
    %4 = vector.broadcast %cst_1 : f32 to vector<1x128xf32>
    %5 = arith.mulf %3, %4 : vector<1x128xf32>
    %6 = vector.extract_strided_slice %2 {offsets = [1, 0], sizes = [1, 128], strides = [1, 1]} : vector<8x128xf32> to vector<1x128xf32>
    %cst_2 = arith.constant 3.125000e-02 : f32
    %7 = vector.broadcast %cst_2 : f32 to vector<1x128xf32>
    %8 = arith.mulf %6, %7 : vector<1x128xf32>
    %9 = arith.mulf %5, %5 : vector<1x128xf32>
    %10 = arith.subf %8, %9 : vector<1x128xf32>
    %c0_3 = arith.constant 0 : index
    %c0_4 = arith.constant 0 : index
    %11 = vector.load %arg3[%c0_3, %c0_4] : memref<1x128xf32, #tpu.memory_space<vmem>>, vector<1x128xf32>
    %cst_5 = arith.constant 9.99999974E-6 : f32
    %12 = vector.broadcast %cst_5 : f32 to vector<1x128xf32>
    %13 = arith.addf %10, %12 : vector<1x128xf32>
    %14 = math.rsqrt %13 : vector<1x128xf32>
    %15 = arith.mulf %11, %14 : vector<1x128xf32>
    %c0_6 = arith.constant 0 : index
    %c0_7 = arith.constant 0 : index
    %16 = vector.load %arg4[%c0_6, %c0_7] : memref<1x128xf32, #tpu.memory_space<vmem>>, vector<1x128xf32>
    %17 = arith.mulf %5, %15 : vector<1x128xf32>
    %18 = arith.subf %16, %17 : vector<1x128xf32>
    %c0_8 = arith.constant 0 : index
    %c0_9 = arith.constant 0 : index
    %19 = vector.load %arg1[%c0_8, %c0_9] : memref<32x128xf32, #tpu.memory_space<vmem>>, vector<32x128xf32>
    %20 = vector.broadcast %15 : vector<1x128xf32> to vector<32x128xf32>
    %21 = arith.mulf %19, %20 : vector<32x128xf32>
    %22 = vector.broadcast %18 : vector<1x128xf32> to vector<32x128xf32>
    %23 = arith.addf %21, %22 : vector<32x128xf32>
    %cst_10 = arith.constant 0.000000e+00 : f32
    %24 = vector.broadcast %cst_10 : f32 to vector<32x128xf32>
    %25 = arith.cmpf oge, %23, %24 : vector<32x128xf32>
    %cst_11 = arith.constant 1.000000e-01 : f32
    %26 = vector.broadcast %cst_11 : f32 to vector<32x128xf32>
    %27 = arith.mulf %26, %23 : vector<32x128xf32>
    %28 = arith.select %25, %23, %27 : vector<32x128xi1>, vector<32x128xf32>
    %c0_12 = arith.constant 0 : index
    %c0_13 = arith.constant 0 : index
    %29 = vector.load %arg5[%c0_12, %c0_13] : memref<32x128xf32, #tpu.memory_space<vmem>>, vector<32x128xf32>
    tpu.vector_store %arg5[%c0_12, %c0_13], %28 {strides = array<i32>} : memref<32x128xf32, #tpu.memory_space<vmem>>, vector<32x128xf32>,
    return
  }
  func.func @transform_0(%arg0: i32) -> (i32, i32) {
    %c0_i32 = arith.constant 0 : i32
    %c0_i32_0 = arith.constant 0 : i32
    return %arg0, %c0_i32 : i32, i32
  }
  func.func @transform_1(%arg0: i32) -> (i32, i32) {
    %c0_i32 = arith.constant 0 : i32
    %c0_i32_0 = arith.constant 0 : i32
    %c0_i32_1 = arith.constant 0 : i32
    return %c0_i32, %c0_i32_0 : i32, i32
  }
  func.func @transform_2(%arg0: i32) -> (i32, i32) {
    %c0_i32 = arith.constant 0 : i32
    %c0_i32_0 = arith.constant 0 : i32
    %c0_i32_1 = arith.constant 0 : i32
    return %c0_i32, %c0_i32_0 : i32, i32
  }
  func.func @transform_3(%arg0: i32) -> (i32, i32) {
    %c0_i32 = arith.constant 0 : i32
    %c0_i32_0 = arith.constant 0 : i32
    %c0_i32_1 = arith.constant 0 : i32
    return %c0_i32, %c0_i32_0 : i32, i32
  }
  func.func @transform_4(%arg0: i32) -> (i32, i32) {
    %c0_i32 = arith.constant 0 : i32
    %c0_i32_0 = arith.constant 0 : i32
    return %arg0, %c0_i32 : i32, i32
  }
}

module attributes {stable_mosaic.version = 11 : i64} {
  func.func @_gemm_stats_kernel(%arg0: i32, %arg1: i32, %arg2: memref<32x256xbf16, #tpu.memory_space<vmem>>, %arg3: memref<256x128xbf16, #tpu.memory_space<vmem>>, %arg4: memref<1x128xf32, #tpu.memory_space<vmem>>, %arg5: memref<32x128xf32, #tpu.memory_space<vmem>>, %arg6: memref<8x128xf32, #tpu.memory_space<vmem>>, %arg7: memref<32x128xf32, #tpu.memory_space<vmem>>) attributes {dimension_semantics = [#tpu.dimension_semantics<parallel>, #tpu.dimension_semantics<arbitrary>], iteration_bounds = array<i64: 1, 1>, scalar_prefetch = 0 : i64, scratch_operands = 1 : i64, tpu.core_type = #tpu.core_type<tc>, window_params = [{transform_indices = @transform_0, window_bounds = array<i64: 32, 256>}, {transform_indices = @transform_1, window_bounds = array<i64: 256, 128>}, {pipeline_mode = #tpu.pipeline_mode<synchronous>, transform_indices = @transform_2, window_bounds = array<i64: 1, 128>}, {transform_indices = @transform_3, window_bounds = array<i64: 32, 128>}, {transform_indices = @transform_4, window_bounds = array<i64: 8, 128>}]} {
    %c32_i32 = arith.constant 32 : i32
    %0 = arith.muli %arg0, %c32_i32 : i32
    %1 = tpu.iota {dimensions = array<i32: 0>} : vector<32x128xi32>
    %2 = vector.broadcast %0 : i32 to vector<32x128xi32>
    %3 = arith.addi %2, %1 : vector<32x128xi32>
    %c32_i32_0 = arith.constant 32 : i32
    %4 = vector.broadcast %c32_i32_0 : i32 to vector<32x128xi32>
    %5 = arith.cmpi slt, %3, %4 : vector<32x128xi32>
    %6 = arith.extui %5 : vector<32x128xi1> to vector<32x128xi32>
    %7 = arith.sitofp %6 : vector<32x128xi32> to vector<32x128xf32>
    %c0_i32 = arith.constant 0 : i32
    %8 = arith.cmpi eq, %arg1, %c0_i32 : i32
    %9 = arith.extui %8 : i1 to i32
    %c0_i32_1 = arith.constant 0 : i32
    %10 = arith.cmpi ne, %9, %c0_i32_1 : i32
    scf.if %10 {
      %cst_11 = arith.constant 0.000000e+00 : f32
      %20 = vector.broadcast %cst_11 : f32 to vector<32x128xf32>
      %c0_12 = arith.constant 0 : index
      %c0_13 = arith.constant 0 : index
      %21 = vector.load %arg7[%c0_12, %c0_13] : memref<32x128xf32, #tpu.memory_space<vmem>>, vector<32x128xf32>
      tpu.vector_store %arg7[%c0_12, %c0_13], %20 {strides = array<i32>} : memref<32x128xf32, #tpu.memory_space<vmem>>, vector<32x128xf32>,
    } else {
    }
    %c0 = arith.constant 0 : index
    %c0_2 = arith.constant 0 : index
    %11 = vector.load %arg7[%c0, %c0_2] : memref<32x128xf32, #tpu.memory_space<vmem>>, vector<32x128xf32>
    %c0_3 = arith.constant 0 : index
    %c0_4 = arith.constant 0 : index
    %12 = vector.load %arg2[%c0_3, %c0_4] : memref<32x256xbf16, #tpu.memory_space<vmem>>, vector<32x256xbf16>
    %c0_5 = arith.constant 0 : index
    %c0_6 = arith.constant 0 : index
    %13 = vector.load %arg3[%c0_5, %c0_6] : memref<256x128xbf16, #tpu.memory_space<vmem>>, vector<256x128xbf16>
    %cst = arith.constant dense<0.000000e+00> : vector<32x128xf32>
    %14 = tpu.matmul %12, %13, %cst {dimension_numbers = #tpu.dot_dimension_numbers<[1], [0], [0], [1], [0, 0, 1, 1], [], []>} : vector<32x256xbf16>, vector<256x128xbf16>, vector<32x128xf32> -> vector<32x128xf32>
    %15 = arith.addf %11, %14 : vector<32x128xf32>
    %c0_7 = arith.constant 0 : index
    %c0_8 = arith.constant 0 : index
    %16 = vector.load %arg7[%c0_7, %c0_8] : memref<32x128xf32, #tpu.memory_space<vmem>>, vector<32x128xf32>
    tpu.vector_store %arg7[%c0_7, %c0_8], %15 {strides = array<i32>} : memref<32x128xf32, #tpu.memory_space<vmem>>, vector<32x128xf32>,
    %c0_i32_9 = arith.constant 0 : i32
    %17 = arith.cmpi eq, %arg1, %c0_i32_9 : i32
    %18 = arith.extui %17 : i1 to i32
    %c0_i32_10 = arith.constant 0 : i32
    %19 = arith.cmpi ne, %18, %c0_i32_10 : i32
    scf.if %19 {
      %c0_11 = arith.constant 0 : index
      %c0_12 = arith.constant 0 : index
      %20 = vector.load %arg7[%c0_11, %c0_12] : memref<32x128xf32, #tpu.memory_space<vmem>>, vector<32x128xf32>
      %c0_13 = arith.constant 0 : index
      %c0_14 = arith.constant 0 : index
      %21 = vector.load %arg4[%c0_13, %c0_14] : memref<1x128xf32, #tpu.memory_space<vmem>>, vector<1x128xf32>
      %22 = vector.broadcast %21 : vector<1x128xf32> to vector<32x128xf32>
      %23 = arith.addf %20, %22 : vector<32x128xf32>
      %c0_15 = arith.constant 0 : index
      %c0_16 = arith.constant 0 : index
      %24 = vector.load %arg5[%c0_15, %c0_16] : memref<32x128xf32, #tpu.memory_space<vmem>>, vector<32x128xf32>
      tpu.vector_store %arg5[%c0_15, %c0_16], %23 {strides = array<i32>} : memref<32x128xf32, #tpu.memory_space<vmem>>, vector<32x128xf32>,
      %25 = arith.mulf %23, %7 : vector<32x128xf32>
      %cst_17 = arith.constant dense<0.000000e+00> : vector<128xf32>
      %26 = vector.multi_reduction <add>, %25, %cst_17 [0] : vector<32x128xf32> to vector<128xf32>
      %27 = vector.shape_cast %26 : vector<128xf32> to vector<1x128xf32>
      %28 = arith.mulf %25, %25 : vector<32x128xf32>
      %cst_18 = arith.constant dense<0.000000e+00> : vector<128xf32>
      %29 = vector.multi_reduction <add>, %28, %cst_18 [0] : vector<32x128xf32> to vector<128xf32>
      %30 = vector.shape_cast %29 : vector<128xf32> to vector<1x128xf32>
      %cst_19 = arith.constant 0.000000e+00 : f32
      %31 = vector.broadcast %cst_19 : f32 to vector<6x128xf32>
      %32 = tpu.concatenate %27, %30, %31 in 0 : vector<1x128xf32>, vector<1x128xf32>, vector<6x128xf32> -> vector<8x128xf32>
      %c0_20 = arith.constant 0 : index
      %c0_21 = arith.constant 0 : index
      %33 = vector.load %arg6[%c0_20, %c0_21] : memref<8x128xf32, #tpu.memory_space<vmem>>, vector<8x128xf32>
      tpu.vector_store %arg6[%c0_20, %c0_21], %32 {strides = array<i32>} : memref<8x128xf32, #tpu.memory_space<vmem>>, vector<8x128xf32>,
    } else {
    }
    return
  }
  func.func @transform_0(%arg0: i32, %arg1: i32) -> (i32, i32) {
    %c0_i32 = arith.constant 0 : i32
    return %arg0, %arg1 : i32, i32
  }
  func.func @transform_1(%arg0: i32, %arg1: i32) -> (i32, i32) {
    %c0_i32 = arith.constant 0 : i32
    %c0_i32_0 = arith.constant 0 : i32
    return %arg1, %c0_i32 : i32, i32
  }
  func.func @transform_2(%arg0: i32, %arg1: i32) -> (i32, i32) {
    %c0_i32 = arith.constant 0 : i32
    %c0_i32_0 = arith.constant 0 : i32
    %c0_i32_1 = arith.constant 0 : i32
    return %c0_i32, %c0_i32_0 : i32, i32
  }
  func.func @transform_3(%arg0: i32, %arg1: i32) -> (i32, i32) {
    %c0_i32 = arith.constant 0 : i32
    %c0_i32_0 = arith.constant 0 : i32
    return %arg0, %c0_i32 : i32, i32
  }
  func.func @transform_4(%arg0: i32, %arg1: i32) -> (i32, i32) {
    %c0_i32 = arith.constant 0 : i32
    %c0_i32_0 = arith.constant 0 : i32
    return %arg0, %c0_i32 : i32, i32
  }
}

module attributes {stable_mosaic.version = 11 : i64} {
  func.func @_classifier_kernel(%arg0: memref<2x256xf32, #tpu.memory_space<vmem>>, %arg1: memref<256x128xf32, #tpu.memory_space<vmem>>, %arg2: memref<1x128xf32, #tpu.memory_space<vmem>>, %arg3: memref<128x128xf32, #tpu.memory_space<vmem>>, %arg4: memref<1x128xf32, #tpu.memory_space<vmem>>, %arg5: memref<2x128xf32, #tpu.memory_space<vmem>>) attributes {dimension_semantics = [], scalar_prefetch = 0 : i64, scratch_operands = 0 : i64, tpu.core_type = #tpu.core_type<tc>} {
    %c0 = arith.constant 0 : index
    %c0_0 = arith.constant 0 : index
    %0 = vector.load %arg0[%c0, %c0_0] : memref<2x256xf32, #tpu.memory_space<vmem>>, vector<2x256xf32>
    %c0_1 = arith.constant 0 : index
    %c0_2 = arith.constant 0 : index
    %1 = vector.load %arg1[%c0_1, %c0_2] : memref<256x128xf32, #tpu.memory_space<vmem>>, vector<256x128xf32>
    %cst = arith.constant dense<0.000000e+00> : vector<2x128xf32>
    %2 = tpu.matmul %0, %1, %cst {dimension_numbers = #tpu.dot_dimension_numbers<[1], [0], [0], [1], [0, 0, 1, 1], [], []>} : vector<2x256xf32>, vector<256x128xf32>, vector<2x128xf32> -> vector<2x128xf32>
    %c0_3 = arith.constant 0 : index
    %c0_4 = arith.constant 0 : index
    %3 = vector.load %arg2[%c0_3, %c0_4] : memref<1x128xf32, #tpu.memory_space<vmem>>, vector<1x128xf32>
    %4 = vector.broadcast %3 : vector<1x128xf32> to vector<2x128xf32>
    %5 = arith.addf %2, %4 : vector<2x128xf32>
    %cst_5 = arith.constant 0.000000e+00 : f32
    %6 = vector.broadcast %cst_5 : f32 to vector<2x128xf32>
    %7 = arith.cmpf oge, %5, %6 : vector<2x128xf32>
    %cst_6 = arith.constant 1.000000e-01 : f32
    %8 = vector.broadcast %cst_6 : f32 to vector<2x128xf32>
    %9 = arith.mulf %8, %5 : vector<2x128xf32>
    %10 = arith.select %7, %5, %9 : vector<2x128xi1>, vector<2x128xf32>
    %c0_7 = arith.constant 0 : index
    %c0_8 = arith.constant 0 : index
    %11 = vector.load %arg3[%c0_7, %c0_8] : memref<128x128xf32, #tpu.memory_space<vmem>>, vector<128x128xf32>
    %cst_9 = arith.constant dense<0.000000e+00> : vector<2x128xf32>
    %12 = tpu.matmul %10, %11, %cst_9 {dimension_numbers = #tpu.dot_dimension_numbers<[1], [0], [0], [1], [0, 0, 1, 1], [], []>} : vector<2x128xf32>, vector<128x128xf32>, vector<2x128xf32> -> vector<2x128xf32>
    %c0_10 = arith.constant 0 : index
    %c0_11 = arith.constant 0 : index
    %13 = vector.load %arg4[%c0_10, %c0_11] : memref<1x128xf32, #tpu.memory_space<vmem>>, vector<1x128xf32>
    %14 = vector.broadcast %13 : vector<1x128xf32> to vector<2x128xf32>
    %15 = arith.addf %12, %14 : vector<2x128xf32>
    %c0_12 = arith.constant 0 : index
    %c0_13 = arith.constant 0 : index
    %16 = vector.load %arg5[%c0_12, %c0_13] : memref<2x128xf32, #tpu.memory_space<vmem>>, vector<2x128xf32>
    tpu.vector_store %arg5[%c0_12, %c0_13], %15 {strides = array<i32>} : memref<2x128xf32, #tpu.memory_space<vmem>>, vector<2x128xf32>,
    return
  }
}

</mosaic_0001>

<bundles_post_ra>
// kernel: discriminator_forward.10
= control target key start
LH: loop header
LB: loop body
LE: loop exit
PB: predicated region body
PF: predicated region fallthrough
CT: control target
= control target key end

     0   :  { %v516_v6 = vmov 1966171168   ;;  %v32_v8 = vlaneseq  ;;  %s1070_s1 = inlined_call_operand.vmem [shape: f32[8,128], index: 1, kind: input, shape index: {}]   ;;  %s1071_s2 = inlined_call_operand.vmem [shape: f32[1,128], index: 2, kind: input, shape index: {}]   ;;  %s1072_s0 = inlined_call_operand.vmem [shape: f32[512,128], index: 0, kind: input, shape index: {}]   ;;  %s1073_s3 = inlined_call_operand.vmem [shape: f32[1,128], index: 3, kind: input, shape index: {}]   ;;  %s1074_s4 = inlined_call_operand.vmem [shape: f32[512,128], index: 4, kind: output, shape index: {}]  }
   0x1   :  { %v17_v0 = vld [vmem:[%s1070_s1] sm:$0xff]  ;;  %v30_v7 = vunpack.c.l.s4 %v516_v6  ;;  %v50_v21 = vld [vmem:[%s1072_s0 + $0x8] sm:$0xff]  ;;  %v51_v22 = vld [vmem:[%s1072_s0 + $0x10] sm:$0xff] }
   0x2   :  { %v19_v1 = vmul.f32 0.001953125, %v17_v0  ;;  %v33_v10 = vshrl.u32 %v32_v8, 7  ;;  %v25_v15 = vld [vmem:[%s1071_s2] sm:$0x1]  ;;  %v52_v23 = vld [vmem:[%s1072_s0 + $0x18] sm:$0xff]  ;;  %v54_v27 = vld [vmem:[%s1072_s0 + $0x28] sm:$0xff] }
   0x3   :  { %v31_v9 = vunpack.c.0.s8 %v30_v7  ;;  %v46_v19 = vld [vmem:[%s1073_s3] sm:$0x1]  ;;  %v55_v28 = vld [vmem:[%s1072_s0 + $0x30] sm:$0xff]  ;;  %v56_v29 = vld [vmem:[%s1072_s0 + $0x38] sm:$0xff] }
   0x4   :  { %v20_v2 = vmul.f32 %v19_v1, %v19_v1  ;;  %v116_v17 = vsub.s32 0, %v33_v10  ;;  %v49_v20 = vld [vmem:[%s1072_s0] sm:$0xff]  ;;  %v58_v31 = vld [vmem:[%s1072_s0 + $0x48] sm:$0xff]  ;;  %v59_v32 = vld [vmem:[%s1072_s0 + $0x50] sm:$0xff] }
   0x5   :  { %v34_v11 = vsub.s32 %v31_v9, %v33_v10  ;;  %v53_v24 = vld [vmem:[%s1072_s0 + $0x20] sm:$0xff]  ;;  %v60_v37 = vld [vmem:[%s1072_s0 + $0x58] sm:$0xff]  ;;  %v62_v39 = vld [vmem:[%s1072_s0 + $0x68] sm:$0xff] }
   0x6   :  { %v22_v3 = vrot.slane %v20_v2, 7  ;;  %v57_v30 = vld [vmem:[%s1072_s0 + $0x40] sm:$0xff] }
   0x7   :  { %v61_v38 = vld [vmem:[%s1072_s0 + $0x60] sm:$0xff] }
   0x8   :  { %v24_v4 = vsub.f32 %v19_v1, %v22_v3 }
   0xa   :  { %v26_v5 = vadd.f32 1e-05, %v24_v4 }
   0xc   :  { %514 = vrsqrt.f32 %v26_v5 }
  0x16   :  { %v515_v12 = vpop.eup %514 }
  0x17   :  { %v35_v13 = vrot.slane %v515_v12, %v34_v11 }
  0x19   :  { %v36_v14 = vcombine.high %v35_v13, %v35_v13 }
  0x1b   :  { %v43_v16 = vrot.slane %v36_v14, %v34_v11 }
  0x1d   :  { %v45_v18 = vmul.f32 %v43_v16, %v25_v15  ;;  %v63_v16 = vld [vmem:[%s1072_s0 + $0x70] sm:$0xff] }
  0x1f   :  { %v47_v25 = vmul.f32 %v45_v18, %v19_v1  ;;  %v566_v26 = vrot.slane %v45_v18, %v116_v17 }
  0x21   :  { %v48_v33 = vsub.f32 %v46_v19, %v47_v25  ;;  %v119_v34 = vmul.f32 %v566_v26, %v49_v20  ;;  %v120_v35 = vmul.f32 %v566_v26, %v50_v21  ;;  %v121_v36 = vmul.f32 %v566_v26, %v51_v22  ;;  %v64_v19 = vld [vmem:[%s1072_s0 + $0x78] sm:$0xff]  ;;  %v65_v20 = vld [vmem:[%s1072_s0 + $0x80] sm:$0xff] }
  0x22   :  { %v122_v40 = vmul.f32 %v566_v26, %v52_v23  ;;  %v123_v41 = vmul.f32 %v566_v26, %v53_v24  ;;  %v124_v42 = vmul.f32 %v566_v26, %v54_v27  ;;  %v125_v43 = vmul.f32 %v566_v26, %v55_v28  ;;  %v66_v27 = vld [vmem:[%s1072_s0 + $0x88] sm:$0xff] }
  0x23   :  { %v602_v44 = vrot.slane %v48_v33, %v116_v17  ;;  %v126_v45 = vmul.f32 %v566_v26, %v56_v29  ;;  %v127_v46 = vmul.f32 %v566_v26, %v57_v30  ;;  %v128_v47 = vmul.f32 %v566_v26, %v58_v31  ;;  %v68_v33 = vld [vmem:[%s1072_s0 + $0x98] sm:$0xff] }
  0x24   :  { %v129_v48 = vmul.f32 %v566_v26, %v59_v32  ;;  %v130_v49 = vmul.f32 %v566_v26, %v60_v37  ;;  %v131_v50 = vmul.f32 %v566_v26, %v61_v38  ;;  %v611_v51 = vmul.f32 %v566_v26, %v62_v39  ;;  %v67_v32 = vld [vmem:[%s1072_s0 + $0x90] sm:$0xff] }
  0x25   :  { %v189_v52 = vadd.f32 %v602_v44, %v119_v34  ;;  %v190_v53 = vadd.f32 %v602_v44, %v120_v35  ;;  %v191_v54 = vadd.f32 %v602_v44, %v121_v36  ;;  %v192_v55 = vadd.f32 %v602_v44, %v122_v40 }
  0x26   :  { %v193_v56 = vadd.f32 %v602_v44, %v123_v41  ;;  %v194_v57 = vadd.f32 %v602_v44, %v124_v42  ;;  %v195_v58 = vadd.f32 %v602_v44, %v125_v43  ;;  %v196_v59 = vadd.f32 %v602_v44, %v126_v45 }
  0x27   :  { %vm253_vm0 = vcmp.ge.f32.partialorder %v189_v52, 0.0  ;;  %v317_v60 = vmul.f32 0.1, %v189_v52  ;;  %vm254_vm1 = vcmp.ge.f32.partialorder %v190_v53, 0.0  ;;  %v318_v61 = vmul.f32 0.1, %v190_v53 }
  0x28   :  { %vm255_vm2 = vcmp.ge.f32.partialorder %v191_v54, 0.0  ;;  %v319_v62 = vmul.f32 0.1, %v191_v54  ;;  %vm256_vm3 = vcmp.ge.f32.partialorder %v192_v55, 0.0  ;;  %v320_v63 = vmul.f32 0.1, %v192_v55 }
  0x29   :  { %v381_v0 = vsel %vm253_vm0, %v189_v52, %v317_v60  ;;  %v382_v1 = vsel %vm254_vm1, %v190_v53, %v318_v61  ;;  %vm257_vm4 = vcmp.ge.f32.partialorder %v193_v56, 0.0  ;;  %v321_v2 = vmul.f32 0.1, %v193_v56  ;;  %v72_v61 = vld [vmem:[%s1072_s0 + $0xb8] sm:$0xff] }
  0x2a   :  { %445 = vst [vmem:[%s1074_s4] sm:$0xff] %v381_v0  ;;  %446 = vst [vmem:[%s1074_s4 + $0x8] sm:$0xff] %v382_v1  ;;  %v383_v3 = vsel %vm255_vm2, %v191_v54, %v319_v62  ;;  %v384_v4 = vsel %vm256_vm3, %v192_v55, %v320_v63  ;;  %vm258_vm5 = vcmp.ge.f32.partialorder %v194_v57, 0.0  ;;  %v322_v5 = vmul.f32 0.1, %v194_v57  ;;  %v73_v62 = vld [vmem:[%s1072_s0 + $0xc0] sm:$0xff] }
  0x2b   :  { %447 = vst [vmem:[%s1074_s4 + $0x10] sm:$0xff] %v383_v3  ;;  %448 = vst [vmem:[%s1074_s4 + $0x18] sm:$0xff] %v384_v4  ;;  %v385_v6 = vsel %vm257_vm4, %v193_v56, %v321_v2  ;;  %vm259_vm6 = vcmp.ge.f32.partialorder %v195_v58, 0.0  ;;  %v323_v7 = vmul.f32 0.1, %v195_v58  ;;  %vm260_vm7 = vcmp.ge.f32.partialorder %v196_v59, 0.0 }
  0x2c   :  { %449 = vst [vmem:[%s1074_s4 + $0x20] sm:$0xff] %v385_v6  ;;  %v386_v8 = vsel %vm258_vm5, %v194_v57, %v322_v5  ;;  %v324_v9 = vmul.f32 0.1, %v196_v59  ;;  %v197_v10 = vadd.f32 %v602_v44, %v127_v46  ;;  %v198_v11 = vadd.f32 %v602_v44, %v128_v47  ;;  %v71_v56 = vld [vmem:[%s1072_s0 + $0xb0] sm:$0xff] }
  0x2d   :  { %450 = vst [vmem:[%s1074_s4 + $0x28] sm:$0xff] %v386_v8  ;;  %v387_v12 = vsel %vm259_vm6, %v195_v58, %v323_v7  ;;  %v199_v13 = vadd.f32 %v602_v44, %v129_v48  ;;  %v200_v14 = vadd.f32 %v602_v44, %v130_v49  ;;  %v201_v15 = vadd.f32 %v602_v44, %v131_v50  ;;  %v69_v49 = vld [vmem:[%s1072_s0 + $0xa0] sm:$0xff]  ;;  %v70_v50 = vld [vmem:[%s1072_s0 + $0xa8] sm:$0xff] }
  0x2e   :  { %451 = vst [vmem:[%s1074_s4 + $0x30] sm:$0xff] %v387_v12  ;;  %v388_v17 = vsel %vm260_vm7, %v196_v59, %v324_v9  ;;  %vm261_vm8 = vcmp.ge.f32.partialorder %v197_v10, 0.0  ;;  %v325_v18 = vmul.f32 0.1, %v197_v10  ;;  %vm262_vm9 = vcmp.ge.f32.partialorder %v198_v11, 0.0  ;;  %v74_v9 = vld [vmem:[%s1072_s0 + $0xc8] sm:$0xff] }
  0x2f   :  { %452 = vst [vmem:[%s1074_s4 + $0x38] sm:$0xff] %v388_v17  ;;  %v326_v21 = vmul.f32 0.1, %v198_v11  ;;  %vm263_vm10 = vcmp.ge.f32.partialorder %v199_v13, 0.0  ;;  %v327_v22 = vmul.f32 0.1, %v199_v13  ;;  %v202_v30 = vadd.f32 %v602_v44, %v611_v51 }
  0x30   :  { %vm264_vm11 = vcmp.ge.f32.partialorder %v200_v14, 0.0  ;;  %v389_v23 = vsel %vm261_vm8, %v197_v10, %v325_v18  ;;  %v328_v24 = vmul.f32 0.1, %v200_v14  ;;  %vm265_vm12 = vcmp.ge.f32.partialorder %v201_v15, 0.0 }
  0x31   :  { %v329_v25 = vmul.f32 0.1, %v201_v15  ;;  %453 = vst [vmem:[%s1074_s4 + $0x40] sm:$0xff] %v389_v23  ;;  %v390_v28 = vsel %vm262_vm9, %v198_v11, %v326_v21  ;;  %v391_v29 = vsel %vm263_vm10, %v199_v13, %v327_v22  ;;  %v133_v31 = vmul.f32 %v566_v26, %v63_v16  ;;  %v75_v16 = vld [vmem:[%s1072_s0 + $0xd0] sm:$0xff]  ;;  %v77_v21 = vld [vmem:[%s1072_s0 + $0xe0] sm:$0xff]  ;;  %v78_v22 = vld [vmem:[%s1072_s0 + $0xe8] sm:$0xff] }
  0x32   :  { %454 = vst [vmem:[%s1074_s4 + $0x48] sm:$0xff] %v390_v28  ;;  %455 = vst [vmem:[%s1074_s4 + $0x50] sm:$0xff] %v391_v29  ;;  %v392_v34 = vsel %vm264_vm11, %v200_v14, %v328_v24  ;;  %v134_v36 = vmul.f32 %v566_v26, %v64_v19  ;;  %v135_v37 = vmul.f32 %v566_v26, %v65_v20  ;;  %vm266_vm13 = vcmp.ge.f32.partialorder %v202_v30, 0.0  ;;  %v76_v20 = vld [vmem:[%s1072_s0 + $0xd8] sm:$0xff] }
  0x33   :  { %v393_v35 = vsel %vm265_vm12, %v201_v15, %v329_v25  ;;  %456 = vst [vmem:[%s1074_s4 + $0x58] sm:$0xff] %v392_v34  ;;  %v330_v38 = vmul.f32 0.1, %v202_v30  ;;  %v203_v39 = vadd.f32 %v602_v44, %v133_v31  ;;  %v136_v40 = vmul.f32 %v566_v26, %v66_v27 }
  0x34   :  { %457 = vst [vmem:[%s1074_s4 + $0x60] sm:$0xff] %v393_v35  ;;  %v204_v41 = vadd.f32 %v602_v44, %v134_v36  ;;  %v205_v42 = vadd.f32 %v602_v44, %v135_v37  ;;  %v137_v43 = vmul.f32 %v566_v26, %v67_v32  ;;  %v138_v45 = vmul.f32 %v566_v26, %v68_v33  ;;  %v80_v35 = vld [vmem:[%s1072_s0 + $0xf8] sm:$0xff] }
  0x35   :  { %v394_v46 = vsel %vm266_vm13, %v202_v30, %v330_v38  ;;  %vm267_vm14 = vcmp.ge.f32.partialorder %v203_v39, 0.0  ;;  %v331_v47 = vmul.f32 0.1, %v203_v39  ;;  %v206_v48 = vadd.f32 %v602_v44, %v136_v40  ;;  %v79_v30 = vld [vmem:[%s1072_s0 + $0xf0] sm:$0xff] }
  0x36   :  { %458 = vst [vmem:[%s1074_s4 + $0x68] sm:$0xff] %v394_v46  ;;  %vm268_vm15 = vcmp.ge.f32.partialorder %v204_v41, 0.0  ;;  %v332_v51 = vmul.f32 0.1, %v204_v41  ;;  %vm269_vm0 = vcmp.ge.f32.partialorder %v205_v42, 0.0  ;;  %v207_v55 = vadd.f32 %v602_v44, %v137_v43 }
  0x37   :  { %v333_v52 = vmul.f32 0.1, %v205_v42  ;;  %v395_v53 = vsel %vm267_vm14, %v203_v39, %v331_v47  ;;  %vm270_vm1 = vcmp.ge.f32.partialorder %v206_v48, 0.0  ;;  %v334_v54 = vmul.f32 0.1, %v206_v48  ;;  %v81_v47 = vld [vmem:[%s1072_s0 + $0x100] sm:$0xff] }
  0x38   :  { %459 = vst [vmem:[%s1074_s4 + $0x70] sm:$0xff] %v395_v53  ;;  %v396_v57 = vsel %vm268_vm15, %v204_v41, %v332_v51  ;;  %v208_v59 = vadd.f32 %v602_v44, %v138_v45  ;;  %v139_v60 = vmul.f32 %v566_v26, %v69_v49  ;;  %vm271_vm2 = vcmp.ge.f32.partialorder %v207_v55, 0.0 }
  0x39   :  { %v397_v58 = vsel %vm269_vm0, %v205_v42, %v333_v52  ;;  %460 = vst [vmem:[%s1074_s4 + $0x78] sm:$0xff] %v396_v57  ;;  %v398_v63 = vsel %vm270_vm1, %v206_v48, %v334_v54  ;;  %v335_v0 = vmul.f32 0.1, %v207_v55  ;;  %v140_v1 = vmul.f32 %v566_v26, %v70_v50  ;;  %v82_v48 = vld [vmem:[%s1072_s0 + $0x108] sm:$0xff]  ;;  %v83_v54 = vld [vmem:[%s1072_s0 + $0x110] sm:$0xff] }
  0x3a   :  { %461 = vst [vmem:[%s1074_s4 + $0x80] sm:$0xff] %v397_v58  ;;  %462 = vst [vmem:[%s1074_s4 + $0x88] sm:$0xff] %v398_v63  ;;  %vm272_vm3 = vcmp.ge.f32.partialorder %v208_v59, 0.0  ;;  %v336_v2 = vmul.f32 0.1, %v208_v59  ;;  %v209_v3 = vadd.f32 %v602_v44, %v139_v60  ;;  %v141_v4 = vmul.f32 %v566_v26, %v71_v56  ;;  %v85_v60 = vld [vmem:[%s1072_s0 + $0x120] sm:$0xff] }
  0x3b   :  { %v399_v5 = vsel %vm271_vm2, %v207_v55, %v335_v0  ;;  %v210_v6 = vadd.f32 %v602_v44, %v140_v1  ;;  %v142_v7 = vmul.f32 %v566_v26, %v72_v61  ;;  %v143_v8 = vmul.f32 %v566_v26, %v73_v62 }
  0x3c   :  { %463 = vst [vmem:[%s1074_s4 + $0x90] sm:$0xff] %v399_v5  ;;  %v400_v10 = vsel %vm272_vm3, %v208_v59, %v336_v2  ;;  %vm273_vm4 = vcmp.ge.f32.partialorder %v209_v3, 0.0  ;;  %v337_v11 = vmul.f32 0.1, %v209_v3  ;;  %v211_v12 = vadd.f32 %v602_v44, %v141_v4  ;;  %v84_v59 = vld [vmem:[%s1072_s0 + $0x118] sm:$0xff] }
  0x3d   :  { %464 = vst [vmem:[%s1074_s4 + $0x98] sm:$0xff] %v400_v10  ;;  %vm274_vm5 = vcmp.ge.f32.partialorder %v210_v6, 0.0  ;;  %v338_v13 = vmul.f32 0.1, %v210_v6  ;;  %v212_v14 = vadd.f32 %v602_v44, %v142_v7  ;;  %v213_v15 = vadd.f32 %v602_v44, %v143_v8  ;;  %v86_v7 = vld [vmem:[%s1072_s0 + $0x128] sm:$0xff] }
  0x3e   :  { %v401_v17 = vsel %vm273_vm4, %v209_v3, %v337_v11  ;;  %vm275_vm6 = vcmp.ge.f32.partialorder %v211_v12, 0.0  ;;  %v339_v18 = vmul.f32 0.1, %v211_v12  ;;  %v144_v19 = vmul.f32 %v566_v26, %v74_v9 }
  0x3f   :  { %465 = vst [vmem:[%s1074_s4 + $0xa0] sm:$0xff] %v401_v17  ;;  %v402_v23 = vsel %vm274_vm5, %v210_v6, %v338_v13  ;;  %vm276_vm7 = vcmp.ge.f32.partialorder %v212_v14, 0.0  ;;  %v340_v24 = vmul.f32 0.1, %v212_v14  ;;  %vm277_vm8 = vcmp.ge.f32.partialorder %v213_v15, 0.0 }
  0x40   :  { %466 = vst [vmem:[%s1074_s4 + $0xa8] sm:$0xff] %v402_v23  ;;  %v403_v25 = vsel %vm275_vm6, %v211_v12, %v339_v18  ;;  %v341_v27 = vmul.f32 0.1, %v213_v15  ;;  %v214_v28 = vadd.f32 %v602_v44, %v144_v19  ;;  %v145_v29 = vmul.f32 %v566_v26, %v75_v16  ;;  %v88_v18 = vld [vmem:[%s1072_s0 + $0x138] sm:$0xff]  ;;  %v89_v19 = vld [vmem:[%s1072_s0 + $0x140] sm:$0xff] }
  0x41   :  { %467 = vst [vmem:[%s1074_s4 + $0xb0] sm:$0xff] %v403_v25  ;;  %v404_v31 = vsel %vm276_vm7, %v212_v14, %v340_v24  ;;  %v146_v32 = vmul.f32 %v566_v26, %v76_v20  ;;  %v147_v33 = vmul.f32 %v566_v26, %v77_v21  ;;  %v148_v34 = vmul.f32 %v566_v26, %v78_v22  ;;  %v87_v14 = vld [vmem:[%s1072_s0 + $0x130] sm:$0xff]  ;;  %v90_v20 = vld [vmem:[%s1072_s0 + $0x148] sm:$0xff] }
  0x42   :  { %468 = vst [vmem:[%s1074_s4 + $0xb8] sm:$0xff] %v404_v31  ;;  %v405_v36 = vsel %vm277_vm8, %v213_v15, %v341_v27  ;;  %vm278_vm9 = vcmp.ge.f32.partialorder %v214_v28, 0.0  ;;  %v342_v37 = vmul.f32 0.1, %v214_v28  ;;  %v215_v38 = vadd.f32 %v602_v44, %v145_v29 }
  0x43   :  { %469 = vst [vmem:[%s1074_s4 + $0xc0] sm:$0xff] %v405_v36  ;;  %v216_v39 = vadd.f32 %v602_v44, %v146_v32  ;;  %v217_v40 = vadd.f32 %v602_v44, %v147_v33  ;;  %v218_v41 = vadd.f32 %v602_v44, %v148_v34  ;;  %v149_v42 = vmul.f32 %v566_v26, %v79_v30  ;;  %v92_v33 = vld [vmem:[%s1072_s0 + $0x158] sm:$0xff] }
  0x44   :  { %v406_v43 = vsel %vm278_vm9, %v214_v28, %v342_v37  ;;  %vm279_vm10 = vcmp.ge.f32.partialorder %v215_v38, 0.0  ;;  %v343_v45 = vmul.f32 0.1, %v215_v38  ;;  %v150_v46 = vmul.f32 %v566_v26, %v80_v35  ;;  %v91_v28 = vld [vmem:[%s1072_s0 + $0x150] sm:$0xff] }
  0x45   :  { %470 = vst [vmem:[%s1074_s4 + $0xc8] sm:$0xff] %v406_v43  ;;  %vm280_vm11 = vcmp.ge.f32.partialorder %v216_v39, 0.0  ;;  %v344_v49 = vmul.f32 0.1, %v216_v39  ;;  %vm281_vm12 = vcmp.ge.f32.partialorder %v217_v40, 0.0  ;;  %vm282_vm13 = vcmp.ge.f32.partialorder %v218_v41, 0.0 }
  0x46   :  { %v345_v50 = vmul.f32 0.1, %v217_v40  ;;  %v407_v51 = vsel %vm279_vm10, %v215_v38, %v343_v45  ;;  %v346_v52 = vmul.f32 0.1, %v218_v41  ;;  %v219_v53 = vadd.f32 %v602_v44, %v149_v42  ;;  %v93_v45 = vld [vmem:[%s1072_s0 + $0x160] sm:$0xff] }
  0x47   :  { %471 = vst [vmem:[%s1074_s4 + $0xd0] sm:$0xff] %v407_v51  ;;  %v408_v55 = vsel %vm280_vm11, %v216_v39, %v344_v49  ;;  %v220_v57 = vadd.f32 %v602_v44, %v150_v46  ;;  %v151_v58 = vmul.f32 %v566_v26, %v81_v47  ;;  %v152_v63 = vmul.f32 %v566_v26, %v82_v48  ;;  %v94_v46 = vld [vmem:[%s1072_s0 + $0x168] sm:$0xff] }
  0x48   :  { %v409_v56 = vsel %vm281_vm12, %v217_v40, %v345_v50  ;;  %472 = vst [vmem:[%s1074_s4 + $0xd8] sm:$0xff] %v408_v55  ;;  %v410_v61 = vsel %vm282_vm13, %v218_v41, %v346_v52  ;;  %vm283_vm14 = vcmp.ge.f32.partialorder %v219_v53, 0.0  ;;  %v347_v62 = vmul.f32 0.1, %v219_v53  ;;  %v95_v52 = vld [vmem:[%s1072_s0 + $0x170] sm:$0xff] }
  0x49   :  { %473 = vst [vmem:[%s1074_s4 + $0xe0] sm:$0xff] %v409_v56  ;;  %474 = vst [vmem:[%s1074_s4 + $0xe8] sm:$0xff] %v410_v61  ;;  %vm284_vm15 = vcmp.ge.f32.partialorder %v220_v57, 0.0  ;;  %v348_v0 = vmul.f32 0.1, %v220_v57  ;;  %v221_v1 = vadd.f32 %v602_v44, %v151_v58  ;;  %v153_v2 = vmul.f32 %v566_v26, %v83_v54  ;;  %v97_v58 = vld [vmem:[%s1072_s0 + $0x180] sm:$0xff] }
  0x4a   :  { %v411_v3 = vsel %vm283_vm14, %v219_v53, %v347_v62  ;;  %v222_v4 = vadd.f32 %v602_v44, %v152_v63  ;;  %v154_v5 = vmul.f32 %v566_v26, %v84_v59  ;;  %v155_v6 = vmul.f32 %v566_v26, %v85_v60 }
  0x4b   :  { %475 = vst [vmem:[%s1074_s4 + $0xf0] sm:$0xff] %v411_v3  ;;  %v412_v8 = vsel %vm284_vm15, %v220_v57, %v348_v0  ;;  %vm285_vm0 = vcmp.ge.f32.partialorder %v221_v1, 0.0  ;;  %v349_v9 = vmul.f32 0.1, %v221_v1  ;;  %v223_v10 = vadd.f32 %v602_v44, %v153_v2  ;;  %v96_v57 = vld [vmem:[%s1072_s0 + $0x178] sm:$0xff] }
  0x4c   :  { %476 = vst [vmem:[%s1074_s4 + $0xf8] sm:$0xff] %v412_v8  ;;  %vm286_vm1 = vcmp.ge.f32.partialorder %v222_v4, 0.0  ;;  %v350_v11 = vmul.f32 0.1, %v222_v4  ;;  %v224_v12 = vadd.f32 %v602_v44, %v154_v5  ;;  %v225_v13 = vadd.f32 %v602_v44, %v155_v6  ;;  %v98_v5 = vld [vmem:[%s1072_s0 + $0x188] sm:$0xff] }
  0x4d   :  { %v413_v15 = vsel %vm285_vm0, %v221_v1, %v349_v9  ;;  %vm287_vm2 = vcmp.ge.f32.partialorder %v223_v10, 0.0  ;;  %v351_v16 = vmul.f32 0.1, %v223_v10  ;;  %v156_v17 = vmul.f32 %v566_v26, %v86_v7 }
  0x4e   :  { %477 = vst [vmem:[%s1074_s4 + $0x100] sm:$0xff] %v413_v15  ;;  %v414_v21 = vsel %vm286_vm1, %v222_v4, %v350_v11  ;;  %vm288_vm3 = vcmp.ge.f32.partialorder %v224_v12, 0.0  ;;  %v352_v22 = vmul.f32 0.1, %v224_v12  ;;  %vm289_vm4 = vcmp.ge.f32.partialorder %v225_v13, 0.0 }
  0x4f   :  { %478 = vst [vmem:[%s1074_s4 + $0x108] sm:$0xff] %v414_v21  ;;  %v415_v23 = vsel %vm287_vm2, %v223_v10, %v351_v16  ;;  %v353_v24 = vmul.f32 0.1, %v225_v13  ;;  %v226_v25 = vadd.f32 %v602_v44, %v156_v17  ;;  %v157_v27 = vmul.f32 %v566_v26, %v87_v14  ;;  %v100_v16 = vld [vmem:[%s1072_s0 + $0x198] sm:$0xff]  ;;  %v101_v17 = vld [vmem:[%s1072_s0 + $0x1a0] sm:$0xff] }
  0x50   :  { %479 = vst [vmem:[%s1074_s4 + $0x110] sm:$0xff] %v415_v23  ;;  %v416_v29 = vsel %vm288_vm3, %v224_v12, %v352_v22  ;;  %v158_v30 = vmul.f32 %v566_v26, %v88_v18  ;;  %v159_v31 = vmul.f32 %v566_v26, %v89_v19  ;;  %v160_v32 = vmul.f32 %v566_v26, %v90_v20  ;;  %v99_v12 = vld [vmem:[%s1072_s0 + $0x190] sm:$0xff]  ;;  %v102_v18 = vld [vmem:[%s1072_s0 + $0x1a8] sm:$0xff] }
  0x51   :  { %480 = vst [vmem:[%s1074_s4 + $0x118] sm:$0xff] %v416_v29  ;;  %v417_v34 = vsel %vm289_vm4, %v225_v13, %v353_v24  ;;  %vm290_vm5 = vcmp.ge.f32.partialorder %v226_v25, 0.0  ;;  %v354_v35 = vmul.f32 0.1, %v226_v25  ;;  %v227_v36 = vadd.f32 %v602_v44, %v157_v27 }
  0x52   :  { %481 = vst [vmem:[%s1074_s4 + $0x120] sm:$0xff] %v417_v34  ;;  %v228_v37 = vadd.f32 %v602_v44, %v158_v30  ;;  %v229_v38 = vadd.f32 %v602_v44, %v159_v31  ;;  %v230_v39 = vadd.f32 %v602_v44, %v160_v32  ;;  %v161_v40 = vmul.f32 %v566_v26, %v91_v28  ;;  %v104_v31 = vld [vmem:[%s1072_s0 + $0x1b8] sm:$0xff] }
  0x53   :  { %v418_v41 = vsel %vm290_vm5, %v226_v25, %v354_v35  ;;  %vm291_vm6 = vcmp.ge.f32.partialorder %v227_v36, 0.0  ;;  %v355_v42 = vmul.f32 0.1, %v227_v36  ;;  %v162_v43 = vmul.f32 %v566_v26, %v92_v33  ;;  %v103_v25 = vld [vmem:[%s1072_s0 + $0x1b0] sm:$0xff] }
  0x54   :  { %482 = vst [vmem:[%s1074_s4 + $0x128] sm:$0xff] %v418_v41  ;;  %vm292_vm7 = vcmp.ge.f32.partialorder %v228_v37, 0.0  ;;  %v356_v47 = vmul.f32 0.1, %v228_v37  ;;  %vm293_vm8 = vcmp.ge.f32.partialorder %v229_v38, 0.0  ;;  %vm294_vm9 = vcmp.ge.f32.partialorder %v230_v39, 0.0 }
  0x55   :  { %v357_v48 = vmul.f32 0.1, %v229_v38  ;;  %v419_v49 = vsel %vm291_vm6, %v227_v36, %v355_v42  ;;  %v358_v50 = vmul.f32 0.1, %v230_v39  ;;  %v231_v51 = vadd.f32 %v602_v44, %v161_v40  ;;  %v105_v42 = vld [vmem:[%s1072_s0 + $0x1c0] sm:$0xff] }
  0x56   :  { %483 = vst [vmem:[%s1074_s4 + $0x130] sm:$0xff] %v419_v49  ;;  %v420_v53 = vsel %vm292_vm7, %v228_v37, %v356_v47  ;;  %v232_v55 = vadd.f32 %v602_v44, %v162_v43  ;;  %v163_v56 = vmul.f32 %v566_v26, %v93_v45  ;;  %v164_v61 = vmul.f32 %v566_v26, %v94_v46  ;;  %v106_v43 = vld [vmem:[%s1072_s0 + $0x1c8] sm:$0xff] }
  0x57   :  { %v421_v54 = vsel %vm293_vm8, %v229_v38, %v357_v48  ;;  %484 = vst [vmem:[%s1074_s4 + $0x138] sm:$0xff] %v420_v53  ;;  %v422_v59 = vsel %vm294_vm9, %v230_v39, %v358_v50  ;;  %vm295_vm10 = vcmp.ge.f32.partialorder %v231_v51, 0.0  ;;  %v359_v60 = vmul.f32 0.1, %v231_v51  ;;  %v107_v50 = vld [vmem:[%s1072_s0 + $0x1d0] sm:$0xff] }
  0x58   :  { %485 = vst [vmem:[%s1074_s4 + $0x140] sm:$0xff] %v421_v54  ;;  %486 = vst [vmem:[%s1074_s4 + $0x148] sm:$0xff] %v422_v59  ;;  %vm296_vm11 = vcmp.ge.f32.partialorder %v232_v55, 0.0  ;;  %v360_v62 = vmul.f32 0.1, %v232_v55  ;;  %v233_v63 = vadd.f32 %v602_v44, %v163_v56  ;;  %v165_v0 = vmul.f32 %v566_v26, %v95_v52  ;;  %v109_v56 = vld [vmem:[%s1072_s0 + $0x1e0] sm:$0xff] }
  0x59   :  { %v423_v1 = vsel %vm295_vm10, %v231_v51, %v359_v60  ;;  %v234_v2 = vadd.f32 %v602_v44, %v164_v61  ;;  %v166_v3 = vmul.f32 %v566_v26, %v96_v57  ;;  %v167_v4 = vmul.f32 %v566_v26, %v97_v58 }
  0x5a   :  { %487 = vst [vmem:[%s1074_s4 + $0x150] sm:$0xff] %v423_v1  ;;  %v424_v6 = vsel %vm296_vm11, %v232_v55, %v360_v62  ;;  %vm297_vm12 = vcmp.ge.f32.partialorder %v233_v63, 0.0  ;;  %v361_v7 = vmul.f32 0.1, %v233_v63  ;;  %v235_v8 = vadd.f32 %v602_v44, %v165_v0  ;;  %v108_v55 = vld [vmem:[%s1072_s0 + $0x1d8] sm:$0xff] }
  0x5b   :  { %488 = vst [vmem:[%s1074_s4 + $0x158] sm:$0xff] %v424_v6  ;;  %vm298_vm13 = vcmp.ge.f32.partialorder %v234_v2, 0.0  ;;  %v362_v9 = vmul.f32 0.1, %v234_v2  ;;  %v236_v10 = vadd.f32 %v602_v44, %v166_v3  ;;  %v237_v11 = vadd.f32 %v602_v44, %v167_v4  ;;  %v110_v3 = vld [vmem:[%s1072_s0 + $0x1e8] sm:$0xff] }
  0x5c   :  { %v425_v13 = vsel %vm297_vm12, %v233_v63, %v361_v7  ;;  %vm299_vm14 = vcmp.ge.f32.partialorder %v235_v8, 0.0  ;;  %v363_v14 = vmul.f32 0.1, %v235_v8  ;;  %v168_v15 = vmul.f32 %v566_v26, %v98_v5 }
  0x5d   :  { %489 = vst [vmem:[%s1074_s4 + $0x160] sm:$0xff] %v425_v13  ;;  %v426_v19 = vsel %vm298_vm13, %v234_v2, %v362_v9  ;;  %vm300_vm15 = vcmp.ge.f32.partialorder %v236_v10, 0.0  ;;  %v364_v20 = vmul.f32 0.1, %v236_v10  ;;  %vm301_vm0 = vcmp.ge.f32.partialorder %v237_v11, 0.0 }
  0x5e   :  { %490 = vst [vmem:[%s1074_s4 + $0x168] sm:$0xff] %v426_v19  ;;  %v427_v21 = vsel %vm299_vm14, %v235_v8, %v363_v14  ;;  %v365_v22 = vmul.f32 0.1, %v237_v11  ;;  %v238_v23 = vadd.f32 %v602_v44, %v168_v15  ;;  %v169_v24 = vmul.f32 %v566_v26, %v99_v12  ;;  %v112_v14 = vld [vmem:[%s1072_s0 + $0x1f8] sm:$0xff] }
  0x5f   :  { %491 = vst [vmem:[%s1074_s4 + $0x170] sm:$0xff] %v427_v21  ;;  %v428_v27 = vsel %vm300_vm15, %v236_v10, %v364_v20  ;;  %v170_v28 = vmul.f32 %v566_v26, %v100_v16  ;;  %v171_v29 = vmul.f32 %v566_v26, %v101_v17  ;;  %v172_v30 = vmul.f32 %v566_v26, %v102_v18  ;;  %v111_v10 = vld [vmem:[%s1072_s0 + $0x1f0] sm:$0xff] }
  0x60   :  { %492 = vst [vmem:[%s1074_s4 + $0x178] sm:$0xff] %v428_v27  ;;  %v429_v32 = vsel %vm301_vm0, %v237_v11, %v365_v22  ;;  %vm302_vm1 = vcmp.ge.f32.partialorder %v238_v23, 0.0  ;;  %v366_v33 = vmul.f32 0.1, %v238_v23  ;;  %v239_v34 = vadd.f32 %v602_v44, %v169_v24 }
  0x61   :  { %493 = vst [vmem:[%s1074_s4 + $0x180] sm:$0xff] %v429_v32  ;;  %v240_v35 = vadd.f32 %v602_v44, %v170_v28  ;;  %v241_v36 = vadd.f32 %v602_v44, %v171_v29  ;;  %v242_v37 = vadd.f32 %v602_v44, %v172_v30  ;;  %v173_v38 = vmul.f32 %v566_v26, %v103_v25 }
  0x62   :  { %v430_v39 = vsel %vm302_vm1, %v238_v23, %v366_v33  ;;  %vm303_vm2 = vcmp.ge.f32.partialorder %v239_v34, 0.0  ;;  %v367_v40 = vmul.f32 0.1, %v239_v34  ;;  %v174_v41 = vmul.f32 %v566_v26, %v104_v31 }
  0x63   :  { %494 = vst [vmem:[%s1074_s4 + $0x188] sm:$0xff] %v430_v39  ;;  %vm304_vm3 = vcmp.ge.f32.partialorder %v240_v35, 0.0  ;;  %v368_v45 = vmul.f32 0.1, %v240_v35  ;;  %vm305_vm4 = vcmp.ge.f32.partialorder %v241_v36, 0.0  ;;  %vm306_vm5 = vcmp.ge.f32.partialorder %v242_v37, 0.0 }
  0x64   :  { %v369_v46 = vmul.f32 0.1, %v241_v36  ;;  %v431_v47 = vsel %vm303_vm2, %v239_v34, %v367_v40  ;;  %v370_v48 = vmul.f32 0.1, %v242_v37  ;;  %v243_v49 = vadd.f32 %v602_v44, %v173_v38 }
  0x65   :  { %495 = vst [vmem:[%s1074_s4 + $0x190] sm:$0xff] %v431_v47  ;;  %v432_v51 = vsel %vm304_vm3, %v240_v35, %v368_v45  ;;  %v244_v53 = vadd.f32 %v602_v44, %v174_v41  ;;  %v175_v54 = vmul.f32 %v566_v26, %v105_v42  ;;  %v176_v59 = vmul.f32 %v566_v26, %v106_v43 }
  0x66   :  { %v433_v52 = vsel %vm305_vm4, %v241_v36, %v369_v46  ;;  %496 = vst [vmem:[%s1074_s4 + $0x198] sm:$0xff] %v432_v51  ;;  %v434_v57 = vsel %vm306_vm5, %v242_v37, %v370_v48  ;;  %vm307_vm6 = vcmp.ge.f32.partialorder %v243_v49, 0.0  ;;  %v371_v58 = vmul.f32 0.1, %v243_v49 }
  0x67   :  { %497 = vst [vmem:[%s1074_s4 + $0x1a0] sm:$0xff] %v433_v52  ;;  %498 = vst [vmem:[%s1074_s4 + $0x1a8] sm:$0xff] %v434_v57  ;;  %vm308_vm7 = vcmp.ge.f32.partialorder %v244_v53, 0.0  ;;  %v372_v60 = vmul.f32 0.1, %v244_v53  ;;  %v245_v61 = vadd.f32 %v602_v44, %v175_v54  ;;  %v177_v62 = vmul.f32 %v566_v26, %v107_v50 }
  0x68   :  { %v435_v63 = vsel %vm307_vm6, %v243_v49, %v371_v58  ;;  %v246_v0 = vadd.f32 %v602_v44, %v176_v59  ;;  %v178_v1 = vmul.f32 %v566_v26, %v108_v55  ;;  %v179_v2 = vmul.f32 %v566_v26, %v109_v56 }
  0x69   :  { %499 = vst [vmem:[%s1074_s4 + $0x1b0] sm:$0xff] %v435_v63  ;;  %v436_v4 = vsel %vm308_vm7, %v244_v53, %v372_v60  ;;  %vm309_vm8 = vcmp.ge.f32.partialorder %v245_v61, 0.0  ;;  %v373_v5 = vmul.f32 0.1, %v245_v61  ;;  %v247_v6 = vadd.f32 %v602_v44, %v177_v62 }
  0x6a   :  { %500 = vst [vmem:[%s1074_s4 + $0x1b8] sm:$0xff] %v436_v4  ;;  %vm310_vm9 = vcmp.ge.f32.partialorder %v246_v0, 0.0  ;;  %v374_v7 = vmul.f32 0.1, %v246_v0  ;;  %v248_v8 = vadd.f32 %v602_v44, %v178_v1  ;;  %v249_v9 = vadd.f32 %v602_v44, %v179_v2 }
  0x6b   :  { %v437_v11 = vsel %vm309_vm8, %v245_v61, %v373_v5  ;;  %vm311_vm10 = vcmp.ge.f32.partialorder %v247_v6, 0.0  ;;  %v375_v12 = vmul.f32 0.1, %v247_v6  ;;  %v180_v13 = vmul.f32 %v566_v26, %v110_v3 }
  0x6c   :  { %501 = vst [vmem:[%s1074_s4 + $0x1c0] sm:$0xff] %v437_v11  ;;  %v438_v15 = vsel %vm310_vm9, %v246_v0, %v374_v7  ;;  %vm312_vm11 = vcmp.ge.f32.partialorder %v248_v8, 0.0  ;;  %v376_v16 = vmul.f32 0.1, %v248_v8  ;;  %vm313_vm12 = vcmp.ge.f32.partialorder %v249_v9, 0.0 }
  0x6d   :  { %502 = vst [vmem:[%s1074_s4 + $0x1c8] sm:$0xff] %v438_v15  ;;  %v439_v17 = vsel %vm311_vm10, %v247_v6, %v375_v12  ;;  %v377_v18 = vmul.f32 0.1, %v249_v9  ;;  %v250_v19 = vadd.f32 %v602_v44, %v180_v13  ;;  %v181_v20 = vmul.f32 %v566_v26, %v111_v10 }
  0x6e   :  { %503 = vst [vmem:[%s1074_s4 + $0x1d0] sm:$0xff] %v439_v17  ;;  %v440_v21 = vsel %vm312_vm11, %v248_v8, %v376_v16  ;;  %v182_v22 = vmul.f32 %v566_v26, %v112_v14 }
  0x6f   :  { %504 = vst [vmem:[%s1074_s4 + $0x1d8] sm:$0xff] %v440_v21  ;;  %v441_v23 = vsel %vm313_vm12, %v249_v9, %v377_v18  ;;  %vm314_vm13 = vcmp.ge.f32.partialorder %v250_v19, 0.0  ;;  %v378_v24 = vmul.f32 0.1, %v250_v19  ;;  %v251_v25 = vadd.f32 %v602_v44, %v181_v20 }
  0x70   :  { %505 = vst [vmem:[%s1074_s4 + $0x1e0] sm:$0xff] %v441_v23  ;;  %v252_v27 = vadd.f32 %v602_v44, %v182_v22 }
  0x71   :  { %v442_v28 = vsel %vm314_vm13, %v250_v19, %v378_v24  ;;  %vm315_vm14 = vcmp.ge.f32.partialorder %v251_v25, 0.0  ;;  %v379_v29 = vmul.f32 0.1, %v251_v25 }
  0x72   :  { %506 = vst [vmem:[%s1074_s4 + $0x1e8] sm:$0xff] %v442_v28  ;;  %vm316_vm15 = vcmp.ge.f32.partialorder %v252_v27, 0.0  ;;  %v380_v26 = vmul.f32 0.1, %v252_v27 }
  0x73   :  { %v443_v30 = vsel %vm315_vm14, %v251_v25, %v379_v29 }
  0x74   :  { %507 = vst [vmem:[%s1074_s4 + $0x1f0] sm:$0xff] %v443_v30  ;;  %v444_v31 = vsel %vm316_vm15, %v252_v27, %v380_v26 }
  0x75   :  { %508 = vst [vmem:[%s1074_s4 + $0x1f8] sm:$0xff] %v444_v31 }

// kernel: discriminator_forward.9
= control target key start
LH: loop header
LB: loop body
LE: loop exit
PB: predicated region body
PF: predicated region fallthrough
CT: control target
= control target key end

     0   :  { %vm1677_vm0 = vcmask 1040384   ;;  %vm1679_vm1 = vcmask 1041408   ;;  %s2508_s1 = inlined_call_operand.vmem [shape: bf16[128,128], index: 1, kind: input, shape index: {}]   ;;  %s2509_s0 = inlined_call_operand.vmem [shape: bf16[512,128], index: 0, kind: input, shape index: {}]   ;;  %s2510_s2 = inlined_call_operand.vmem [shape: f32[1,128], index: 2, kind: input, shape index: {}]   ;;  %s2511_s3 = inlined_call_operand.vmem [shape: f32[512,128], index: 3, kind: output, shape index: {0}]   ;;  %s2512_s4 = inlined_call_operand.vmem [shape: f32[8,128], index: 4, kind: output, shape index: {1}]  }
   0x1   :  { %v1867_v0 = vld [vmem:[%s2508_s1] sm:$0xff]   ;;  %v1868_v1 = vld [vmem:[%s2508_s1 + $0x8] sm:$0xff]   ;;  %v1869_v2 = vld [vmem:[%s2508_s1 + $0x10] sm:$0xff]  }
   0x2   :  { %1771 = vmatprep.subr.bf16.mxu0 %v1867_v0  ;;  %1851 = vmatprep.subr.bf16.mxu1 %v1867_v0  ;;  %v1870_v3 = vld [vmem:[%s2508_s1 + $0x18] sm:$0xff]   ;;  %v1875_v4 = vld [vmem:[%s2509_s0] sm:$0xff]   ;;  %v1872_v6 = vld [vmem:[%s2508_s1 + $0x28] sm:$0xff]  }
   0x3   :  { %1772 = vmatpush3.bf16.msra.mxu0 %v1867_v0  ;;  %1859 = vmatpush3.bf16.msra.mxu1 %v1867_v0  ;;  %v1871_v5 = vld [vmem:[%s2508_s1 + $0x20] sm:$0xff]   ;;  %v1873_v7 = vld [vmem:[%s2508_s1 + $0x30] sm:$0xff]   ;;  %v1874_v8 = vld [vmem:[%s2508_s1 + $0x38] sm:$0xff]  }
   0x4   :  { %1773 = vmatprep.subr.bf16.mxu0 %v1868_v1  ;;  %1852 = vmatprep.subr.bf16.mxu1 %v1868_v1  ;;  %v1891_v9 = vld [vmem:[%s2509_s0 + $0x80] sm:$0xff]   ;;  %v1876_v10 = vld [vmem:[%s2509_s0 + $0x8] sm:$0xff]   ;;  %v1877_v11 = vld [vmem:[%s2509_s0 + $0x10] sm:$0xff]  }
   0x5   :  { %1787 = vmatprep.mubr.bf16.mxu0 %v1875_v4  ;;  %1819 = vmatprep.mubr.bf16.mxu1 %v1891_v9  ;;  %v1892_v12 = vld [vmem:[%s2509_s0 + $0x88] sm:$0xff]   ;;  %v1893_v13 = vld [vmem:[%s2509_s0 + $0x90] sm:$0xff]   ;;  %v1878_v14 = vld [vmem:[%s2509_s0 + $0x18] sm:$0xff]  }
   0x6   :  { %v1879_v15 = vld [vmem:[%s2509_s0 + $0x20] sm:$0xff]   ;;  %v1894_v16 = vld [vmem:[%s2509_s0 + $0x98] sm:$0xff]   ;;  %v1880_v18 = vld [vmem:[%s2509_s0 + $0x28] sm:$0xff]  }
   0x7   :  { %1774 = vmatpush3.bf16.msra.mxu0 %v1868_v1  ;;  %1860 = vmatpush3.bf16.msra.mxu1 %v1868_v1  ;;  %v1895_v17 = vld [vmem:[%s2509_s0 + $0xa0] sm:$0xff]   ;;  %v1896_v19 = vld [vmem:[%s2509_s0 + $0xa8] sm:$0xff]   ;;  %v1881_v20 = vld [vmem:[%s2509_s0 + $0x30] sm:$0xff]  }
   0x8   :  { %1775 = vmatprep.subr.bf16.mxu0 %v1869_v2  ;;  %1853 = vmatprep.subr.bf16.mxu1 %v1869_v2  ;;  %v1897_v21 = vld [vmem:[%s2509_s0 + $0xb0] sm:$0xff]   ;;  %v1882_v22 = vld [vmem:[%s2509_s0 + $0x38] sm:$0xff]   ;;  %v1883_v24 = vld [vmem:[%s2509_s0 + $0x40] sm:$0xff]  }
   0x9   :  { %v1898_v23 = vld [vmem:[%s2509_s0 + $0xb8] sm:$0xff]   ;;  %v1899_v25 = vld [vmem:[%s2509_s0 + $0xc0] sm:$0xff]   ;;  %v1884_v26 = vld [vmem:[%s2509_s0 + $0x48] sm:$0xff]  }
   0xa   :  { %v1900_v27 = vld [vmem:[%s2509_s0 + $0xc8] sm:$0xff]   ;;  %v1885_v28 = vld [vmem:[%s2509_s0 + $0x50] sm:$0xff]   ;;  %v1886_v30 = vld [vmem:[%s2509_s0 + $0x58] sm:$0xff]  }
   0xb   :  { %1776 = vmatpush3.bf16.msra.mxu0 %v1869_v2  ;;  %1861 = vmatpush3.bf16.msra.mxu1 %v1869_v2  ;;  %v1901_v29 = vld [vmem:[%s2509_s0 + $0xd0] sm:$0xff]   ;;  %v1902_v31 = vld [vmem:[%s2509_s0 + $0xd8] sm:$0xff]   ;;  %v1887_v32 = vld [vmem:[%s2509_s0 + $0x60] sm:$0xff]  }
   0xc   :  { %1777 = vmatprep.subr.bf16.mxu0 %v1870_v3  ;;  %1854 = vmatprep.subr.bf16.mxu1 %v1870_v3  ;;  %v1903_v33 = vld [vmem:[%s2509_s0 + $0xe0] sm:$0xff]   ;;  %v1888_v34 = vld [vmem:[%s2509_s0 + $0x68] sm:$0xff]   ;;  %v1889_v36 = vld [vmem:[%s2509_s0 + $0x70] sm:$0xff]  }
   0xd   :  { %v1904_v35 = vld [vmem:[%s2509_s0 + $0xe8] sm:$0xff]   ;;  %v1905_v37 = vld [vmem:[%s2509_s0 + $0xf0] sm:$0xff]   ;;  %v1890_v38 = vld [vmem:[%s2509_s0 + $0x78] sm:$0xff]  }
   0xe   :  { %v1906_v39 = vld [vmem:[%s2509_s0 + $0xf8] sm:$0xff]   ;;  %v2055_v40 = vld [vmem:[%s2510_s2] ss:$0 sm:$0xff] }
   0xf   :  { %1778 = vmatpush3.bf16.msra.mxu0 %v1870_v3  ;;  %1862 = vmatpush3.bf16.msra.mxu1 %v1870_v3 }
  0x10   :  { %1779 = vmatprep.subr.bf16.mxu0 %v1871_v5  ;;  %1855 = vmatprep.subr.bf16.mxu1 %v1871_v5 }
  0x13   :  { %1780 = vmatpush3.bf16.msra.mxu0 %v1871_v5  ;;  %1863 = vmatpush3.bf16.msra.mxu1 %v1871_v5 }
  0x14   :  { %1781 = vmatprep.subr.bf16.mxu0 %v1872_v6  ;;  %1856 = vmatprep.subr.bf16.mxu1 %v1872_v6 }
  0x17   :  { %1782 = vmatpush3.bf16.msra.mxu0 %v1872_v6  ;;  %1864 = vmatpush3.bf16.msra.mxu1 %v1872_v6 }
  0x18   :  { %1783 = vmatprep.subr.bf16.mxu0 %v1873_v7  ;;  %1857 = vmatprep.subr.bf16.mxu1 %v1873_v7 }
  0x1b   :  { %1784 = vmatpush3.bf16.msra.mxu0 %v1873_v7  ;;  %1865 = vmatpush3.bf16.msra.mxu1 %v1873_v7 }
  0x1c   :  { %1785 = vmatprep.subr.bf16.mxu0 %v1874_v8  ;;  %1858 = vmatprep.subr.bf16.mxu1 %v1874_v8 }
  0x1f   :  { %1786 = vmatpush3.bf16.msra.mxu0 %v1874_v8  ;;  %1866 = vmatpush3.bf16.msra.mxu1 %v1874_v8 }
  0x22   :  { %1788 = vmatmul.mubr.bf16.vlgmr.msra.gmra.mrb[0].mxu0 %v1876_v10  ;;  %1820 = vmatmul.mubr.bf16.vlgmr.msra.gmra.mrb[0].mxu1 %v1892_v12 }
  0x23   :  { %1791 = vmatprep.mubr.bf16.mxu0 %v1877_v11  ;;  %1823 = vmatprep.mubr.bf16.mxu1 %v1893_v13 }
  0x2a   :  { %1792 = vmatmul.mubr.bf16.gmra.mrb[4].mxu0 %v1878_v14  ;;  %1824 = vmatmul.mubr.bf16.gmra.mrb[4].mxu1 %v1894_v16 }
  0x2b   :  { %1795 = vmatprep.mubr.bf16.mxu0 %v1879_v15  ;;  %1827 = vmatprep.mubr.bf16.mxu1 %v1895_v17 }
  0x32   :  { %1796 = vmatmul.mubr.bf16.gmra.mrb[8].mxu0 %v1880_v18  ;;  %1828 = vmatmul.mubr.bf16.gmra.mrb[8].mxu1 %v1896_v19 }
  0x33   :  { %1799 = vmatprep.mubr.bf16.mxu0 %v1881_v20  ;;  %1831 = vmatprep.mubr.bf16.mxu1 %v1897_v21 }
  0x3a   :  { %1800 = vmatmul.mubr.bf16.gmra.mrb[12].mxu0 %v1882_v22  ;;  %1832 = vmatmul.mubr.bf16.gmra.mrb[12].mxu1 %v1898_v23 }
  0x3b   :  { %1803 = vmatprep.mubr.bf16.mxu0 %v1883_v24  ;;  %1835 = vmatprep.mubr.bf16.mxu1 %v1899_v25 }
  0x42   :  { %1804 = vmatmul.mubr.bf16.gmra.mrb[16].mxu0 %v1884_v26  ;;  %1836 = vmatmul.mubr.bf16.gmra.mrb[16].mxu1 %v1900_v27 }
  0x43   :  { %1807 = vmatprep.mubr.bf16.mxu0 %v1885_v28  ;;  %1839 = vmatprep.mubr.bf16.mxu1 %v1901_v29 }
  0x4a   :  { %1808 = vmatmul.mubr.bf16.gmra.mrb[20].mxu0 %v1886_v30  ;;  %1840 = vmatmul.mubr.bf16.gmra.mrb[20].mxu1 %v1902_v31 }
  0x4b   :  { %1811 = vmatprep.mubr.bf16.mxu0 %v1887_v32  ;;  %1843 = vmatprep.mubr.bf16.mxu1 %v1903_v33 }
  0x52   :  { %1812 = vmatmul.mubr.bf16.gmra.mrb[24].mxu0 %v1888_v34  ;;  %1844 = vmatmul.mubr.bf16.gmra.mrb[24].mxu1 %v1904_v35 }
  0x53   :  { %1815 = vmatprep.mubr.bf16.mxu0 %v1889_v36  ;;  %1847 = vmatprep.mubr.bf16.mxu1 %v1905_v37 }
  0x5a   :  { %1816 = vmatmul.mubr.bf16.gmra.mrb[28].mxu0 %v1890_v38  ;;  %1848 = vmatmul.mubr.bf16.gmra.mrb[28].mxu1 %v1906_v39 }
  0xf5   :  { %v1789_v41 = vpop.f32.mrb[0].mxu0  ;;  %v1821_v42 = vpop.f32.mrb[0].mxu1 }
  0xf6   :  { %v1285_v43 = vadd.f32 %v1789_v41, %v2055_v40  ;;  %v826_v44 = vpop.f32.mrb[1].mxu0  ;;  %v2059_v45 = vadd.f32 %v1821_v42, %v2055_v40  ;;  %v954_v46 = vpop.f32.mrb[1].mxu1 }
  0xf7   :  { %v1283_v47 = vadd.f32 %v2055_v40, %v826_v44  ;;  %v1790_v48 = vpop.f32.mrb[2].mxu0  ;;  %v2063_v49 = vadd.f32 %v2055_v40, %v954_v46  ;;  %v1822_v50 = vpop.f32.mrb[2].mxu1 }
  0xf8   :  { %1349 = vst [vmem:[%s2511_s3 + $0x10] sm:$0xff] %v1285_v43  ;;  %v1286_v51 = vadd.f32 %v1790_v48, %v2055_v40  ;;  %v829_v52 = vpop.f32.mrb[3].mxu0  ;;  %1381 = vst [vmem:[%s2511_s3 + $0x110] sm:$0xff] %v2059_v45  ;;  %v2074_v53 = vadd.f32 %v1822_v50, %v2055_v40  ;;  %v957_v54 = vpop.f32.mrb[3].mxu1  ;;  %v1546_v60 = vmul.f32 %v1285_v43, %v1285_v43 }
  0xf9   :  { %1347 = vst [vmem:[%s2511_s3] sm:$0xff] %v1283_v47  ;;  %v1284_v55 = vadd.f32 %v2055_v40, %v829_v52  ;;  %1379 = vst [vmem:[%s2511_s3 + $0x100] sm:$0xff] %v2063_v49  ;;  %v2085_v56 = vadd.f32 %v2055_v40, %v957_v54  ;;  %v1544_v57 = vmul.f32 %v1283_v47, %v1283_v47 }
  0xfa   :  { %1350 = vst [vmem:[%s2511_s3 + $0x18] sm:$0xff] %v1286_v51  ;;  %1382 = vst [vmem:[%s2511_s3 + $0x118] sm:$0xff] %v2074_v53  ;;  %v1547_v1 = vmul.f32 %v1286_v51, %v1286_v51 }
  0xfb   :  { %1348 = vst [vmem:[%s2511_s3 + $0x8] sm:$0xff] %v1284_v55  ;;  %v1475_v58 = vadd.f32 %v1284_v55, %v1283_v47  ;;  %v1545_v59 = vmul.f32 %v1284_v55, %v1284_v55  ;;  %1380 = vst [vmem:[%s2511_s3 + $0x108] sm:$0xff] %v2085_v56 }
  0xfd   :  { %v1476_v61 = vadd.f32 %v1475_v58, %v1285_v43  ;;  %v1608_v62 = vadd.f32 %v1545_v59, %v1544_v57  ;;  %v1793_v63 = vpop.f32.mrb[4].mxu0  ;;  %v1825_v0 = vpop.f32.mrb[4].mxu1 }
  0xfe   :  { %v1289_v2 = vadd.f32 %v1793_v63, %v2055_v40  ;;  %v842_v3 = vpop.f32.mrb[5].mxu0  ;;  %v2103_v4 = vadd.f32 %v1825_v0, %v2055_v40  ;;  %v970_v5 = vpop.f32.mrb[5].mxu1 }
  0xff   :  { %v1609_v6 = vadd.f32 %v1608_v62, %v1546_v60  ;;  %v1287_v7 = vadd.f32 %v2055_v40, %v842_v3  ;;  %v1477_v8 = vadd.f32 %v1476_v61, %v1286_v51  ;;  %v1794_v9 = vpop.f32.mrb[6].mxu0  ;;  %v2107_v10 = vadd.f32 %v2055_v40, %v970_v5  ;;  %v1826_v11 = vpop.f32.mrb[6].mxu1 }
 0x100   :  { %1353 = vst [vmem:[%s2511_s3 + $0x30] sm:$0xff] %v1289_v2  ;;  %v1290_v12 = vadd.f32 %v1794_v9, %v2055_v40  ;;  %v845_v13 = vpop.f32.mrb[7].mxu0  ;;  %1385 = vst [vmem:[%s2511_s3 + $0x130] sm:$0xff] %v2103_v4  ;;  %v2118_v14 = vadd.f32 %v1826_v11, %v2055_v40  ;;  %v973_v15 = vpop.f32.mrb[7].mxu1  ;;  %v1550_v24 = vmul.f32 %v1289_v2, %v1289_v2 }
 0x101   :  { %1351 = vst [vmem:[%s2511_s3 + $0x20] sm:$0xff] %v1287_v7  ;;  %v1478_v16 = vadd.f32 %v1477_v8, %v1287_v7  ;;  %v1548_v17 = vmul.f32 %v1287_v7, %v1287_v7  ;;  %v1610_v18 = vadd.f32 %v1609_v6, %v1547_v1  ;;  %v1288_v19 = vadd.f32 %v2055_v40, %v845_v13 }
 0x102   :  { %1383 = vst [vmem:[%s2511_s3 + $0x120] sm:$0xff] %v2107_v10  ;;  %1354 = vst [vmem:[%s2511_s3 + $0x38] sm:$0xff] %v1290_v12  ;;  %v2136_v20 = vadd.f32 %v2055_v40, %v973_v15  ;;  %v1551_v29 = vmul.f32 %v1290_v12, %v1290_v12 }
 0x103   :  { %1386 = vst [vmem:[%s2511_s3 + $0x138] sm:$0xff] %v2118_v14  ;;  %v1611_v21 = vadd.f32 %v1610_v18, %v1548_v17  ;;  %1352 = vst [vmem:[%s2511_s3 + $0x28] sm:$0xff] %v1288_v19  ;;  %v1479_v22 = vadd.f32 %v1478_v16, %v1288_v19  ;;  %v1549_v23 = vmul.f32 %v1288_v19, %v1288_v19 }
 0x104   :  { %1384 = vst [vmem:[%s2511_s3 + $0x128] sm:$0xff] %v2136_v20 }
 0x105   :  { %v1480_v25 = vadd.f32 %v1479_v22, %v1289_v2  ;;  %v1612_v26 = vadd.f32 %v1611_v21, %v1549_v23  ;;  %v1797_v27 = vpop.f32.mrb[8].mxu0  ;;  %v1829_v28 = vpop.f32.mrb[8].mxu1 }
 0x106   :  { %v1293_v30 = vadd.f32 %v1797_v27, %v2055_v40  ;;  %v858_v31 = vpop.f32.mrb[9].mxu0  ;;  %v2147_v32 = vadd.f32 %v1829_v28, %v2055_v40  ;;  %v986_v33 = vpop.f32.mrb[9].mxu1 }
 0x107   :  { %v1613_v34 = vadd.f32 %v1612_v26, %v1550_v24  ;;  %v1291_v35 = vadd.f32 %v2055_v40, %v858_v31  ;;  %v1481_v36 = vadd.f32 %v1480_v25, %v1290_v12  ;;  %v1798_v37 = vpop.f32.mrb[10].mxu0  ;;  %v2151_v38 = vadd.f32 %v2055_v40, %v986_v33  ;;  %v1830_v39 = vpop.f32.mrb[10].mxu1 }
 0x108   :  { %1357 = vst [vmem:[%s2511_s3 + $0x50] sm:$0xff] %v1293_v30  ;;  %v1294_v41 = vadd.f32 %v1798_v37, %v2055_v40  ;;  %v861_v42 = vpop.f32.mrb[11].mxu0  ;;  %1389 = vst [vmem:[%s2511_s3 + $0x150] sm:$0xff] %v2147_v32  ;;  %v2162_v43 = vadd.f32 %v1830_v39, %v2055_v40  ;;  %v989_v44 = vpop.f32.mrb[11].mxu1  ;;  %v1554_v57 = vmul.f32 %v1293_v30, %v1293_v30 }
 0x109   :  { %1355 = vst [vmem:[%s2511_s3 + $0x40] sm:$0xff] %v1291_v35  ;;  %v1482_v46 = vadd.f32 %v1481_v36, %v1291_v35  ;;  %v1552_v47 = vmul.f32 %v1291_v35, %v1291_v35  ;;  %v1614_v48 = vadd.f32 %v1613_v34, %v1551_v29  ;;  %v1292_v50 = vadd.f32 %v2055_v40, %v861_v42 }
 0x10a   :  { %1387 = vst [vmem:[%s2511_s3 + $0x140] sm:$0xff] %v2151_v38  ;;  %1358 = vst [vmem:[%s2511_s3 + $0x58] sm:$0xff] %v1294_v41  ;;  %v2180_v51 = vadd.f32 %v2055_v40, %v989_v44  ;;  %v1555_v62 = vmul.f32 %v1294_v41, %v1294_v41 }
 0x10b   :  { %1390 = vst [vmem:[%s2511_s3 + $0x158] sm:$0xff] %v2162_v43  ;;  %v1615_v52 = vadd.f32 %v1614_v48, %v1552_v47  ;;  %1356 = vst [vmem:[%s2511_s3 + $0x48] sm:$0xff] %v1292_v50  ;;  %v1483_v54 = vadd.f32 %v1482_v46, %v1292_v50  ;;  %v1553_v55 = vmul.f32 %v1292_v50, %v1292_v50 }
 0x10c   :  { %1388 = vst [vmem:[%s2511_s3 + $0x148] sm:$0xff] %v2180_v51 }
 0x10d   :  { %v1484_v58 = vadd.f32 %v1483_v54, %v1293_v30  ;;  %v1616_v59 = vadd.f32 %v1615_v52, %v1553_v55  ;;  %v1801_v60 = vpop.f32.mrb[12].mxu0  ;;  %v1833_v61 = vpop.f32.mrb[12].mxu1 }
 0x10e   :  { %v1297_v63 = vadd.f32 %v1801_v60, %v2055_v40  ;;  %v874_v0 = vpop.f32.mrb[13].mxu0  ;;  %v2191_v1 = vadd.f32 %v1833_v61, %v2055_v40  ;;  %v1002_v2 = vpop.f32.mrb[13].mxu1 }
 0x10f   :  { %v1617_v3 = vadd.f32 %v1616_v59, %v1554_v57  ;;  %v1295_v5 = vadd.f32 %v2055_v40, %v874_v0  ;;  %v1485_v6 = vadd.f32 %v1484_v58, %v1294_v41  ;;  %v1802_v7 = vpop.f32.mrb[14].mxu0  ;;  %v2195_v8 = vadd.f32 %v2055_v40, %v1002_v2  ;;  %v1834_v9 = vpop.f32.mrb[14].mxu1 }
 0x110   :  { %1361 = vst [vmem:[%s2511_s3 + $0x70] sm:$0xff] %v1297_v63  ;;  %v1298_v11 = vadd.f32 %v1802_v7, %v2055_v40  ;;  %v877_v12 = vpop.f32.mrb[15].mxu0  ;;  %1393 = vst [vmem:[%s2511_s3 + $0x170] sm:$0xff] %v2191_v1  ;;  %v2206_v13 = vadd.f32 %v1834_v9, %v2055_v40  ;;  %v1005_v15 = vpop.f32.mrb[15].mxu1  ;;  %v1558_v25 = vmul.f32 %v1297_v63, %v1297_v63 }
 0x111   :  { %1359 = vst [vmem:[%s2511_s3 + $0x60] sm:$0xff] %v1295_v5  ;;  %v1486_v16 = vadd.f32 %v1485_v6, %v1295_v5  ;;  %v1556_v17 = vmul.f32 %v1295_v5, %v1295_v5  ;;  %v1618_v18 = vadd.f32 %v1617_v3, %v1555_v62  ;;  %v1296_v19 = vadd.f32 %v2055_v40, %v877_v12 }
 0x112   :  { %1391 = vst [vmem:[%s2511_s3 + $0x160] sm:$0xff] %v2195_v8  ;;  %1362 = vst [vmem:[%s2511_s3 + $0x78] sm:$0xff] %v1298_v11  ;;  %v2224_v21 = vadd.f32 %v2055_v40, %v1005_v15  ;;  %v1559_v30 = vmul.f32 %v1298_v11, %v1298_v11 }
 0x113   :  { %1394 = vst [vmem:[%s2511_s3 + $0x178] sm:$0xff] %v2206_v13  ;;  %v1619_v22 = vadd.f32 %v1618_v18, %v1556_v17  ;;  %1360 = vst [vmem:[%s2511_s3 + $0x68] sm:$0xff] %v1296_v19  ;;  %v1487_v23 = vadd.f32 %v1486_v16, %v1296_v19  ;;  %v1557_v24 = vmul.f32 %v1296_v19, %v1296_v19 }
 0x114   :  { %1392 = vst [vmem:[%s2511_s3 + $0x168] sm:$0xff] %v2224_v21 }
 0x115   :  { %v1488_v26 = vadd.f32 %v1487_v23, %v1297_v63  ;;  %v1620_v27 = vadd.f32 %v1619_v22, %v1557_v24  ;;  %v1805_v28 = vpop.f32.mrb[16].mxu0  ;;  %v1837_v29 = vpop.f32.mrb[16].mxu1 }
 0x116   :  { %v1301_v31 = vadd.f32 %v1805_v28, %v2055_v40  ;;  %v890_v33 = vpop.f32.mrb[17].mxu0  ;;  %v2235_v34 = vadd.f32 %v1837_v29, %v2055_v40  ;;  %v1018_v35 = vpop.f32.mrb[17].mxu1 }
 0x117   :  { %v1621_v36 = vadd.f32 %v1620_v27, %v1558_v25  ;;  %v1299_v37 = vadd.f32 %v2055_v40, %v890_v33  ;;  %v1489_v39 = vadd.f32 %v1488_v26, %v1298_v11  ;;  %v1806_v41 = vpop.f32.mrb[18].mxu0  ;;  %v2239_v42 = vadd.f32 %v2055_v40, %v1018_v35  ;;  %v1838_v44 = vpop.f32.mrb[18].mxu1 }
 0x118   :  { %1365 = vst [vmem:[%s2511_s3 + $0x90] sm:$0xff] %v1301_v31  ;;  %v1302_v46 = vadd.f32 %v1806_v41, %v2055_v40  ;;  %v893_v47 = vpop.f32.mrb[19].mxu0  ;;  %1397 = vst [vmem:[%s2511_s3 + $0x190] sm:$0xff] %v2235_v34  ;;  %v2250_v48 = vadd.f32 %v1838_v44, %v2055_v40  ;;  %v1021_v50 = vpop.f32.mrb[19].mxu1  ;;  %v1562_v62 = vmul.f32 %v1301_v31, %v1301_v31 }
 0x119   :  { %1363 = vst [vmem:[%s2511_s3 + $0x80] sm:$0xff] %v1299_v37  ;;  %v1490_v52 = vadd.f32 %v1489_v39, %v1299_v37  ;;  %v1560_v54 = vmul.f32 %v1299_v37, %v1299_v37  ;;  %v1622_v55 = vadd.f32 %v1621_v36, %v1559_v30  ;;  %v1300_v57 = vadd.f32 %v2055_v40, %v893_v47 }
 0x11a   :  { %1395 = vst [vmem:[%s2511_s3 + $0x180] sm:$0xff] %v2239_v42  ;;  %1366 = vst [vmem:[%s2511_s3 + $0x98] sm:$0xff] %v1302_v46  ;;  %v2268_v58 = vadd.f32 %v2055_v40, %v1021_v50  ;;  %v1563_v5 = vmul.f32 %v1302_v46, %v1302_v46 }
 0x11b   :  { %1398 = vst [vmem:[%s2511_s3 + $0x198] sm:$0xff] %v2250_v48  ;;  %v1623_v59 = vadd.f32 %v1622_v55, %v1560_v54  ;;  %1364 = vst [vmem:[%s2511_s3 + $0x88] sm:$0xff] %v1300_v57  ;;  %v1491_v60 = vadd.f32 %v1490_v52, %v1300_v57  ;;  %v1561_v61 = vmul.f32 %v1300_v57, %v1300_v57 }
 0x11c   :  { %1396 = vst [vmem:[%s2511_s3 + $0x188] sm:$0xff] %v2268_v58 }
 0x11d   :  { %v1492_v63 = vadd.f32 %v1491_v60, %v1301_v31  ;;  %v1624_v0 = vadd.f32 %v1623_v59, %v1561_v61  ;;  %v1809_v2 = vpop.f32.mrb[20].mxu0  ;;  %v1841_v3 = vpop.f32.mrb[20].mxu1 }
 0x11e   :  { %v1305_v6 = vadd.f32 %v1809_v2, %v2055_v40  ;;  %v906_v7 = vpop.f32.mrb[21].mxu0  ;;  %v2279_v9 = vadd.f32 %v1841_v3, %v2055_v40  ;;  %v1034_v11 = vpop.f32.mrb[21].mxu1 }
 0x11f   :  { %v1625_v12 = vadd.f32 %v1624_v0, %v1562_v62  ;;  %v1303_v15 = vadd.f32 %v2055_v40, %v906_v7  ;;  %v1493_v16 = vadd.f32 %v1492_v63, %v1302_v46  ;;  %v1810_v17 = vpop.f32.mrb[22].mxu0  ;;  %v2283_v18 = vadd.f32 %v2055_v40, %v1034_v11  ;;  %v1842_v19 = vpop.f32.mrb[22].mxu1 }
 0x120   :  { %1369 = vst [vmem:[%s2511_s3 + $0xb0] sm:$0xff] %v1305_v6  ;;  %v1306_v22 = vadd.f32 %v1810_v17, %v2055_v40  ;;  %v909_v23 = vpop.f32.mrb[23].mxu0  ;;  %1401 = vst [vmem:[%s2511_s3 + $0x1b0] sm:$0xff] %v2279_v9  ;;  %v2294_v24 = vadd.f32 %v1842_v19, %v2055_v40  ;;  %v1037_v25 = vpop.f32.mrb[23].mxu1  ;;  %v1566_v36 = vmul.f32 %v1305_v6, %v1305_v6 }
 0x121   :  { %1367 = vst [vmem:[%s2511_s3 + $0xa0] sm:$0xff] %v1303_v15  ;;  %v1494_v26 = vadd.f32 %v1493_v16, %v1303_v15  ;;  %v1564_v27 = vmul.f32 %v1303_v15, %v1303_v15  ;;  %v1626_v28 = vadd.f32 %v1625_v12, %v1563_v5  ;;  %v1304_v29 = vadd.f32 %v2055_v40, %v909_v23 }
 0x122   :  { %1399 = vst [vmem:[%s2511_s3 + $0x1a0] sm:$0xff] %v2283_v18  ;;  %1370 = vst [vmem:[%s2511_s3 + $0xb8] sm:$0xff] %v1306_v22  ;;  %v2312_v30 = vadd.f32 %v2055_v40, %v1037_v25  ;;  %v1567_v46 = vmul.f32 %v1306_v22, %v1306_v22 }
 0x123   :  { %1402 = vst [vmem:[%s2511_s3 + $0x1b8] sm:$0xff] %v2294_v24  ;;  %v1627_v31 = vadd.f32 %v1626_v28, %v1564_v27  ;;  %1368 = vst [vmem:[%s2511_s3 + $0xa8] sm:$0xff] %v1304_v29  ;;  %v1495_v33 = vadd.f32 %v1494_v26, %v1304_v29  ;;  %v1565_v35 = vmul.f32 %v1304_v29, %v1304_v29 }
 0x124   :  { %1400 = vst [vmem:[%s2511_s3 + $0x1a8] sm:$0xff] %v2312_v30 }
 0x125   :  { %v1496_v37 = vadd.f32 %v1495_v33, %v1305_v6  ;;  %v1628_v39 = vadd.f32 %v1627_v31, %v1565_v35  ;;  %v1813_v41 = vpop.f32.mrb[24].mxu0  ;;  %v1845_v44 = vpop.f32.mrb[24].mxu1 }
 0x126   :  { %v1309_v47 = vadd.f32 %v1813_v41, %v2055_v40  ;;  %v922_v50 = vpop.f32.mrb[25].mxu0  ;;  %v2323_v52 = vadd.f32 %v1845_v44, %v2055_v40  ;;  %v1050_v54 = vpop.f32.mrb[25].mxu1 }
 0x127   :  { %v1629_v55 = vadd.f32 %v1628_v39, %v1566_v36  ;;  %v1307_v57 = vadd.f32 %v2055_v40, %v922_v50  ;;  %v1497_v59 = vadd.f32 %v1496_v37, %v1306_v22  ;;  %v1814_v60 = vpop.f32.mrb[26].mxu0  ;;  %v2327_v61 = vadd.f32 %v2055_v40, %v1050_v54  ;;  %v1846_v62 = vpop.f32.mrb[26].mxu1 }
 0x128   :  { %1373 = vst [vmem:[%s2511_s3 + $0xd0] sm:$0xff] %v1309_v47  ;;  %v1310_v63 = vadd.f32 %v1814_v60, %v2055_v40  ;;  %v925_v0 = vpop.f32.mrb[27].mxu0  ;;  %1405 = vst [vmem:[%s2511_s3 + $0x1d0] sm:$0xff] %v2323_v52  ;;  %v2338_v2 = vadd.f32 %v1846_v62, %v2055_v40  ;;  %v1053_v3 = vpop.f32.mrb[27].mxu1  ;;  %v1570_v19 = vmul.f32 %v1309_v47, %v1309_v47 }
 0x129   :  { %1371 = vst [vmem:[%s2511_s3 + $0xc0] sm:$0xff] %v1307_v57  ;;  %v1498_v5 = vadd.f32 %v1497_v59, %v1307_v57  ;;  %v1568_v6 = vmul.f32 %v1307_v57, %v1307_v57  ;;  %v1630_v7 = vadd.f32 %v1629_v55, %v1567_v46  ;;  %v1308_v11 = vadd.f32 %v2055_v40, %v925_v0 }
 0x12a   :  { %1403 = vst [vmem:[%s2511_s3 + $0x1c0] sm:$0xff] %v2327_v61  ;;  %1374 = vst [vmem:[%s2511_s3 + $0xd8] sm:$0xff] %v1310_v63  ;;  %v2356_v12 = vadd.f32 %v2055_v40, %v1053_v3  ;;  %v1571_v27 = vmul.f32 %v1310_v63, %v1310_v63 }
 0x12b   :  { %1406 = vst [vmem:[%s2511_s3 + $0x1d8] sm:$0xff] %v2338_v2  ;;  %v1631_v15 = vadd.f32 %v1630_v7, %v1568_v6  ;;  %1372 = vst [vmem:[%s2511_s3 + $0xc8] sm:$0xff] %v1308_v11  ;;  %v1499_v16 = vadd.f32 %v1498_v5, %v1308_v11  ;;  %v1569_v17 = vmul.f32 %v1308_v11, %v1308_v11 }
 0x12c   :  { %1404 = vst [vmem:[%s2511_s3 + $0x1c8] sm:$0xff] %v2356_v12 }
 0x12d   :  { %v1500_v22 = vadd.f32 %v1499_v16, %v1309_v47  ;;  %v1632_v23 = vadd.f32 %v1631_v15, %v1569_v17  ;;  %v1817_v25 = vpop.f32.mrb[28].mxu0  ;;  %v1849_v26 = vpop.f32.mrb[28].mxu1 }
 0x12e   :  { %v1313_v28 = vadd.f32 %v1817_v25, %v2055_v40  ;;  %v938_v29 = vpop.f32.mrb[29].mxu0  ;;  %v2367_v31 = vadd.f32 %v1849_v26, %v2055_v40  ;;  %v1066_v33 = vpop.f32.mrb[29].mxu1  ;;  %v1577_v25 = vmul.f32 %v2085_v56, %v2085_v56  ;;  %v1578_v26 = vmul.f32 %v2059_v45, %v2059_v45 }
 0x12f   :  { %v1633_v35 = vadd.f32 %v1632_v23, %v1570_v19  ;;  %v1311_v36 = vadd.f32 %v2055_v40, %v938_v29  ;;  %v1501_v37 = vadd.f32 %v1500_v22, %v1310_v63  ;;  %v1818_v39 = vpop.f32.mrb[30].mxu0  ;;  %v2371_v41 = vadd.f32 %v2055_v40, %v1066_v33  ;;  %v1850_v44 = vpop.f32.mrb[30].mxu1 }
 0x130   :  { %1377 = vst [vmem:[%s2511_s3 + $0xf0] sm:$0xff] %v1313_v28  ;;  %v1314_v46 = vadd.f32 %v1818_v39, %v2055_v40  ;;  %v941_v47 = vpop.f32.mrb[31].mxu0  ;;  %1409 = vst [vmem:[%s2511_s3 + $0x1f0] sm:$0xff] %v2367_v31  ;;  %v2382_v50 = vadd.f32 %v1850_v44, %v2055_v40  ;;  %v1069_v54 = vpop.f32.mrb[31].mxu1  ;;  %v1574_v5 = vmul.f32 %v1313_v28, %v1313_v28 }
 0x131   :  { %1375 = vst [vmem:[%s2511_s3 + $0xe0] sm:$0xff] %v1311_v36  ;;  %v1502_v55 = vadd.f32 %v1501_v37, %v1311_v36  ;;  %v1572_v57 = vmul.f32 %v1311_v36, %v1311_v36  ;;  %v1634_v59 = vadd.f32 %v1633_v35, %v1571_v27  ;;  %v1312_v60 = vadd.f32 %v2055_v40, %v941_v47 }
 0x132   :  { %1407 = vst [vmem:[%s2511_s3 + $0x1e0] sm:$0xff] %v2371_v41  ;;  %1378 = vst [vmem:[%s2511_s3 + $0xf8] sm:$0xff] %v1314_v46  ;;  %v2400_v62 = vadd.f32 %v2055_v40, %v1069_v54  ;;  %v1575_v11 = vmul.f32 %v1314_v46, %v1314_v46  ;;  %v1576_v40 = vmul.f32 %v2063_v49, %v2063_v49 }
 0x133   :  { %1410 = vst [vmem:[%s2511_s3 + $0x1f8] sm:$0xff] %v2382_v50  ;;  %v1635_v63 = vadd.f32 %v1634_v59, %v1572_v57  ;;  %1376 = vst [vmem:[%s2511_s3 + $0xe8] sm:$0xff] %v1312_v60  ;;  %v1503_v0 = vadd.f32 %v1502_v55, %v1312_v60  ;;  %v1573_v3 = vmul.f32 %v1312_v60, %v1312_v60 }
 0x134   :  { %1408 = vst [vmem:[%s2511_s3 + $0x1e8] sm:$0xff] %v2400_v62  ;;  %v1579_v29 = vmul.f32 %v2074_v53, %v2074_v53  ;;  %v1581_v44 = vmul.f32 %v2136_v20, %v2136_v20 }
 0x135   :  { %v1504_v6 = vadd.f32 %v1503_v0, %v1313_v28  ;;  %v1636_v7 = vadd.f32 %v1635_v63, %v1573_v3  ;;  %v1585_v63 = vmul.f32 %v2180_v51, %v2180_v51 }
 0x137   :  { %v1637_v15 = vadd.f32 %v1636_v7, %v1574_v5  ;;  %v1505_v16 = vadd.f32 %v1504_v6, %v1314_v46 }
 0x139   :  { %v1506_v17 = vadd.f32 %v1505_v16, %v2063_v49  ;;  %v1638_v19 = vadd.f32 %v1637_v15, %v1575_v11  ;;  %v1580_v49 = vmul.f32 %v2107_v10, %v2107_v10  ;;  %v1589_v16 = vmul.f32 %v2224_v21, %v2224_v21 }
 0x13b   :  { %v1639_v22 = vadd.f32 %v1638_v19, %v1576_v40  ;;  %v1507_v23 = vadd.f32 %v1506_v17, %v2085_v56 }
 0x13d   :  { %v1508_v27 = vadd.f32 %v1507_v23, %v2059_v45  ;;  %v1640_v28 = vadd.f32 %v1639_v22, %v1577_v25  ;;  %v1582_v45 = vmul.f32 %v2103_v4, %v2103_v4 }
 0x13f   :  { %v1641_v33 = vadd.f32 %v1640_v28, %v1578_v26  ;;  %v1509_v35 = vadd.f32 %v1508_v27, %v2074_v53  ;;  %v1583_v53 = vmul.f32 %v2118_v14, %v2118_v14  ;;  %v1593_v27 = vmul.f32 %v2268_v58, %v2268_v58 }
 0x141   :  { %v1510_v36 = vadd.f32 %v1509_v35, %v2107_v10  ;;  %v1642_v37 = vadd.f32 %v1641_v33, %v1579_v29  ;;  %v1584_v10 = vmul.f32 %v2151_v38, %v2151_v38 }
 0x143   :  { %v1643_v39 = vadd.f32 %v1642_v37, %v1580_v49  ;;  %v1511_v56 = vadd.f32 %v1510_v36, %v2136_v20 }
 0x145   :  { %v1512_v46 = vadd.f32 %v1511_v56, %v2103_v4  ;;  %v1644_v47 = vadd.f32 %v1643_v39, %v1581_v44  ;;  %v1586_v4 = vmul.f32 %v2147_v32, %v2147_v32  ;;  %v1597_v39 = vmul.f32 %v2312_v30, %v2312_v30 }
 0x147   :  { %v1645_v54 = vadd.f32 %v1644_v47, %v1582_v45  ;;  %v1513_v55 = vadd.f32 %v1512_v46, %v2118_v14  ;;  %v1587_v14 = vmul.f32 %v2162_v43, %v2162_v43 }
 0x149   :  { %v1514_v57 = vadd.f32 %v1513_v55, %v2151_v38  ;;  %v1646_v59 = vadd.f32 %v1645_v54, %v1583_v53  ;;  %v1588_v38 = vmul.f32 %v2195_v8, %v2195_v8  ;;  %v1601_v55 = vmul.f32 %v2356_v12, %v2356_v12 }
 0x14b   :  { %v1647_v60 = vadd.f32 %v1646_v59, %v1584_v10  ;;  %v1515_v20 = vadd.f32 %v1514_v57, %v2180_v51 }
 0x14d   :  { %v1516_v0 = vadd.f32 %v1515_v20, %v2147_v32  ;;  %v1648_v3 = vadd.f32 %v1647_v60, %v1585_v63  ;;  %v1590_v32 = vmul.f32 %v2191_v1, %v2191_v1 }
 0x14f   :  { %v1649_v5 = vadd.f32 %v1648_v3, %v1586_v4  ;;  %v1517_v6 = vadd.f32 %v1516_v0, %v2162_v43  ;;  %v1591_v43 = vmul.f32 %v2206_v13, %v2206_v13  ;;  %v1605_v0 = vmul.f32 %v2400_v62, %v2400_v62 }
 0x151   :  { %v1518_v7 = vadd.f32 %v1517_v6, %v2195_v8  ;;  %v1650_v11 = vadd.f32 %v1649_v5, %v1587_v14  ;;  %v1592_v8 = vmul.f32 %v2239_v42, %v2239_v42 }
 0x153   :  { %v1651_v15 = vadd.f32 %v1650_v11, %v1588_v38  ;;  %v1519_v51 = vadd.f32 %v1518_v7, %v2224_v21 }
 0x155   :  { %v1520_v40 = vadd.f32 %v1519_v51, %v2191_v1  ;;  %v1652_v17 = vadd.f32 %v1651_v15, %v1589_v16  ;;  %v1594_v1 = vmul.f32 %v2235_v34, %v2235_v34 }
 0x157   :  { %v1653_v19 = vadd.f32 %v1652_v17, %v1590_v32  ;;  %v1521_v22 = vadd.f32 %v1520_v40, %v2206_v13  ;;  %v1595_v13 = vmul.f32 %v2250_v48, %v2250_v48 }
 0x159   :  { %v1522_v23 = vadd.f32 %v1521_v22, %v2239_v42  ;;  %v1654_v25 = vadd.f32 %v1653_v19, %v1591_v43  ;;  %v1596_v42 = vmul.f32 %v2283_v18, %v2283_v18 }
 0x15b   :  { %v1655_v26 = vadd.f32 %v1654_v25, %v1592_v8  ;;  %v1523_v21 = vadd.f32 %v1522_v23, %v2268_v58 }
 0x15d   :  { %v1524_v28 = vadd.f32 %v1523_v21, %v2235_v34  ;;  %v1656_v29 = vadd.f32 %v1655_v26, %v1593_v27  ;;  %v1598_v34 = vmul.f32 %v2279_v9, %v2279_v9 }
 0x15f   :  { %v1657_v33 = vadd.f32 %v1656_v29, %v1594_v1  ;;  %v1525_v35 = vadd.f32 %v1524_v28, %v2250_v48  ;;  %v1599_v48 = vmul.f32 %v2294_v24, %v2294_v24 }
 0x161   :  { %v1526_v49 = vadd.f32 %v1525_v35, %v2283_v18  ;;  %v1658_v36 = vadd.f32 %v1657_v33, %v1595_v13  ;;  %v1600_v18 = vmul.f32 %v2327_v61, %v2327_v61 }
 0x163   :  { %v1659_v37 = vadd.f32 %v1658_v36, %v1596_v42  ;;  %v1527_v58 = vadd.f32 %v1526_v49, %v2312_v30 }
 0x165   :  { %v1528_v56 = vadd.f32 %v1527_v58, %v2279_v9  ;;  %v1660_v44 = vadd.f32 %v1659_v37, %v1597_v39  ;;  %v1602_v9 = vmul.f32 %v2323_v52, %v2323_v52 }
 0x167   :  { %v1661_v45 = vadd.f32 %v1660_v44, %v1598_v34  ;;  %v1529_v46 = vadd.f32 %v1528_v56, %v2294_v24  ;;  %v1603_v24 = vmul.f32 %v2338_v2, %v2338_v2 }
 0x169   :  { %v1530_v47 = vadd.f32 %v1529_v46, %v2327_v61  ;;  %v1662_v53 = vadd.f32 %v1661_v45, %v1599_v48  ;;  %v1604_v61 = vmul.f32 %v2371_v41, %v2371_v41 }
 0x16b   :  { %v1663_v54 = vadd.f32 %v1662_v53, %v1600_v18  ;;  %v1531_v30 = vadd.f32 %v1530_v47, %v2356_v12 }
 0x16d   :  { %v1532_v10 = vadd.f32 %v1531_v30, %v2323_v52  ;;  %v1664_v57 = vadd.f32 %v1663_v54, %v1601_v55  ;;  %v1606_v52 = vmul.f32 %v2367_v31, %v2367_v31 }
 0x16f   :  { %v1665_v59 = vadd.f32 %v1664_v57, %v1602_v9  ;;  %v1533_v60 = vadd.f32 %v1532_v10, %v2338_v2  ;;  %v1607_v2 = vmul.f32 %v2382_v50, %v2382_v50 }
 0x171   :  { %v1534_v20 = vadd.f32 %v1533_v60, %v2371_v41  ;;  %v1666_v63 = vadd.f32 %v1665_v59, %v1603_v24 }
 0x173   :  { %v1667_v4 = vadd.f32 %v1666_v63, %v1604_v61  ;;  %v1535_v12 = vadd.f32 %v1534_v20, %v2400_v62 }
 0x175   :  { %v1536_v3 = vadd.f32 %v1535_v12, %v2367_v31  ;;  %v1668_v14 = vadd.f32 %v1667_v4, %v1605_v0 }
 0x177   :  { %v1537_v5 = vadd.f32 %v1536_v3, %v2382_v50  ;;  %v1669_v6 = vadd.f32 %v1668_v14, %v1606_v52 }
 0x179   :  { %v1538_v41 = vrot.slane %v1537_v5, 4  ;;  %v1670_v38 = vadd.f32 %v1669_v6, %v1607_v2 }
 0x17b   :  { %v1539_v7 = vadd.f32 %v1538_v41, %v1537_v5  ;;  %v1671_v11 = vrot.slane %v1670_v38, 4 }
 0x17d   :  { %v1540_v15 = vrot.slane %v1539_v7, 2  ;;  %v1672_v51 = vadd.f32 %v1671_v11, %v1670_v38 }
 0x17f   :  { %v1541_v16 = vadd.f32 %v1540_v15, %v1539_v7  ;;  %v1673_v62 = vrot.slane %v1672_v51, 2 }
 0x181   :  { %v1542_v32 = vrot.slane %v1541_v16, 1  ;;  %v1674_v40 = vadd.f32 %v1673_v62, %v1672_v51 }
 0x183   :  { %v1675_v17 = vrot.slane %v1674_v40, 1  ;;  %v1543_v31 = vadd.f32 %v1542_v32, %v1541_v16 }
 0x185   :  { %v1676_v43 = vadd.f32 %v1675_v17, %v1674_v40 }
 0x187   :  { %v1678_v19 = vsel %vm1677_vm0, %v1543_v31, %v1676_v43 }
 0x188   :  { %v1680_v22 = vsel %vm1679_vm1, %v1678_v19, 0.0 }
 0x189   :  { %1681 = vst [vmem:[%s2512_s4] sm:$0xff] %v1680_v22 }

// kernel: discriminator_forward.11
= control target key start
LH: loop header
LB: loop body
LE: loop exit
PB: predicated region body
PF: predicated region fallthrough
CT: control target
= control target key end

     0   :  { %vm525_vm0 = vcmask 1040384   ;;  %vm527_vm1 = vcmask 1041408   ;;  %s774_s1 = inlined_call_operand.vmem [shape: bf16[128,128], index: 1, kind: input, shape index: {}]   ;;  %s775_s0 = inlined_call_operand.vmem [shape: bf16[128,128], index: 0, kind: input, shape index: {}]   ;;  %s776_s2 = inlined_call_operand.vmem [shape: f32[1,128], index: 2, kind: input, shape index: {}]   ;;  %s777_s3 = inlined_call_operand.vmem [shape: f32[128,128], index: 3, kind: output, shape index: {0}]   ;;  %s778_s4 = inlined_call_operand.vmem [shape: f32[8,128], index: 4, kind: output, shape index: {1}]  }
   0x1   :  { %v619_v0 = vld [vmem:[%s774_s1] sm:$0xff]   ;;  %v620_v1 = vld [vmem:[%s774_s1 + $0x8] sm:$0xff]   ;;  %v621_v2 = vld [vmem:[%s774_s1 + $0x10] sm:$0xff]  }
   0x2   :  { %571 = vmatprep.subr.bf16.mxu0 %v619_v0  ;;  %603 = vmatprep.subr.bf16.mxu1 %v619_v0  ;;  %v622_v3 = vld [vmem:[%s774_s1 + $0x18] sm:$0xff]   ;;  %v627_v4 = vld [vmem:[%s775_s0] sm:$0xff]   ;;  %v624_v7 = vld [vmem:[%s774_s1 + $0x28] sm:$0xff]  }
   0x3   :  { %572 = vmatpush3.bf16.msra.mxu0 %v619_v0  ;;  %611 = vmatpush3.bf16.msra.mxu1 %v619_v0  ;;  %v623_v5 = vld [vmem:[%s774_s1 + $0x20] sm:$0xff]   ;;  %v625_v8 = vld [vmem:[%s774_s1 + $0x30] sm:$0xff]   ;;  %v626_v9 = vld [vmem:[%s774_s1 + $0x38] sm:$0xff]  }
   0x4   :  { %573 = vmatprep.subr.bf16.mxu0 %v620_v1  ;;  %604 = vmatprep.subr.bf16.mxu1 %v620_v1  ;;  %v631_v6 = vld [vmem:[%s775_s0 + $0x20] sm:$0xff]   ;;  %v628_v10 = vld [vmem:[%s775_s0 + $0x8] sm:$0xff]   ;;  %v629_v12 = vld [vmem:[%s775_s0 + $0x10] sm:$0xff]  }
   0x5   :  { %587 = vmatprep.mubr.bf16.mxu0 %v627_v4  ;;  %595 = vmatprep.mubr.bf16.mxu1 %v631_v6  ;;  %v632_v11 = vld [vmem:[%s775_s0 + $0x28] sm:$0xff]   ;;  %v633_v13 = vld [vmem:[%s775_s0 + $0x30] sm:$0xff]   ;;  %v630_v14 = vld [vmem:[%s775_s0 + $0x18] sm:$0xff]  }
   0x6   :  { %v634_v15 = vld [vmem:[%s775_s0 + $0x38] sm:$0xff]   ;;  %v554_v16 = vld [vmem:[%s776_s2] ss:$0 sm:$0xff] }
   0x7   :  { %574 = vmatpush3.bf16.msra.mxu0 %v620_v1  ;;  %612 = vmatpush3.bf16.msra.mxu1 %v620_v1 }
   0x8   :  { %575 = vmatprep.subr.bf16.mxu0 %v621_v2  ;;  %605 = vmatprep.subr.bf16.mxu1 %v621_v2 }
   0xb   :  { %576 = vmatpush3.bf16.msra.mxu0 %v621_v2  ;;  %613 = vmatpush3.bf16.msra.mxu1 %v621_v2 }
   0xc   :  { %577 = vmatprep.subr.bf16.mxu0 %v622_v3  ;;  %606 = vmatprep.subr.bf16.mxu1 %v622_v3 }
   0xf   :  { %578 = vmatpush3.bf16.msra.mxu0 %v622_v3  ;;  %614 = vmatpush3.bf16.msra.mxu1 %v622_v3 }
  0x10   :  { %579 = vmatprep.subr.bf16.mxu0 %v623_v5  ;;  %607 = vmatprep.subr.bf16.mxu1 %v623_v5 }
  0x13   :  { %580 = vmatpush3.bf16.msra.mxu0 %v623_v5  ;;  %615 = vmatpush3.bf16.msra.mxu1 %v623_v5 }
  0x14   :  { %581 = vmatprep.subr.bf16.mxu0 %v624_v7  ;;  %608 = vmatprep.subr.bf16.mxu1 %v624_v7 }
  0x17   :  { %582 = vmatpush3.bf16.msra.mxu0 %v624_v7  ;;  %616 = vmatpush3.bf16.msra.mxu1 %v624_v7 }
  0x18   :  { %583 = vmatprep.subr.bf16.mxu0 %v625_v8  ;;  %609 = vmatprep.subr.bf16.mxu1 %v625_v8 }
  0x1b   :  { %584 = vmatpush3.bf16.msra.mxu0 %v625_v8  ;;  %617 = vmatpush3.bf16.msra.mxu1 %v625_v8 }
  0x1c   :  { %585 = vmatprep.subr.bf16.mxu0 %v626_v9  ;;  %610 = vmatprep.subr.bf16.mxu1 %v626_v9 }
  0x1f   :  { %586 = vmatpush3.bf16.msra.mxu0 %v626_v9  ;;  %618 = vmatpush3.bf16.msra.mxu1 %v626_v9 }
  0x22   :  { %588 = vmatmul.mubr.bf16.vlgmr.msra.gmra.mrb[0].mxu0 %v628_v10  ;;  %596 = vmatmul.mubr.bf16.vlgmr.msra.gmra.mrb[0].mxu1 %v632_v11 }
  0x23   :  { %591 = vmatprep.mubr.bf16.mxu0 %v629_v12  ;;  %599 = vmatprep.mubr.bf16.mxu1 %v633_v13 }
  0x2a   :  { %592 = vmatmul.mubr.bf16.gmra.mrb[4].mxu0 %v630_v14  ;;  %600 = vmatmul.mubr.bf16.gmra.mrb[4].mxu1 %v634_v15 }
  0xf5   :  { %v589_v17 = vpop.f32.mrb[0].mxu0  ;;  %v597_v18 = vpop.f32.mrb[0].mxu1 }
  0xf6   :  { %v421_v19 = vadd.f32 %v589_v17, %v554_v16  ;;  %v298_v20 = vpop.f32.mrb[1].mxu0  ;;  %v711_v21 = vadd.f32 %v597_v18, %v554_v16  ;;  %v330_v22 = vpop.f32.mrb[1].mxu1 }
  0xf7   :  { %v419_v23 = vadd.f32 %v554_v16, %v298_v20  ;;  %v590_v24 = vpop.f32.mrb[2].mxu0  ;;  %v427_v25 = vadd.f32 %v554_v16, %v330_v22  ;;  %v598_v26 = vpop.f32.mrb[2].mxu1 }
  0xf8   :  { %437 = vst [vmem:[%s777_s3 + $0x10] sm:$0xff] %v421_v19  ;;  %v422_v27 = vadd.f32 %v590_v24, %v554_v16  ;;  %v301_v28 = vpop.f32.mrb[3].mxu0  ;;  %445 = vst [vmem:[%s777_s3 + $0x50] sm:$0xff] %v711_v21  ;;  %v720_v29 = vadd.f32 %v598_v26, %v554_v16  ;;  %v333_v30 = vpop.f32.mrb[3].mxu1  ;;  %v490_v36 = vmul.f32 %v421_v19, %v421_v19 }
  0xf9   :  { %435 = vst [vmem:[%s777_s3] sm:$0xff] %v419_v23  ;;  %v420_v31 = vadd.f32 %v554_v16, %v301_v28  ;;  %443 = vst [vmem:[%s777_s3 + $0x40] sm:$0xff] %v427_v25  ;;  %v428_v32 = vadd.f32 %v554_v16, %v333_v30  ;;  %v488_v33 = vmul.f32 %v419_v23, %v419_v23 }
  0xfa   :  { %438 = vst [vmem:[%s777_s3 + $0x18] sm:$0xff] %v422_v27  ;;  %446 = vst [vmem:[%s777_s3 + $0x58] sm:$0xff] %v720_v29  ;;  %v491_v41 = vmul.f32 %v422_v27, %v422_v27  ;;  %v496_v6 = vmul.f32 %v427_v25, %v427_v25  ;;  %v498_v12 = vmul.f32 %v711_v21, %v711_v21 }
  0xfb   :  { %436 = vst [vmem:[%s777_s3 + $0x8] sm:$0xff] %v420_v31  ;;  %v467_v34 = vadd.f32 %v420_v31, %v419_v23  ;;  %v489_v35 = vmul.f32 %v420_v31, %v420_v31  ;;  %444 = vst [vmem:[%s777_s3 + $0x48] sm:$0xff] %v428_v32  ;;  %v497_v11 = vmul.f32 %v428_v32, %v428_v32 }
  0xfc   :  { %v499_v15 = vmul.f32 %v720_v29, %v720_v29 }
  0xfd   :  { %v468_v37 = vadd.f32 %v467_v34, %v421_v19  ;;  %v504_v38 = vadd.f32 %v489_v35, %v488_v33  ;;  %v593_v39 = vpop.f32.mrb[4].mxu0  ;;  %v601_v40 = vpop.f32.mrb[4].mxu1 }
  0xfe   :  { %v425_v42 = vadd.f32 %v593_v39, %v554_v16  ;;  %v314_v43 = vpop.f32.mrb[5].mxu0  ;;  %v433_v44 = vadd.f32 %v601_v40, %v554_v16  ;;  %v346_v45 = vpop.f32.mrb[5].mxu1 }
  0xff   :  { %v505_v46 = vadd.f32 %v504_v38, %v490_v36  ;;  %v423_v47 = vadd.f32 %v554_v16, %v314_v43  ;;  %v469_v48 = vadd.f32 %v468_v37, %v422_v27  ;;  %v594_v49 = vpop.f32.mrb[6].mxu0  ;;  %v431_v50 = vadd.f32 %v554_v16, %v346_v45  ;;  %v602_v51 = vpop.f32.mrb[6].mxu1 }
 0x100   :  { %441 = vst [vmem:[%s777_s3 + $0x30] sm:$0xff] %v425_v42  ;;  %v426_v52 = vadd.f32 %v594_v49, %v554_v16  ;;  %v317_v53 = vpop.f32.mrb[7].mxu0  ;;  %449 = vst [vmem:[%s777_s3 + $0x70] sm:$0xff] %v433_v44  ;;  %v434_v54 = vadd.f32 %v602_v51, %v554_v16  ;;  %v349_v55 = vpop.f32.mrb[7].mxu1  ;;  %v494_v0 = vmul.f32 %v425_v42, %v425_v42 }
 0x101   :  { %439 = vst [vmem:[%s777_s3 + $0x20] sm:$0xff] %v423_v47  ;;  %v470_v56 = vadd.f32 %v469_v48, %v423_v47  ;;  %v492_v57 = vmul.f32 %v423_v47, %v423_v47  ;;  %v506_v58 = vadd.f32 %v505_v46, %v491_v41  ;;  %v424_v59 = vadd.f32 %v554_v16, %v317_v53 }
 0x102   :  { %447 = vst [vmem:[%s777_s3 + $0x60] sm:$0xff] %v431_v50  ;;  %442 = vst [vmem:[%s777_s3 + $0x38] sm:$0xff] %v426_v52  ;;  %v432_v60 = vadd.f32 %v554_v16, %v349_v55  ;;  %v495_v3 = vmul.f32 %v426_v52, %v426_v52  ;;  %v500_v18 = vmul.f32 %v431_v50, %v431_v50 }
 0x103   :  { %450 = vst [vmem:[%s777_s3 + $0x78] sm:$0xff] %v434_v54  ;;  %v507_v61 = vadd.f32 %v506_v58, %v492_v57  ;;  %440 = vst [vmem:[%s777_s3 + $0x28] sm:$0xff] %v424_v59  ;;  %v471_v62 = vadd.f32 %v470_v56, %v424_v59  ;;  %v493_v63 = vmul.f32 %v424_v59, %v424_v59 }
 0x104   :  { %448 = vst [vmem:[%s777_s3 + $0x68] sm:$0xff] %v432_v60  ;;  %v501_v24 = vmul.f32 %v432_v60, %v432_v60  ;;  %v503_v28 = vmul.f32 %v434_v54, %v434_v54 }
 0x105   :  { %v472_v1 = vadd.f32 %v471_v62, %v425_v42  ;;  %v508_v2 = vadd.f32 %v507_v61, %v493_v63 }
 0x107   :  { %v509_v4 = vadd.f32 %v508_v2, %v494_v0  ;;  %v473_v5 = vadd.f32 %v472_v1, %v426_v52 }
 0x109   :  { %v474_v7 = vadd.f32 %v473_v5, %v427_v25  ;;  %v510_v8 = vadd.f32 %v509_v4, %v495_v3  ;;  %v502_v25 = vmul.f32 %v433_v44, %v433_v44 }
 0x10b   :  { %v511_v9 = vadd.f32 %v510_v8, %v496_v6  ;;  %v475_v10 = vadd.f32 %v474_v7, %v428_v32 }
 0x10d   :  { %v476_v13 = vadd.f32 %v475_v10, %v711_v21  ;;  %v512_v14 = vadd.f32 %v511_v9, %v497_v11 }
 0x10f   :  { %v513_v16 = vadd.f32 %v512_v14, %v498_v12  ;;  %v477_v17 = vadd.f32 %v476_v13, %v720_v29 }
 0x111   :  { %v478_v19 = vadd.f32 %v477_v17, %v431_v50  ;;  %v514_v20 = vadd.f32 %v513_v16, %v499_v15 }
 0x113   :  { %v515_v22 = vadd.f32 %v514_v20, %v500_v18  ;;  %v479_v23 = vadd.f32 %v478_v19, %v432_v60 }
 0x115   :  { %v480_v26 = vadd.f32 %v479_v23, %v433_v44  ;;  %v516_v27 = vadd.f32 %v515_v22, %v501_v24 }
 0x117   :  { %v481_v30 = vadd.f32 %v480_v26, %v434_v54  ;;  %v517_v31 = vadd.f32 %v516_v27, %v502_v25 }
 0x119   :  { %v482_v21 = vrot.slane %v481_v30, 4  ;;  %v518_v32 = vadd.f32 %v517_v31, %v503_v28 }
 0x11b   :  { %v483_v33 = vadd.f32 %v482_v21, %v481_v30  ;;  %v519_v34 = vrot.slane %v518_v32, 4 }
 0x11d   :  { %v484_v35 = vrot.slane %v483_v33, 2  ;;  %v520_v36 = vadd.f32 %v519_v34, %v518_v32 }
 0x11f   :  { %v485_v37 = vadd.f32 %v484_v35, %v483_v33  ;;  %v521_v29 = vrot.slane %v520_v36, 2 }
 0x121   :  { %v486_v38 = vrot.slane %v485_v37, 1  ;;  %v522_v39 = vadd.f32 %v521_v29, %v520_v36 }
 0x123   :  { %v523_v40 = vrot.slane %v522_v39, 1  ;;  %v487_v41 = vadd.f32 %v486_v38, %v485_v37 }
 0x125   :  { %v524_v42 = vadd.f32 %v523_v40, %v522_v39 }
 0x127   :  { %v526_v43 = vsel %vm525_vm0, %v487_v41, %v524_v42 }
 0x128   :  { %v528_v44 = vsel %vm527_vm1, %v526_v43, 0.0 }
 0x129   :  { %529 = vst [vmem:[%s778_s4] sm:$0xff] %v528_v44 }

// kernel: discriminator_forward.12
= control target key start
LH: loop header
LB: loop body
LE: loop exit
PB: predicated region body
PF: predicated region fallthrough
CT: control target
= control target key end

     0   :  { %v180_v6 = vmov 1966171168   ;;  %v32_v8 = vlaneseq  ;;  %s350_s1 = inlined_call_operand.vmem [shape: f32[8,128], index: 1, kind: input, shape index: {}]   ;;  %s351_s2 = inlined_call_operand.vmem [shape: f32[1,128], index: 2, kind: input, shape index: {}]   ;;  %s352_s0 = inlined_call_operand.vmem [shape: f32[128,128], index: 0, kind: input, shape index: {}]   ;;  %s353_s3 = inlined_call_operand.vmem [shape: f32[1,128], index: 3, kind: input, shape index: {}]   ;;  %s354_s4 = inlined_call_operand.vmem [shape: f32[128,128], index: 4, kind: output, shape index: {}]  }
   0x1   :  { %v17_v0 = vld [vmem:[%s350_s1] sm:$0xff]  ;;  %v30_v7 = vunpack.c.l.s4 %v180_v6  ;;  %v50_v21 = vld [vmem:[%s352_s0 + $0x8] sm:$0xff]  ;;  %v51_v22 = vld [vmem:[%s352_s0 + $0x10] sm:$0xff] }
   0x2   :  { %v19_v1 = vmul.f32 0.0078125, %v17_v0  ;;  %v33_v10 = vshrl.u32 %v32_v8, 7  ;;  %v25_v15 = vld [vmem:[%s351_s2] sm:$0x1]  ;;  %v52_v23 = vld [vmem:[%s352_s0 + $0x18] sm:$0xff]  ;;  %v54_v27 = vld [vmem:[%s352_s0 + $0x28] sm:$0xff] }
   0x3   :  { %v31_v9 = vunpack.c.0.s8 %v30_v7  ;;  %v46_v19 = vld [vmem:[%s353_s3] sm:$0x1]  ;;  %v55_v28 = vld [vmem:[%s352_s0 + $0x30] sm:$0xff]  ;;  %v56_v29 = vld [vmem:[%s352_s0 + $0x38] sm:$0xff] }
   0x4   :  { %v20_v2 = vmul.f32 %v19_v1, %v19_v1  ;;  %v68_v17 = vsub.s32 0, %v33_v10  ;;  %v49_v20 = vld [vmem:[%s352_s0] sm:$0xff]  ;;  %v58_v31 = vld [vmem:[%s352_s0 + $0x48] sm:$0xff]  ;;  %v59_v32 = vld [vmem:[%s352_s0 + $0x50] sm:$0xff] }
   0x5   :  { %v34_v11 = vsub.s32 %v31_v9, %v33_v10  ;;  %v53_v24 = vld [vmem:[%s352_s0 + $0x20] sm:$0xff]  ;;  %v60_v37 = vld [vmem:[%s352_s0 + $0x58] sm:$0xff]  ;;  %v62_v39 = vld [vmem:[%s352_s0 + $0x68] sm:$0xff] }
   0x6   :  { %v22_v3 = vrot.slane %v20_v2, 7  ;;  %v57_v30 = vld [vmem:[%s352_s0 + $0x40] sm:$0xff] }
   0x7   :  { %v61_v38 = vld [vmem:[%s352_s0 + $0x60] sm:$0xff] }
   0x8   :  { %v24_v4 = vsub.f32 %v19_v1, %v22_v3 }
   0xa   :  { %v26_v5 = vadd.f32 1e-05, %v24_v4 }
   0xc   :  { %178 = vrsqrt.f32 %v26_v5 }
  0x16   :  { %v179_v12 = vpop.eup %178 }
  0x17   :  { %v35_v13 = vrot.slane %v179_v12, %v34_v11 }
  0x19   :  { %v36_v14 = vcombine.high %v35_v13, %v35_v13 }
  0x1b   :  { %v43_v16 = vrot.slane %v36_v14, %v34_v11 }
  0x1d   :  { %v45_v18 = vmul.f32 %v43_v16, %v25_v15 }
  0x1f   :  { %v47_v25 = vmul.f32 %v45_v18, %v19_v1  ;;  %v230_v26 = vrot.slane %v45_v18, %v68_v17  ;;  %v63_v18 = vld [vmem:[%s352_s0 + $0x70] sm:$0xff] }
  0x21   :  { %v48_v33 = vsub.f32 %v46_v19, %v47_v25  ;;  %v71_v34 = vmul.f32 %v230_v26, %v49_v20  ;;  %v72_v35 = vmul.f32 %v230_v26, %v50_v21  ;;  %v73_v36 = vmul.f32 %v230_v26, %v51_v22  ;;  %v64_v19 = vld [vmem:[%s352_s0 + $0x78] sm:$0xff] }
  0x22   :  { %v74_v40 = vmul.f32 %v230_v26, %v52_v23  ;;  %v75_v41 = vmul.f32 %v230_v26, %v53_v24  ;;  %v76_v42 = vmul.f32 %v230_v26, %v54_v27  ;;  %v77_v43 = vmul.f32 %v230_v26, %v55_v28 }
  0x23   :  { %v266_v44 = vrot.slane %v48_v33, %v68_v17  ;;  %v78_v45 = vmul.f32 %v230_v26, %v56_v29  ;;  %v79_v46 = vmul.f32 %v230_v26, %v57_v30  ;;  %v80_v47 = vmul.f32 %v230_v26, %v58_v31 }
  0x24   :  { %v81_v48 = vmul.f32 %v230_v26, %v59_v32  ;;  %v82_v49 = vmul.f32 %v230_v26, %v60_v37  ;;  %v83_v50 = vmul.f32 %v230_v26, %v61_v38  ;;  %v275_v51 = vmul.f32 %v230_v26, %v62_v39 }
  0x25   :  { %v93_v52 = vadd.f32 %v266_v44, %v71_v34  ;;  %v94_v53 = vadd.f32 %v266_v44, %v72_v35  ;;  %v95_v54 = vadd.f32 %v266_v44, %v73_v36  ;;  %v96_v55 = vadd.f32 %v266_v44, %v74_v40 }
  0x26   :  { %v97_v56 = vadd.f32 %v266_v44, %v75_v41  ;;  %v98_v57 = vadd.f32 %v266_v44, %v76_v42  ;;  %v99_v58 = vadd.f32 %v266_v44, %v77_v43  ;;  %v100_v59 = vadd.f32 %v266_v44, %v78_v45 }
  0x27   :  { %vm109_vm0 = vcmp.ge.f32.partialorder %v93_v52, 0.0  ;;  %v125_v60 = vmul.f32 0.1, %v93_v52  ;;  %vm110_vm1 = vcmp.ge.f32.partialorder %v94_v53, 0.0  ;;  %v126_v61 = vmul.f32 0.1, %v94_v53 }
  0x28   :  { %vm111_vm2 = vcmp.ge.f32.partialorder %v95_v54, 0.0  ;;  %v127_v62 = vmul.f32 0.1, %v95_v54  ;;  %vm112_vm3 = vcmp.ge.f32.partialorder %v96_v55, 0.0  ;;  %v128_v63 = vmul.f32 0.1, %v96_v55 }
  0x29   :  { %v141_v0 = vsel %vm109_vm0, %v93_v52, %v125_v60  ;;  %v142_v1 = vsel %vm110_vm1, %v94_v53, %v126_v61  ;;  %vm113_vm4 = vcmp.ge.f32.partialorder %v97_v56, 0.0  ;;  %v129_v2 = vmul.f32 0.1, %v97_v56 }
  0x2a   :  { %157 = vst [vmem:[%s354_s4] sm:$0xff] %v141_v0  ;;  %158 = vst [vmem:[%s354_s4 + $0x8] sm:$0xff] %v142_v1  ;;  %v143_v3 = vsel %vm111_vm2, %v95_v54, %v127_v62  ;;  %v144_v4 = vsel %vm112_vm3, %v96_v55, %v128_v63  ;;  %vm114_vm5 = vcmp.ge.f32.partialorder %v98_v57, 0.0  ;;  %v130_v5 = vmul.f32 0.1, %v98_v57 }
  0x2b   :  { %159 = vst [vmem:[%s354_s4 + $0x10] sm:$0xff] %v143_v3  ;;  %160 = vst [vmem:[%s354_s4 + $0x18] sm:$0xff] %v144_v4  ;;  %v145_v6 = vsel %vm113_vm4, %v97_v56, %v129_v2  ;;  %vm115_vm6 = vcmp.ge.f32.partialorder %v99_v58, 0.0  ;;  %v131_v7 = vmul.f32 0.1, %v99_v58  ;;  %vm116_vm7 = vcmp.ge.f32.partialorder %v100_v59, 0.0 }
  0x2c   :  { %161 = vst [vmem:[%s354_s4 + $0x20] sm:$0xff] %v145_v6  ;;  %v146_v8 = vsel %vm114_vm5, %v98_v57, %v130_v5  ;;  %v132_v9 = vmul.f32 0.1, %v100_v59  ;;  %v101_v10 = vadd.f32 %v266_v44, %v79_v46  ;;  %v102_v11 = vadd.f32 %v266_v44, %v80_v47 }
  0x2d   :  { %162 = vst [vmem:[%s354_s4 + $0x28] sm:$0xff] %v146_v8  ;;  %v147_v12 = vsel %vm115_vm6, %v99_v58, %v131_v7  ;;  %v103_v13 = vadd.f32 %v266_v44, %v81_v48  ;;  %v104_v14 = vadd.f32 %v266_v44, %v82_v49  ;;  %v105_v15 = vadd.f32 %v266_v44, %v83_v50 }
  0x2e   :  { %163 = vst [vmem:[%s354_s4 + $0x30] sm:$0xff] %v147_v12  ;;  %v148_v16 = vsel %vm116_vm7, %v100_v59, %v132_v9  ;;  %vm117_vm8 = vcmp.ge.f32.partialorder %v101_v10, 0.0  ;;  %v133_v17 = vmul.f32 0.1, %v101_v10  ;;  %vm118_vm9 = vcmp.ge.f32.partialorder %v102_v11, 0.0 }
  0x2f   :  { %164 = vst [vmem:[%s354_s4 + $0x38] sm:$0xff] %v148_v16  ;;  %v134_v20 = vmul.f32 0.1, %v102_v11  ;;  %vm119_vm10 = vcmp.ge.f32.partialorder %v103_v13, 0.0  ;;  %v135_v21 = vmul.f32 0.1, %v103_v13  ;;  %v106_v28 = vadd.f32 %v266_v44, %v275_v51 }
  0x30   :  { %vm120_vm11 = vcmp.ge.f32.partialorder %v104_v14, 0.0  ;;  %v149_v22 = vsel %vm117_vm8, %v101_v10, %v133_v17  ;;  %v136_v23 = vmul.f32 0.1, %v104_v14  ;;  %vm121_vm12 = vcmp.ge.f32.partialorder %v105_v15, 0.0 }
  0x31   :  { %v137_v24 = vmul.f32 0.1, %v105_v15  ;;  %165 = vst [vmem:[%s354_s4 + $0x40] sm:$0xff] %v149_v22  ;;  %v150_v25 = vsel %vm118_vm9, %v102_v11, %v134_v20  ;;  %v151_v27 = vsel %vm119_vm10, %v103_v13, %v135_v21  ;;  %v85_v29 = vmul.f32 %v230_v26, %v63_v18 }
  0x32   :  { %166 = vst [vmem:[%s354_s4 + $0x48] sm:$0xff] %v150_v25  ;;  %167 = vst [vmem:[%s354_s4 + $0x50] sm:$0xff] %v151_v27  ;;  %v152_v30 = vsel %vm120_vm11, %v104_v14, %v136_v23  ;;  %v86_v32 = vmul.f32 %v230_v26, %v64_v19  ;;  %vm122_vm13 = vcmp.ge.f32.partialorder %v106_v28, 0.0  ;;  %v138_v33 = vmul.f32 0.1, %v106_v28 }
  0x33   :  { %v153_v31 = vsel %vm121_vm12, %v105_v15, %v137_v24  ;;  %168 = vst [vmem:[%s354_s4 + $0x58] sm:$0xff] %v152_v30  ;;  %v107_v34 = vadd.f32 %v266_v44, %v85_v29 }
  0x34   :  { %169 = vst [vmem:[%s354_s4 + $0x60] sm:$0xff] %v153_v31  ;;  %v108_v35 = vadd.f32 %v266_v44, %v86_v32  ;;  %v154_v36 = vsel %vm122_vm13, %v106_v28, %v138_v33 }
  0x35   :  { %vm123_vm14 = vcmp.ge.f32.partialorder %v107_v34, 0.0  ;;  %v139_v37 = vmul.f32 0.1, %v107_v34  ;;  %170 = vst [vmem:[%s354_s4 + $0x68] sm:$0xff] %v154_v36 }
  0x36   :  { %vm124_vm15 = vcmp.ge.f32.partialorder %v108_v35, 0.0  ;;  %v140_v26 = vmul.f32 0.1, %v108_v35 }
  0x37   :  { %v155_v38 = vsel %vm123_vm14, %v107_v34, %v139_v37 }
  0x38   :  { %171 = vst [vmem:[%s354_s4 + $0x70] sm:$0xff] %v155_v38  ;;  %v156_v39 = vsel %vm124_vm15, %v108_v35, %v140_v26 }
  0x39   :  { %172 = vst [vmem:[%s354_s4 + $0x78] sm:$0xff] %v156_v39 }

// kernel: discriminator_forward.16
= control target key start
LH: loop header
LB: loop body
LE: loop exit
PB: predicated region body
PF: predicated region fallthrough
CT: control target
= control target key end

     0   :  { %v96_v6 = vmov 1966171168   ;;  %v32_v8 = vlaneseq  ;;  %s155_s1 = inlined_call_operand.vmem [shape: f32[8,128], index: 1, kind: input, shape index: {}]   ;;  %s156_s2 = inlined_call_operand.vmem [shape: f32[1,128], index: 2, kind: input, shape index: {}]   ;;  %s157_s3 = inlined_call_operand.vmem [shape: f32[1,128], index: 3, kind: input, shape index: {}]   ;;  %s158_s0 = inlined_call_operand.vmem [shape: f32[32,128], index: 0, kind: input, shape index: {}]   ;;  %s159_s4 = inlined_call_operand.vmem [shape: f32[32,128], index: 4, kind: output, shape index: {}]  }
   0x1   :  { %v17_v0 = vld [vmem:[%s155_s1] sm:$0xff]  ;;  %v30_v7 = vunpack.c.l.s4 %v96_v6  ;;  %v50_v21 = vld [vmem:[%s158_s0 + $0x8] sm:$0xff]  ;;  %v51_v22 = vld [vmem:[%s158_s0 + $0x10] sm:$0xff] }
   0x2   :  { %v19_v1 = vmul.f32 0.03125, %v17_v0  ;;  %v33_v10 = vshrl.u32 %v32_v8, 7  ;;  %v25_v15 = vld [vmem:[%s156_s2] sm:$0x1]  ;;  %v52_v25 = vld [vmem:[%s158_s0 + $0x18] sm:$0xff] }
   0x3   :  { %v31_v9 = vunpack.c.0.s8 %v30_v7  ;;  %v46_v19 = vld [vmem:[%s157_s3] sm:$0x1] }
   0x4   :  { %v20_v2 = vmul.f32 %v19_v1, %v19_v1  ;;  %v56_v17 = vsub.s32 0, %v33_v10  ;;  %v49_v20 = vld [vmem:[%s158_s0] sm:$0xff] }
   0x5   :  { %v34_v11 = vsub.s32 %v31_v9, %v33_v10 }
   0x6   :  { %v22_v3 = vrot.slane %v20_v2, 7 }
   0x8   :  { %v24_v4 = vsub.f32 %v19_v1, %v22_v3 }
   0xa   :  { %v26_v5 = vadd.f32 1e-05, %v24_v4 }
   0xc   :  { %94 = vrsqrt.f32 %v26_v5 }
  0x16   :  { %v95_v12 = vpop.eup %94 }
  0x17   :  { %v35_v13 = vrot.slane %v95_v12, %v34_v11 }
  0x19   :  { %v36_v14 = vcombine.high %v35_v13, %v35_v13 }
  0x1b   :  { %v43_v16 = vrot.slane %v36_v14, %v34_v11 }
  0x1d   :  { %v45_v18 = vmul.f32 %v43_v16, %v25_v15 }
  0x1f   :  { %v47_v23 = vmul.f32 %v45_v18, %v19_v1  ;;  %v57_v24 = vrot.slane %v45_v18, %v56_v17 }
  0x21   :  { %v48_v26 = vsub.f32 %v46_v19, %v47_v23  ;;  %v59_v27 = vmul.f32 %v57_v24, %v49_v20  ;;  %v60_v28 = vmul.f32 %v57_v24, %v50_v21  ;;  %v61_v29 = vmul.f32 %v57_v24, %v51_v22 }
  0x22   :  { %v62_v30 = vmul.f32 %v57_v24, %v52_v25 }
  0x23   :  { %v67_v31 = vrot.slane %v48_v26, %v56_v17 }
  0x25   :  { %v69_v32 = vadd.f32 %v67_v31, %v59_v27  ;;  %v70_v33 = vadd.f32 %v67_v31, %v60_v28  ;;  %v71_v34 = vadd.f32 %v67_v31, %v61_v29  ;;  %v72_v35 = vadd.f32 %v67_v31, %v62_v30 }
  0x27   :  { %vm73_vm0 = vcmp.ge.f32.partialorder %v69_v32, 0.0  ;;  %v77_v36 = vmul.f32 0.1, %v69_v32  ;;  %vm74_vm1 = vcmp.ge.f32.partialorder %v70_v33, 0.0  ;;  %v78_v37 = vmul.f32 0.1, %v70_v33 }
  0x28   :  { %vm75_vm2 = vcmp.ge.f32.partialorder %v71_v34, 0.0  ;;  %v79_v38 = vmul.f32 0.1, %v71_v34  ;;  %vm76_vm3 = vcmp.ge.f32.partialorder %v72_v35, 0.0  ;;  %v80_v39 = vmul.f32 0.1, %v72_v35 }
  0x29   :  { %v81_v40 = vsel %vm73_vm0, %v69_v32, %v77_v36  ;;  %v82_v41 = vsel %vm74_vm1, %v70_v33, %v78_v37 }
  0x2a   :  { %85 = vst [vmem:[%s159_s4] sm:$0xff] %v81_v40  ;;  %86 = vst [vmem:[%s159_s4 + $0x8] sm:$0xff] %v82_v41  ;;  %v83_v42 = vsel %vm75_vm2, %v71_v34, %v79_v38  ;;  %v84_v43 = vsel %vm76_vm3, %v72_v35, %v80_v39 }
  0x2b   :  { %87 = vst [vmem:[%s159_s4 + $0x10] sm:$0xff] %v83_v42  ;;  %88 = vst [vmem:[%s159_s4 + $0x18] sm:$0xff] %v84_v43 }

// kernel: discriminator_forward.15
= control target key start
LH: loop header
LB: loop body
LE: loop exit
PB: predicated region body
PF: predicated region fallthrough
CT: control target
= control target key end

     0   :  { %vm309_vm0 = vcmask 1040384   ;;  %vm311_vm1 = vcmask 1041408   ;;  %s512_s1 = inlined_call_operand.vmem [shape: bf16[256,128], index: 1, kind: input, shape index: {}]   ;;  %s513_s0 = inlined_call_operand.vmem [shape: bf16[32,256], index: 0, kind: input, shape index: {}]   ;;  %s514_s2 = inlined_call_operand.vmem [shape: f32[1,128], index: 2, kind: input, shape index: {}]   ;;  %s515_s3 = inlined_call_operand.vmem [shape: f32[32,128], index: 3, kind: output, shape index: {0}]   ;;  %s516_s4 = inlined_call_operand.vmem [shape: f32[8,128], index: 4, kind: output, shape index: {1}]  }
   0x1   :  { %v387_v0 = vld [vmem:[%s512_s1 + $0x40] sm:$0xff]   ;;  %v389_v2 = vld [vmem:[%s512_s1 + $0x48] sm:$0xff]   ;;  %v391_v4 = vld [vmem:[%s512_s1 + $0x50] sm:$0xff]  }
   0x2   :  { %v388_v1 = vld [vmem:[%s512_s1] sm:$0xff]   ;;  %343 = vmatprep.subr.bf16.mxu0 %v387_v0  ;;  %371 = vmatprep.subr.bf16.mxu1 %v387_v0  ;;  %v390_v3 = vld [vmem:[%s512_s1 + $0x8] sm:$0xff]   ;;  %v392_v5 = vld [vmem:[%s512_s1 + $0x10] sm:$0xff]  }
   0x3   :  { %344 = vmatpush3.bf16.msra.mxu0 %v388_v1  ;;  %379 = vmatpush3.bf16.msra.mxu1 %v388_v1  ;;  %v393_v6 = vld [vmem:[%s512_s1 + $0x58] sm:$0xff]   ;;  %v395_v8 = vld [vmem:[%s512_s1 + $0x60] sm:$0xff]   ;;  %v397_v10 = vld [vmem:[%s512_s1 + $0x68] sm:$0xff]  }
   0x4   :  { %345 = vmatprep.subr.bf16.mxu0 %v389_v2  ;;  %372 = vmatprep.subr.bf16.mxu1 %v389_v2  ;;  %v394_v7 = vld [vmem:[%s512_s1 + $0x18] sm:$0xff]   ;;  %v396_v9 = vld [vmem:[%s512_s1 + $0x20] sm:$0xff]   ;;  %v398_v13 = vld [vmem:[%s512_s1 + $0x28] sm:$0xff]  }
   0x5   :  { %v405_v11 = vld [vmem:[%s513_s0 + $0x4] ss:$8 sps:$4 sm:$0xff]   ;;  %v408_v12 = vld [vmem:[%s513_s0 + $0x14] ss:$8 sps:$4 sm:$0xff]   ;;  %v403_v18 = vld [vmem:[%s513_s0] ss:$8 sps:$4 sm:$0xff]  }
   0x6   :  { %v399_v14 = vld [vmem:[%s512_s1 + $0x70] sm:$0xff]   ;;  %236 = vmatprep.mubr.bf16.mxu0 %v405_v11  ;;  %244 = vmatprep.mubr.bf16.mxu1 %v408_v12  ;;  %v401_v16 = vld [vmem:[%s512_s1 + $0x78] sm:$0xff]   ;;  %v342_v23 = vld [vmem:[%s514_s2] ss:$0 sm:$0xff] }
   0x7   :  { %346 = vmatpush3.bf16.msra.mxu0 %v390_v3  ;;  %380 = vmatpush3.bf16.msra.mxu1 %v390_v3  ;;  %v400_v15 = vld [vmem:[%s512_s1 + $0x30] sm:$0xff]   ;;  %v402_v17 = vld [vmem:[%s512_s1 + $0x38] sm:$0xff]  }
   0x8   :  { %347 = vmatprep.subr.bf16.mxu0 %v391_v4  ;;  %373 = vmatprep.subr.bf16.mxu1 %v391_v4  ;;  %v406_v19 = vld [vmem:[%s513_s0 + $0x10] ss:$8 sps:$4 sm:$0xff]  }
   0xb   :  { %348 = vmatpush3.bf16.msra.mxu0 %v392_v5  ;;  %381 = vmatpush3.bf16.msra.mxu1 %v392_v5 }
   0xc   :  { %349 = vmatprep.subr.bf16.mxu0 %v393_v6  ;;  %374 = vmatprep.subr.bf16.mxu1 %v393_v6 }
   0xf   :  { %350 = vmatpush3.bf16.msra.mxu0 %v394_v7  ;;  %382 = vmatpush3.bf16.msra.mxu1 %v394_v7 }
  0x10   :  { %351 = vmatprep.subr.bf16.mxu0 %v395_v8  ;;  %375 = vmatprep.subr.bf16.mxu1 %v395_v8 }
  0x13   :  { %352 = vmatpush3.bf16.msra.mxu0 %v396_v9  ;;  %383 = vmatpush3.bf16.msra.mxu1 %v396_v9 }
  0x14   :  { %353 = vmatprep.subr.bf16.mxu0 %v397_v10  ;;  %376 = vmatprep.subr.bf16.mxu1 %v397_v10 }
  0x17   :  { %354 = vmatpush3.bf16.msra.mxu0 %v398_v13  ;;  %384 = vmatpush3.bf16.msra.mxu1 %v398_v13 }
  0x18   :  { %355 = vmatprep.subr.bf16.mxu0 %v399_v14  ;;  %377 = vmatprep.subr.bf16.mxu1 %v399_v14 }
  0x1b   :  { %356 = vmatpush3.bf16.msra.mxu0 %v400_v15  ;;  %385 = vmatpush3.bf16.msra.mxu1 %v400_v15 }
  0x1c   :  { %357 = vmatprep.subr.bf16.mxu0 %v401_v16  ;;  %378 = vmatprep.subr.bf16.mxu1 %v401_v16 }
  0x1f   :  { %358 = vmatpush3.bf16.msra.mxu0 %v402_v17  ;;  %386 = vmatpush3.bf16.msra.mxu1 %v402_v17 }
  0x22   :  { %237 = vmatmul.mubr.bf16.vlgmr.msra.gmra.mrb[0].mxu0 %v403_v18  ;;  %245 = vmatmul.mubr.bf16.vlgmr.msra.gmra.mrb[0].mxu1 %v406_v19 }
  0xf5   :  { %v359_v20 = vpop.f32.mrb[0].mxu0  ;;  %v365_v21 = vpop.f32.mrb[0].mxu1 }
  0xf6   :  { %v360_v22 = vpop.f32.mrb[1].mxu0  ;;  %v366_v24 = vpop.f32.mrb[1].mxu1 }
  0xf7   :  { %v361_v25 = vadd.f32 %v360_v22, %v359_v20  ;;  %v362_v26 = vpop.f32.mrb[2].mxu0  ;;  %v367_v27 = vadd.f32 %v366_v24, %v365_v21  ;;  %v368_v28 = vpop.f32.mrb[2].mxu1 }
  0xf8   :  { %v363_v29 = vpop.f32.mrb[3].mxu0  ;;  %v369_v30 = vpop.f32.mrb[3].mxu1 }
  0xf9   :  { %v275_v31 = vadd.f32 %v361_v25, %v342_v23  ;;  %v277_v32 = vadd.f32 %v367_v27, %v342_v23  ;;  %v364_v33 = vadd.f32 %v363_v29, %v362_v26  ;;  %v370_v34 = vadd.f32 %v369_v30, %v368_v28 }
  0xfb   :  { %279 = vst [vmem:[%s515_s3] sm:$0xff] %v275_v31  ;;  %281 = vst [vmem:[%s515_s3 + $0x10] sm:$0xff] %v277_v32  ;;  %v276_v35 = vadd.f32 %v364_v33, %v342_v23  ;;  %v278_v36 = vadd.f32 %v370_v34, %v342_v23  ;;  %v296_v37 = vmul.f32 %v275_v31, %v275_v31 }
  0xfc   :  { %v298_v38 = vmul.f32 %v277_v32, %v277_v32 }
  0xfd   :  { %280 = vst [vmem:[%s515_s3 + $0x8] sm:$0xff] %v276_v35  ;;  %v287_v39 = vadd.f32 %v276_v35, %v275_v31  ;;  %v297_v40 = vmul.f32 %v276_v35, %v276_v35  ;;  %282 = vst [vmem:[%s515_s3 + $0x18] sm:$0xff] %v278_v36  ;;  %v299_v44 = vmul.f32 %v278_v36, %v278_v36 }
  0xff   :  { %v300_v41 = vadd.f32 %v297_v40, %v296_v37  ;;  %v288_v42 = vadd.f32 %v287_v39, %v277_v32 }
 0x101   :  { %v289_v43 = vadd.f32 %v288_v42, %v278_v36  ;;  %v301_v45 = vadd.f32 %v300_v41, %v298_v38 }
 0x103   :  { %v290_v46 = vrot.slane %v289_v43, 4  ;;  %v302_v47 = vadd.f32 %v301_v45, %v299_v44 }
 0x105   :  { %v291_v48 = vadd.f32 %v290_v46, %v289_v43  ;;  %v303_v49 = vrot.slane %v302_v47, 4 }
 0x107   :  { %v292_v50 = vrot.slane %v291_v48, 2  ;;  %v304_v51 = vadd.f32 %v303_v49, %v302_v47 }
 0x109   :  { %v293_v52 = vadd.f32 %v292_v50, %v291_v48  ;;  %v305_v53 = vrot.slane %v304_v51, 2 }
 0x10b   :  { %v294_v54 = vrot.slane %v293_v52, 1  ;;  %v306_v55 = vadd.f32 %v305_v53, %v304_v51 }
 0x10d   :  { %v307_v56 = vrot.slane %v306_v55, 1  ;;  %v295_v57 = vadd.f32 %v294_v54, %v293_v52 }
 0x10f   :  { %v308_v58 = vadd.f32 %v307_v56, %v306_v55 }
 0x111   :  { %v310_v59 = vsel %vm309_vm0, %v295_v57, %v308_v58 }
 0x112   :  { %v312_v60 = vsel %vm311_vm1, %v310_v59, 0.0 }
 0x113   :  { %313 = vst [vmem:[%s516_s4] sm:$0xff] %v312_v60 }

// kernel: discriminator_forward.17
= control target key start
LH: loop header
LB: loop body
LE: loop exit
PB: predicated region body
PF: predicated region fallthrough
CT: control target
= control target key end

     0   :  { %v391_v3 = vmov 0.0|0.0   ;;  %vm392_vm0 = vmmov 0   ;;  %s593_s1 = inlined_call_operand.vmem [shape: f32[256,128], index: 1, kind: input, shape index: {}]   ;;  %s594_s0 = inlined_call_operand.vmem [shape: f32[2,256], index: 0, kind: input, shape index: {}]   ;;  %s595_s3 = inlined_call_operand.vmem [shape: f32[128,128], index: 3, kind: input, shape index: {}]   ;;  %s596_s2 = inlined_call_operand.vmem [shape: f32[1,128], index: 2, kind: input, shape index: {}]   ;;  %s597_s4 = inlined_call_operand.vmem [shape: f32[1,128], index: 4, kind: input, shape index: {}]   ;;  %s598_s5 = inlined_call_operand.vmem [shape: f32[2,128], index: 5, kind: output, shape index: {}]  }
   0x1   :  { %v37_v0 = vld [vmem:[%s593_s1 + $0x80] sm:$0xff]  ;;  %v38_v1 = vld [vmem:[%s593_s1 + $0x88] sm:$0xff]  ;;  %364 = vmatprep.subr.bf16.mxu1 %v391_v3  ;;  %v39_v6 = vld [vmem:[%s593_s1 + $0x90] sm:$0xff] }
   0x2   :  { %v21_v2 = vld [vmem:[%s593_s1] sm:$0xff]  ;;  %v332_v4 = vpack.c.bf16 %v38_v1, %v37_v0  ;;  %v22_v5 = vld [vmem:[%s593_s1 + $0x8] sm:$0xff]  ;;  %v40_v7 = vld [vmem:[%s593_s1 + $0x98] sm:$0xff] }
   0x3   :  { %v334_v8 = vpack.c.bf16 %v22_v5, %v21_v2  ;;  %v336_v9 = vpack.c.bf16 %v40_v7, %v39_v6  ;;  %v23_v10 = vld [vmem:[%s593_s1 + $0x10] sm:$0xff]  ;;  %v24_v11 = vld [vmem:[%s593_s1 + $0x18] sm:$0xff]  ;;  %v41_v12 = vld [vmem:[%s593_s1 + $0xa0] sm:$0xff] }
   0x4   :  { %333 = vmatprep.subr.bf16.mxu0 %v332_v4  ;;  %v42_v13 = vld [vmem:[%s593_s1 + $0xa8] sm:$0xff]  ;;  %v338_v14 = vpack.c.bf16 %v24_v11, %v23_v10  ;;  %v25_v16 = vld [vmem:[%s593_s1 + $0x20] sm:$0xff]  ;;  %v43_v18 = vld [vmem:[%s593_s1 + $0xb0] sm:$0xff] }
   0x5   :  { %335 = vmatpush3.bf16.msra.mxu0 %v334_v8  ;;  %v340_v15 = vpack.c.bf16 %v42_v13, %v41_v12  ;;  %v26_v17 = vld [vmem:[%s593_s1 + $0x28] sm:$0xff]  ;;  %v44_v19 = vld [vmem:[%s593_s1 + $0xb8] sm:$0xff]  ;;  %v27_v22 = vld [vmem:[%s593_s1 + $0x30] sm:$0xff]  ;;  %v393_v12 = vmov 0.0  }
   0x6   :  { %337 = vmatprep.subr.bf16.mxu0 %v336_v9  ;;  %v342_v20 = vpack.c.bf16 %v26_v17, %v25_v16  ;;  %v344_v21 = vpack.c.bf16 %v44_v19, %v43_v18  ;;  %v28_v23 = vld [vmem:[%s593_s1 + $0x38] sm:$0xff]  ;;  %v45_v24 = vld [vmem:[%s593_s1 + $0xc0] sm:$0xff]  ;;  %v46_v25 = vld [vmem:[%s593_s1 + $0xc8] sm:$0xff]  ;;  %329 = vmatprep.mubr.msk.f32.mxu1 %vm392_vm0, %v393_v12 }
   0x7   :  { %v482_v26 = vld.sshfl [vmem:[%s594_s0] sm:$0x33 pattern:$0x76325410]  ;;  %v145_v29 = vld [vmem:[%s595_s3 + $0x8] sm:$0xff]  ;;  %v146_v30 = vld [vmem:[%s595_s3 + $0x10] sm:$0xff]  ;;  %v346_v31 = vpack.c.bf16 %v28_v23, %v27_v22  ;;  %v348_v34 = vpack.c.bf16 %v46_v25, %v45_v24 }
   0x8   :  { %v68_v27 = vcombine.high %v482_v26, %v482_v26  ;;  %v144_v28 = vld [vmem:[%s595_s3] sm:$0xff]  ;;  %v147_v33 = vld [vmem:[%s595_s3 + $0x18] sm:$0xff]  ;;  %v30_v36 = vld [vmem:[%s593_s1 + $0x48] sm:$0xff] }
   0x9   :  { %339 = vmatpush3.bf16.msra.mxu0 %v338_v14  ;;  %v365_v32 = vpack.c.bf16 %v145_v29, %v144_v28  ;;  %v29_v35 = vld [vmem:[%s593_s1 + $0x40] sm:$0xff]  ;;  %v47_v37 = vld [vmem:[%s593_s1 + $0xd0] sm:$0xff]  ;;  %v48_v38 = vld [vmem:[%s593_s1 + $0xd8] sm:$0xff]  ;;  %v368_v39 = vpack.c.bf16 %v147_v33, %v146_v30 }
   0xa   :  { %341 = vmatprep.subr.bf16.mxu0 %v340_v15  ;;  %135 = vmatprep.mubr.f32.mxu0 %v68_v27  ;;  %v148_v40 = vld [vmem:[%s595_s3 + $0x20] sm:$0xff]  ;;  %v149_v41 = vld [vmem:[%s595_s3 + $0x28] sm:$0xff]  ;;  %v350_v42 = vpack.c.bf16 %v30_v36, %v29_v35  ;;  %v352_v43 = vpack.c.bf16 %v48_v38, %v47_v37  ;;  %v31_v44 = vld [vmem:[%s593_s1 + $0x50] sm:$0xff] }
   0xb   :  { %366 = vmatpush3.bf16.msra.mxu1 %v365_v32  ;;  %v32_v45 = vld [vmem:[%s593_s1 + $0x58] sm:$0xff]  ;;  %v49_v46 = vld [vmem:[%s593_s1 + $0xe0] sm:$0xff]  ;;  %v50_v47 = vld [vmem:[%s593_s1 + $0xe8] sm:$0xff]  ;;  %v371_v48 = vpack.c.bf16 %v149_v41, %v148_v40 }
   0xc   :  { %367 = vmatprep.subr.bf16.mxu1 %v391_v3  ;;  %v150_v49 = vld [vmem:[%s595_s3 + $0x30] sm:$0xff]  ;;  %v151_v50 = vld [vmem:[%s595_s3 + $0x38] sm:$0xff]  ;;  %v354_v51 = vpack.c.bf16 %v32_v45, %v31_v44  ;;  %v356_v52 = vpack.c.bf16 %v50_v47, %v49_v46  ;;  %v33_v53 = vld [vmem:[%s593_s1 + $0x60] sm:$0xff] }
   0xd   :  { %343 = vmatpush3.bf16.msra.mxu0 %v342_v20  ;;  %v34_v54 = vld [vmem:[%s593_s1 + $0x68] sm:$0xff]  ;;  %v51_v55 = vld [vmem:[%s593_s1 + $0xf0] sm:$0xff]  ;;  %v52_v56 = vld [vmem:[%s593_s1 + $0xf8] sm:$0xff]  ;;  %v374_v57 = vpack.c.bf16 %v151_v50, %v150_v49 }
   0xe   :  { %345 = vmatprep.subr.bf16.mxu0 %v344_v21  ;;  %v152_v58 = vld [vmem:[%s595_s3 + $0x40] sm:$0xff]  ;;  %v153_v59 = vld [vmem:[%s595_s3 + $0x48] sm:$0xff]  ;;  %v358_v60 = vpack.c.bf16 %v34_v54, %v33_v53  ;;  %v360_v61 = vpack.c.bf16 %v52_v56, %v51_v55  ;;  %v35_v62 = vld [vmem:[%s593_s1 + $0x70] sm:$0xff] }
   0xf   :  { %369 = vmatpush3.bf16.msra.mxu1 %v368_v39  ;;  %v36_v63 = vld [vmem:[%s593_s1 + $0x78] sm:$0xff]  ;;  %v377_v0 = vpack.c.bf16 %v153_v59, %v152_v58  ;;  %v154_v1 = vld [vmem:[%s595_s3 + $0x50] sm:$0xff]  ;;  %v156_v6 = vld [vmem:[%s595_s3 + $0x60] sm:$0xff] }
  0x10   :  { %370 = vmatprep.subr.bf16.mxu1 %v391_v3  ;;  %v155_v2 = vld [vmem:[%s595_s3 + $0x58] sm:$0xff]  ;;  %v362_v4 = vpack.c.bf16 %v36_v63, %v35_v62  ;;  %v157_v7 = vld [vmem:[%s595_s3 + $0x68] sm:$0xff]  ;;  %v158_v9 = vld [vmem:[%s595_s3 + $0x70] sm:$0xff] }
  0x11   :  { %347 = vmatpush3.bf16.msra.mxu0 %v346_v31  ;;  %v380_v5 = vpack.c.bf16 %v155_v2, %v154_v1  ;;  %v383_v8 = vpack.c.bf16 %v157_v7, %v156_v6  ;;  %v159_v10 = vld [vmem:[%s595_s3 + $0x78] sm:$0xff]  ;;  %v242_v14 = vld [vmem:[%s596_s2] ss:$0 sm:$0xff] }
  0x12   :  { %349 = vmatprep.subr.bf16.mxu0 %v348_v34  ;;  %v386_v11 = vpack.c.bf16 %v159_v10, %v158_v9  ;;  %v244_v19 = vld [vmem:[%s597_s4] ss:$0 sm:$0xff] }
  0x13   :  { %372 = vmatpush3.bf16.msra.mxu1 %v371_v48 }
  0x14   :  { %373 = vmatprep.subr.bf16.mxu1 %v391_v3 }
  0x15   :  { %351 = vmatpush3.bf16.msra.mxu0 %v350_v42 }
  0x16   :  { %353 = vmatprep.subr.bf16.mxu0 %v352_v43 }
  0x17   :  { %375 = vmatpush3.bf16.msra.mxu1 %v374_v57 }
  0x18   :  { %376 = vmatprep.subr.bf16.mxu1 %v391_v3 }
  0x19   :  { %355 = vmatpush3.bf16.msra.mxu0 %v354_v51 }
  0x1a   :  { %357 = vmatprep.subr.bf16.mxu0 %v356_v52 }
  0x1b   :  { %378 = vmatpush3.bf16.msra.mxu1 %v377_v0 }
  0x1c   :  { %379 = vmatprep.subr.bf16.mxu1 %v391_v3 }
  0x1d   :  { %359 = vmatpush3.bf16.msra.mxu0 %v358_v60 }
  0x1e   :  { %361 = vmatprep.subr.bf16.mxu0 %v360_v61 }
  0x1f   :  { %381 = vmatpush3.bf16.msra.mxu1 %v380_v5 }
  0x20   :  { %382 = vmatprep.subr.bf16.mxu1 %v391_v3 }
  0x21   :  { %363 = vmatpush3.bf16.msra.mxu0 %v362_v4 }
  0x23   :  { %384 = vmatpush3.bf16.msra.mxu1 %v383_v8 }
  0x24   :  { %136 = vmatmul.mubr.f32.vlgmr.msra.gmra.mrb[0].mxu0 %v482_v26  ;;  %385 = vmatprep.subr.bf16.mxu1 %v391_v3 }
  0x27   :  { %387 = vmatpush3.bf16.msra.mxu1 %v386_v11 }
  0xf7   :  { %v277_v13 = vpop.f32.mrb[0].mxu0 }
  0xf8   :  { %v278_v15 = vpop.f32.mrb[1].mxu0 }
  0xf9   :  { %v279_v3 = vadd.f32 %v278_v15, %v277_v13 }
  0xfb   :  { %v138_v16 = vadd.f32 %v279_v3, %v242_v14 }
  0xfd   :  { %vm141_vm1 = vcmp.ge.f32.partialorder %v138_v16, 0.0  ;;  %v142_v17 = vmul.f32 0.1, %v138_v16 }
  0xff   :  { %v143_v18 = vsel %vm141_vm1, %v138_v16, %v142_v17 }
 0x100   :  { %330 = vmatmul.mubr.f32.vlgmr.msra.gmra.mrb[0].mxu1 %v143_v18 }
 0x1d3   :  { %v233_v20 = vpop.f32.mrb[0].mxu1 }
 0x1d4   :  { %v234_v21 = vadd.f32 %v244_v19, %v233_v20  ;;  %v331_v22 = vpop.f32.mrb[1].mxu1 }
 0x1d6   :  { %237 = vst [vmem:[%s598_s5] sm:$0x3] %v234_v21 }

</bundles_post_ra>
